<compile_context>
chip_gen: v6e
topology: v6e:2x2x1
jax: 0.10.0
libtpu: 0.0.40
codegen_flags: <defaults>
</compile_context>

<pallas_src>
import jax
import jax.numpy as jnp
from jax import lax
from jax.experimental import pallas as pl
from jax.experimental.pallas import tpu as pltpu

EXPANSION = 4
BN_EPS = 1e-5


# ---------------------------------------------------------------------------
# BN folding: conv -> BN(eval)  ==  x @ (w * scale) + bias
# ---------------------------------------------------------------------------
def bn_fold(bn_params, eps=BN_EPS):
    gamma, beta, mean, var = bn_params
    scale = gamma / jnp.sqrt(var + eps)
    bias = beta - mean * scale
    return scale, bias


# ---------------------------------------------------------------------------
# Fully fused Bottleneck kernel (one grid step == one image)
# ---------------------------------------------------------------------------
def _make_bottleneck_kernel(H, W, Cin, planes, stride, has_ws):
    P = planes
    C4 = EXPANSION * planes
    Ho = (H - 1) // stride + 1
    Wo = (W - 1) // stride + 1

    def kernel(*refs):
        if has_ws:
            (x_ref, w1_ref, b1_ref, w2_ref, b2_ref, w3_ref, b3_ref,
             ws_ref, bs_ref, o_ref, pad_ref) = refs
        else:
            (x_ref, w1_ref, b1_ref, w2_ref, b2_ref, w3_ref, b3_ref,
             o_ref, pad_ref) = refs

        # ---- conv1 (1x1) + folded BN + ReLU  (bf16 x bf16 -> f32 acc) -----
        x_rows = x_ref[...].reshape(H * W, Cin)                 # bf16
        h1 = jnp.dot(x_rows, w1_ref[...],
                     preferred_element_type=jnp.float32)
        h1 = jnp.maximum(h1 + b1_ref[...], 0.0)

        # ---- write into zero-padded VMEM scratch (halo for the 3x3) -------
        # Zero the whole pad buffer every step (cheap, a few KiB) so the code
        # stays correct when the "parallel" batch axis is split across
        # TensorCores (each core has its own scratch instance).
        pad_ref[...] = jnp.zeros((H + 2, W + 2, P), pad_ref.dtype)
        pad_ref[1:H + 1, 1:W + 1, :] = h1.reshape(H, W, P).astype(pad_ref.dtype)

        # ---- conv2 (3x3, stride, pad=1): 9 tap-accumulating matmuls -------
        acc = jnp.zeros((Ho * Wo, P), jnp.float32)
        for dy in range(3):
            for dx in range(3):
                if stride == 1:
                    tap = pad_ref[dy:dy + Ho, dx:dx + Wo, :]
                else:
                    tap = pad_ref[pl.ds(dy, Ho, stride=stride),
                                  pl.ds(dx, Wo, stride=stride), :]
                acc = acc + jnp.dot(tap.reshape(Ho * Wo, P),
                                    w2_ref[3 * dy + dx],
                                    preferred_element_type=jnp.float32)
        h2 = jnp.maximum(acc + b2_ref[...], 0.0).astype(jnp.bfloat16)

        # ---- conv3 (1x1) + folded BN ---------------------------------------
        h3 = jnp.dot(h2, w3_ref[...], preferred_element_type=jnp.float32)
        h3 = h3 + b3_ref[...]

        # ---- shortcut -------------------------------------------------------
        if has_ws:
            if stride == 1:
                xs_rows = x_rows
            else:
                xs_rows = x_ref[:, pl.ds(0, Ho, stride=stride),
                                pl.ds(0, Wo, stride=stride), :].reshape(
                                    Ho * Wo, Cin)
            sc = jnp.dot(xs_rows, ws_ref[...],
                         preferred_element_type=jnp.float32)
            sc = sc + bs_ref[...]
        else:
            # identity shortcut (only valid when stride == 1 and Cin == C4)
            sc = x_rows.astype(jnp.float32)

        out = jnp.maximum(h3 + sc, 0.0)
        o_ref[...] = out.reshape(1, Ho, Wo, C4).astype(o_ref.dtype)

    return kernel, Ho, Wo


# ---------------------------------------------------------------------------
# NHWC forward (single fused pallas_call)
# ---------------------------------------------------------------------------
def bottleneck_forward_nhwc(x_nhwc, params, stride):
    N, H, W, Cin = x_nhwc.shape
    planes = params["w1"].shape[0]
    C4 = EXPANSION * planes
    has_ws = "ws" in params

    # --- fold BN into weights (f32), then cast weights to bf16 ---
    s1, b1 = bn_fold(params["bn1"])
    s2, b2 = bn_fold(params["bn2"])
    s3, b3 = bn_fold(params["bn3"])

    w1 = (params["w1"][:, :, 0, 0] * s1[:, None]).T.astype(jnp.bfloat16)   # [Cin, P]
    w2f = params["w2"] * s2[:, None, None, None]                           # OIHW
    w2taps = jnp.stack(
        [w2f[:, :, ky, kx].T for ky in range(3) for kx in range(3)],
        axis=0).astype(jnp.bfloat16)                                        # [9, P, P]
    w3 = (params["w3"][:, :, 0, 0] * s3[:, None]).T.astype(jnp.bfloat16)   # [P, C4]

    args = [
        x_nhwc.astype(jnp.bfloat16),
        w1, b1.reshape(1, planes).astype(jnp.float32),
        w2taps, b2.reshape(1, planes).astype(jnp.float32),
        w3, b3.reshape(1, C4).astype(jnp.float32),
    ]
    in_specs = [
        pl.BlockSpec((1, H, W, Cin), lambda n: (n, 0, 0, 0)),   # one image / step
        pl.BlockSpec((Cin, planes), lambda n: (0, 0)),
        pl.BlockSpec((1, planes), lambda n: (0, 0)),
        pl.BlockSpec((9, planes, planes), lambda n: (0, 0, 0)),
        pl.BlockSpec((1, planes), lambda n: (0, 0)),
        pl.BlockSpec((planes, C4), lambda n: (0, 0)),
        pl.BlockSpec((1, C4), lambda n: (0, 0)),
    ]
    if has_ws:
        ss, bs = bn_fold(params["bns"])
        ws = (params["ws"][:, :, 0, 0] * ss[:, None]).T.astype(jnp.bfloat16)  # [Cin, C4]
        args += [ws, bs.reshape(1, C4).astype(jnp.float32)]
        in_specs += [pl.BlockSpec((Cin, C4), lambda n: (0, 0)),
                     pl.BlockSpec((1, C4), lambda n: (0, 0))]

    kernel, Ho, Wo = _make_bottleneck_kernel(H, W, Cin, planes, stride, has_ws)

    # rough VMEM budget (double-buffered image/output blocks + weights + scratch)
    x_blk = H * W * Cin * 2
    out_blk = Ho * Wo * C4 * 4
    w_bytes = (Cin * planes + 9 * planes * planes + planes * C4) * 2 \
        + (2 * planes + C4) * 4
    if has_ws:
        w_bytes += Cin * C4 * 2 + C4 * 4
    scratch_bytes = (H + 2) * (W + 2) * planes * 2
    est = 2 * (x_blk + out_blk + w_bytes) + scratch_bytes
    vmem_limit = int(min(48 * 1024 * 1024, max(16 * 1024 * 1024, 4 * est)))

    return pl.pallas_call(
        kernel,
        out_shape=jax.ShapeDtypeStruct((N, Ho, Wo, C4), jnp.float32),
        grid=(N,),
        in_specs=in_specs,
        out_specs=pl.BlockSpec((1, Ho, Wo, C4), lambda n: (n, 0, 0, 0)),
        scratch_shapes=[pltpu.VMEM((H + 2, W + 2, planes), jnp.bfloat16)],
        compiler_params=pltpu.CompilerParams(
            dimension_semantics=("parallel",),
            vmem_limit_bytes=vmem_limit),
    )(*args)


def bottleneck_forward(x_nchw, params, stride):
    """NCHW wrapper matching the PyTorch module interface."""
    x = jnp.transpose(x_nchw, (0, 2, 3, 1))               # NHWC
    out = bottleneck_forward_nhwc(x, params, stride)
    return jnp.transpose(out, (0, 3, 1, 2))               # back to NCHW


# ---------------------------------------------------------------------------
# Parameter init (matches the PyTorch module's parameter set, eval-mode BN)
# ---------------------------------------------------------------------------
def init_bottleneck_params(key, in_planes, planes, stride):
    out_planes = EXPANSION * planes
    ks = jax.random.split(key, 16)

    def bn_init(k, c):
        k1, k2, k3, k4 = jax.random.split(k, 4)
        gamma = jax.random.uniform(k1, (c,), jnp.float32, 0.5, 1.5)
        beta = 0.1 * jax.random.normal(k2, (c,), jnp.float32)
        mean = 0.1 * jax.random.normal(k3, (c,), jnp.float32)
        var = jax.random.uniform(k4, (c,), jnp.float32, 0.5, 1.5)
        return (gamma, beta, mean, var)

    params = {
        "w1": 0.1 * jax.random.normal(ks[0], (planes, in_planes, 1, 1), jnp.float32),
        "bn1": bn_init(ks[1], planes),
        "w2": 0.1 * jax.random.normal(ks[2], (planes, planes, 3, 3), jnp.float32),
        "bn2": bn_init(ks[3], planes),
        "w3": 0.1 * jax.random.normal(ks[4], (out_planes, planes, 1, 1), jnp.float32),
        "bn3": bn_init(ks[5], out_planes),
    }
    if stride != 1 or in_planes != out_planes:
        params["ws"] = 0.1 * jax.random.normal(
            ks[6], (out_planes, in_planes, 1, 1), jnp.float32)
        params["bns"] = bn_init(ks[7], out_planes)
    return params


# ---------------------------------------------------------------------------
# Pure-JAX f32 reference (eval-mode BN) for correctness checking
# ---------------------------------------------------------------------------
def bottleneck_reference(x, params, stride):
    def conv(x, w, s, pad):
        return lax.conv_general_dilated(
            x, w, (s, s), pad, dimension_numbers=("NCHW", "OIHW", "NCHW"))

    def bn(x, p):
        gamma, beta, mean, var = p
        inv = gamma / jnp.sqrt(var + BN_EPS)
        return (x - mean[None, :, None, None]) * inv[None, :, None, None] \
            + beta[None, :, None, None]

    out = jax.nn.relu(bn(conv(x, params["w1"], 1, "VALID"), params["bn1"]))
    out = jax.nn.relu(bn(conv(out, params["w2"], stride, ((1, 1), (1, 1))),
                         params["bn2"]))
    out = bn(conv(out, params["w3"], 1, "VALID"), params["bn3"])
    if "ws" in params:
        sc = bn(conv(x, params["ws"], stride, "VALID"), params["bns"])
    else:
        sc = x
    return jax.nn.relu(out + sc)


def _run_case(key, in_planes, planes, stride, N, H, W):
    k_x, k_p = jax.random.split(key)
    x = jax.random.normal(k_x, (N, in_planes, H, W), jnp.float32)
    params = init_bottleneck_params(k_p, in_planes, planes, stride)

    fwd = jax.jit(bottleneck_forward, static_argnums=2)
    out = jax.block_until_ready(fwd(x, params, stride))
    ref = jax.block_until_ready(bottleneck_reference(x, params, stride))

    Ho = (H - 1) // stride + 1
    Wo = (W - 1) // stride + 1
    assert out.shape == ref.shape == (N, EXPANSION * planes, Ho, Wo)
    # bf16 operands (f32 accumulation) -> relaxed tolerance vs. the f32 reference
    max_err = float(jnp.max(jnp.abs(out - ref)))
    assert jnp.allclose(out, ref, rtol=5e-2, atol=5e-2), max_err
    return max_err


if __name__ == "__main__":
    key = jax.random.PRNGKey(0)
    k1, k2 = jax.random.split(key)

    # Case 1: Bottleneck(in_planes=8, planes=4, stride=1) -> projection shortcut
    _run_case(k1, in_planes=8, planes=4, stride=1, N=2, H=16, W=16)

    # Case 2: Bottleneck(in_planes=16, planes=4, stride=1) -> identity shortcut
    _run_case(k2, in_planes=16, planes=4, stride=1, N=2, H=16, W=16)

    print("KERNEL_OK")
</pallas_src>

<mosaic_0001>
module attributes {stable_mosaic.version = 11 : i64} {
  func.func @kernel(%arg0: i32, %arg1: memref<1x16x16x8xbf16, #tpu.memory_space<vmem>>, %arg2: memref<8x4xbf16, #tpu.memory_space<vmem>>, %arg3: memref<1x4xf32, #tpu.memory_space<vmem>>, %arg4: memref<9x4x4xbf16, #tpu.memory_space<vmem>>, %arg5: memref<1x4xf32, #tpu.memory_space<vmem>>, %arg6: memref<4x16xbf16, #tpu.memory_space<vmem>>, %arg7: memref<1x16xf32, #tpu.memory_space<vmem>>, %arg8: memref<8x16xbf16, #tpu.memory_space<vmem>>, %arg9: memref<1x16xf32, #tpu.memory_space<vmem>>, %arg10: memref<1x16x16x16xf32, #tpu.memory_space<vmem>>, %arg11: memref<18x18x4xbf16, #tpu.memory_space<vmem>>) attributes {dimension_semantics = [#tpu.dimension_semantics<parallel>], iteration_bounds = array<i64: 2>, scalar_prefetch = 0 : i64, scratch_operands = 1 : i64, tpu.core_type = #tpu.core_type<tc>, window_params = [{transform_indices = @transform_0, window_bounds = array<i64: 1, 16, 16, 8>}, {pipeline_mode = #tpu.pipeline_mode<synchronous>, transform_indices = @transform_1, window_bounds = array<i64: 8, 4>}, {pipeline_mode = #tpu.pipeline_mode<synchronous>, transform_indices = @transform_2, window_bounds = array<i64: 1, 4>}, {pipeline_mode = #tpu.pipeline_mode<synchronous>, transform_indices = @transform_3, window_bounds = array<i64: 9, 4, 4>}, {pipeline_mode = #tpu.pipeline_mode<synchronous>, transform_indices = @transform_4, window_bounds = array<i64: 1, 4>}, {pipeline_mode = #tpu.pipeline_mode<synchronous>, transform_indices = @transform_5, window_bounds = array<i64: 4, 16>}, {pipeline_mode = #tpu.pipeline_mode<synchronous>, transform_indices = @transform_6, window_bounds = array<i64: 1, 16>}, {pipeline_mode = #tpu.pipeline_mode<synchronous>, transform_indices = @transform_7, window_bounds = array<i64: 8, 16>}, {pipeline_mode = #tpu.pipeline_mode<synchronous>, transform_indices = @transform_8, window_bounds = array<i64: 1, 16>}, {transform_indices = @transform_9, window_bounds = array<i64: 1, 16, 16, 16>}]} {
    %c0 = arith.constant 0 : index
    %c0_0 = arith.constant 0 : index
    %c0_1 = arith.constant 0 : index
    %c0_2 = arith.constant 0 : index
    %0 = vector.load %arg1[%c0, %c0_0, %c0_1, %c0_2] : memref<1x16x16x8xbf16, #tpu.memory_space<vmem>>, vector<1x16x16x8xbf16>
    %1 = vector.shape_cast %0 : vector<1x16x16x8xbf16> to vector<256x8xbf16>
    %c0_3 = arith.constant 0 : index
    %c0_4 = arith.constant 0 : index
    %2 = vector.load %arg2[%c0_3, %c0_4] : memref<8x4xbf16, #tpu.memory_space<vmem>>, vector<8x4xbf16>
    %cst = arith.constant dense<0.000000e+00> : vector<256x4xf32>
    %3 = tpu.matmul %1, %2, %cst {dimension_numbers = #tpu.dot_dimension_numbers<[1], [0], [0], [1], [0, 0, 1, 1], [], []>} : vector<256x8xbf16>, vector<8x4xbf16>, vector<256x4xf32> -> vector<256x4xf32>
    %c0_5 = arith.constant 0 : index
    %c0_6 = arith.constant 0 : index
    %4 = vector.load %arg3[%c0_5, %c0_6] : memref<1x4xf32, #tpu.memory_space<vmem>>, vector<1x4xf32>
    %5 = vector.broadcast %4 : vector<1x4xf32> to vector<256x4xf32>
    %6 = arith.addf %3, %5 : vector<256x4xf32>
    %cst_7 = arith.constant 0.000000e+00 : f32
    %7 = vector.broadcast %cst_7 : f32 to vector<256x4xf32>
    %8 = arith.maximumf %6, %7 : vector<256x4xf32>
    %cst_8 = arith.constant 0.000000e+00 : bf16
    %9 = vector.broadcast %cst_8 : bf16 to vector<18x18x4xbf16>
    %c0_9 = arith.constant 0 : index
    %c0_10 = arith.constant 0 : index
    %c0_11 = arith.constant 0 : index
    %10 = vector.load %arg11[%c0_9, %c0_10, %c0_11] : memref<18x18x4xbf16, #tpu.memory_space<vmem>>, vector<18x18x4xbf16>
    tpu.vector_store %arg11[%c0_9, %c0_10, %c0_11], %9 {strides = array<i32>} : memref<18x18x4xbf16, #tpu.memory_space<vmem>>, vector<18x18x4xbf16>,
    %11 = vector.shape_cast %8 : vector<256x4xf32> to vector<16x16x4xf32>
    %12 = arith.truncf %11 : vector<16x16x4xf32> to vector<16x16x4xbf16>
    %c1 = arith.constant 1 : index
    %c1_12 = arith.constant 1 : index
    %c0_13 = arith.constant 0 : index
    %13 = vector.load %arg11[%c1, %c1_12, %c0_13] : memref<18x18x4xbf16, #tpu.memory_space<vmem>>, vector<16x16x4xbf16>
    tpu.vector_store %arg11[%c1, %c1_12, %c0_13], %12 {strides = array<i32>} : memref<18x18x4xbf16, #tpu.memory_space<vmem>>, vector<16x16x4xbf16>,
    %cst_14 = arith.constant 0.000000e+00 : f32
    %14 = vector.broadcast %cst_14 : f32 to vector<256x4xf32>
    %c0_15 = arith.constant 0 : index
    %c0_16 = arith.constant 0 : index
    %c0_17 = arith.constant 0 : index
    %15 = vector.load %arg11[%c0_15, %c0_16, %c0_17] : memref<18x18x4xbf16, #tpu.memory_space<vmem>>, vector<16x16x4xbf16>
    %16 = vector.shape_cast %15 : vector<16x16x4xbf16> to vector<256x4xbf16>
    %c0_18 = arith.constant 0 : index
    %c0_19 = arith.constant 0 : index
    %c0_20 = arith.constant 0 : index
    %17 = vector.load %arg4[%c0_18, %c0_19, %c0_20] : memref<9x4x4xbf16, #tpu.memory_space<vmem>>, vector<1x4x4xbf16>
    %18 = vector.shape_cast %17 : vector<1x4x4xbf16> to vector<4x4xbf16>
    %cst_21 = arith.constant dense<0.000000e+00> : vector<256x4xf32>
    %19 = tpu.matmul %16, %18, %cst_21 {dimension_numbers = #tpu.dot_dimension_numbers<[1], [0], [0], [1], [0, 0, 1, 1], [], []>} : vector<256x4xbf16>, vector<4x4xbf16>, vector<256x4xf32> -> vector<256x4xf32>
    %20 = arith.addf %14, %19 : vector<256x4xf32>
    %c0_22 = arith.constant 0 : index
    %c1_23 = arith.constant 1 : index
    %c0_24 = arith.constant 0 : index
    %21 = vector.load %arg11[%c0_22, %c1_23, %c0_24] : memref<18x18x4xbf16, #tpu.memory_space<vmem>>, vector<16x16x4xbf16>
    %22 = vector.shape_cast %21 : vector<16x16x4xbf16> to vector<256x4xbf16>
    %c1_25 = arith.constant 1 : index
    %c0_26 = arith.constant 0 : index
    %c0_27 = arith.constant 0 : index
    %23 = vector.load %arg4[%c1_25, %c0_26, %c0_27] : memref<9x4x4xbf16, #tpu.memory_space<vmem>>, vector<1x4x4xbf16>
    %24 = vector.shape_cast %23 : vector<1x4x4xbf16> to vector<4x4xbf16>
    %cst_28 = arith.constant dense<0.000000e+00> : vector<256x4xf32>
    %25 = tpu.matmul %22, %24, %cst_28 {dimension_numbers = #tpu.dot_dimension_numbers<[1], [0], [0], [1], [0, 0, 1, 1], [], []>} : vector<256x4xbf16>, vector<4x4xbf16>, vector<256x4xf32> -> vector<256x4xf32>
    %26 = arith.addf %20, %25 : vector<256x4xf32>
    %c0_29 = arith.constant 0 : index
    %c2 = arith.constant 2 : index
    %c0_30 = arith.constant 0 : index
    %27 = vector.load %arg11[%c0_29, %c2, %c0_30] : memref<18x18x4xbf16, #tpu.memory_space<vmem>>, vector<16x16x4xbf16>
    %28 = vector.shape_cast %27 : vector<16x16x4xbf16> to vector<256x4xbf16>
    %c2_31 = arith.constant 2 : index
    %c0_32 = arith.constant 0 : index
    %c0_33 = arith.constant 0 : index
    %29 = vector.load %arg4[%c2_31, %c0_32, %c0_33] : memref<9x4x4xbf16, #tpu.memory_space<vmem>>, vector<1x4x4xbf16>
    %30 = vector.shape_cast %29 : vector<1x4x4xbf16> to vector<4x4xbf16>
    %cst_34 = arith.constant dense<0.000000e+00> : vector<256x4xf32>
    %31 = tpu.matmul %28, %30, %cst_34 {dimension_numbers = #tpu.dot_dimension_numbers<[1], [0], [0], [1], [0, 0, 1, 1], [], []>} : vector<256x4xbf16>, vector<4x4xbf16>, vector<256x4xf32> -> vector<256x4xf32>
    %32 = arith.addf %26, %31 : vector<256x4xf32>
    %c1_35 = arith.constant 1 : index
    %c0_36 = arith.constant 0 : index
    %c0_37 = arith.constant 0 : index
    %33 = vector.load %arg11[%c1_35, %c0_36, %c0_37] : memref<18x18x4xbf16, #tpu.memory_space<vmem>>, vector<16x16x4xbf16>
    %34 = vector.shape_cast %33 : vector<16x16x4xbf16> to vector<256x4xbf16>
    %c3 = arith.constant 3 : index
    %c0_38 = arith.constant 0 : index
    %c0_39 = arith.constant 0 : index
    %35 = vector.load %arg4[%c3, %c0_38, %c0_39] : memref<9x4x4xbf16, #tpu.memory_space<vmem>>, vector<1x4x4xbf16>
    %36 = vector.shape_cast %35 : vector<1x4x4xbf16> to vector<4x4xbf16>
    %cst_40 = arith.constant dense<0.000000e+00> : vector<256x4xf32>
    %37 = tpu.matmul %34, %36, %cst_40 {dimension_numbers = #tpu.dot_dimension_numbers<[1], [0], [0], [1], [0, 0, 1, 1], [], []>} : vector<256x4xbf16>, vector<4x4xbf16>, vector<256x4xf32> -> vector<256x4xf32>
    %38 = arith.addf %32, %37 : vector<256x4xf32>
    %c1_41 = arith.constant 1 : index
    %c1_42 = arith.constant 1 : index
    %c0_43 = arith.constant 0 : index
    %39 = vector.load %arg11[%c1_41, %c1_42, %c0_43] : memref<18x18x4xbf16, #tpu.memory_space<vmem>>, vector<16x16x4xbf16>
    %40 = vector.shape_cast %39 : vector<16x16x4xbf16> to vector<256x4xbf16>
    %c4 = arith.constant 4 : index
    %c0_44 = arith.constant 0 : index
    %c0_45 = arith.constant 0 : index
    %41 = vector.load %arg4[%c4, %c0_44, %c0_45] : memref<9x4x4xbf16, #tpu.memory_space<vmem>>, vector<1x4x4xbf16>
    %42 = vector.shape_cast %41 : vector<1x4x4xbf16> to vector<4x4xbf16>
    %cst_46 = arith.constant dense<0.000000e+00> : vector<256x4xf32>
    %43 = tpu.matmul %40, %42, %cst_46 {dimension_numbers = #tpu.dot_dimension_numbers<[1], [0], [0], [1], [0, 0, 1, 1], [], []>} : vector<256x4xbf16>, vector<4x4xbf16>, vector<256x4xf32> -> vector<256x4xf32>
    %44 = arith.addf %38, %43 : vector<256x4xf32>
    %c1_47 = arith.constant 1 : index
    %c2_48 = arith.constant 2 : index
    %c0_49 = arith.constant 0 : index
    %45 = vector.load %arg11[%c1_47, %c2_48, %c0_49] : memref<18x18x4xbf16, #tpu.memory_space<vmem>>, vector<16x16x4xbf16>
    %46 = vector.shape_cast %45 : vector<16x16x4xbf16> to vector<256x4xbf16>
    %c5 = arith.constant 5 : index
    %c0_50 = arith.constant 0 : index
    %c0_51 = arith.constant 0 : index
    %47 = vector.load %arg4[%c5, %c0_50, %c0_51] : memref<9x4x4xbf16, #tpu.memory_space<vmem>>, vector<1x4x4xbf16>
    %48 = vector.shape_cast %47 : vector<1x4x4xbf16> to vector<4x4xbf16>
    %cst_52 = arith.constant dense<0.000000e+00> : vector<256x4xf32>
    %49 = tpu.matmul %46, %48, %cst_52 {dimension_numbers = #tpu.dot_dimension_numbers<[1], [0], [0], [1], [0, 0, 1, 1], [], []>} : vector<256x4xbf16>, vector<4x4xbf16>, vector<256x4xf32> -> vector<256x4xf32>
    %50 = arith.addf %44, %49 : vector<256x4xf32>
    %c2_53 = arith.constant 2 : index
    %c0_54 = arith.constant 0 : index
    %c0_55 = arith.constant 0 : index
    %51 = vector.load %arg11[%c2_53, %c0_54, %c0_55] : memref<18x18x4xbf16, #tpu.memory_space<vmem>>, vector<16x16x4xbf16>
    %52 = vector.shape_cast %51 : vector<16x16x4xbf16> to vector<256x4xbf16>
    %c6 = arith.constant 6 : index
    %c0_56 = arith.constant 0 : index
    %c0_57 = arith.constant 0 : index
    %53 = vector.load %arg4[%c6, %c0_56, %c0_57] : memref<9x4x4xbf16, #tpu.memory_space<vmem>>, vector<1x4x4xbf16>
    %54 = vector.shape_cast %53 : vector<1x4x4xbf16> to vector<4x4xbf16>
    %cst_58 = arith.constant dense<0.000000e+00> : vector<256x4xf32>
    %55 = tpu.matmul %52, %54, %cst_58 {dimension_numbers = #tpu.dot_dimension_numbers<[1], [0], [0], [1], [0, 0, 1, 1], [], []>} : vector<256x4xbf16>, vector<4x4xbf16>, vector<256x4xf32> -> vector<256x4xf32>
    %56 = arith.addf %50, %55 : vector<256x4xf32>
    %c2_59 = arith.constant 2 : index
    %c1_60 = arith.constant 1 : index
    %c0_61 = arith.constant 0 : index
    %57 = vector.load %arg11[%c2_59, %c1_60, %c0_61] : memref<18x18x4xbf16, #tpu.memory_space<vmem>>, vector<16x16x4xbf16>
    %58 = vector.shape_cast %57 : vector<16x16x4xbf16> to vector<256x4xbf16>
    %c7 = arith.constant 7 : index
    %c0_62 = arith.constant 0 : index
    %c0_63 = arith.constant 0 : index
    %59 = vector.load %arg4[%c7, %c0_62, %c0_63] : memref<9x4x4xbf16, #tpu.memory_space<vmem>>, vector<1x4x4xbf16>
    %60 = vector.shape_cast %59 : vector<1x4x4xbf16> to vector<4x4xbf16>
    %cst_64 = arith.constant dense<0.000000e+00> : vector<256x4xf32>
    %61 = tpu.matmul %58, %60, %cst_64 {dimension_numbers = #tpu.dot_dimension_numbers<[1], [0], [0], [1], [0, 0, 1, 1], [], []>} : vector<256x4xbf16>, vector<4x4xbf16>, vector<256x4xf32> -> vector<256x4xf32>
    %62 = arith.addf %56, %61 : vector<256x4xf32>
    %c2_65 = arith.constant 2 : index
    %c2_66 = arith.constant 2 : index
    %c0_67 = arith.constant 0 : index
    %63 = vector.load %arg11[%c2_65, %c2_66, %c0_67] : memref<18x18x4xbf16, #tpu.memory_space<vmem>>, vector<16x16x4xbf16>
    %64 = vector.shape_cast %63 : vector<16x16x4xbf16> to vector<256x4xbf16>
    %c8 = arith.constant 8 : index
    %c0_68 = arith.constant 0 : index
    %c0_69 = arith.constant 0 : index
    %65 = vector.load %arg4[%c8, %c0_68, %c0_69] : memref<9x4x4xbf16, #tpu.memory_space<vmem>>, vector<1x4x4xbf16>
    %66 = vector.shape_cast %65 : vector<1x4x4xbf16> to vector<4x4xbf16>
    %cst_70 = arith.constant dense<0.000000e+00> : vector<256x4xf32>
    %67 = tpu.matmul %64, %66, %cst_70 {dimension_numbers = #tpu.dot_dimension_numbers<[1], [0], [0], [1], [0, 0, 1, 1], [], []>} : vector<256x4xbf16>, vector<4x4xbf16>, vector<256x4xf32> -> vector<256x4xf32>
    %68 = arith.addf %62, %67 : vector<256x4xf32>
    %c0_71 = arith.constant 0 : index
    %c0_72 = arith.constant 0 : index
    %69 = vector.load %arg5[%c0_71, %c0_72] : memref<1x4xf32, #tpu.memory_space<vmem>>, vector<1x4xf32>
    %70 = vector.broadcast %69 : vector<1x4xf32> to vector<256x4xf32>
    %71 = arith.addf %68, %70 : vector<256x4xf32>
    %cst_73 = arith.constant 0.000000e+00 : f32
    %72 = vector.broadcast %cst_73 : f32 to vector<256x4xf32>
    %73 = arith.maximumf %71, %72 : vector<256x4xf32>
    %74 = arith.truncf %73 : vector<256x4xf32> to vector<256x4xbf16>
    %c0_74 = arith.constant 0 : index
    %c0_75 = arith.constant 0 : index
    %75 = vector.load %arg6[%c0_74, %c0_75] : memref<4x16xbf16, #tpu.memory_space<vmem>>, vector<4x16xbf16>
    %cst_76 = arith.constant dense<0.000000e+00> : vector<256x16xf32>
    %76 = tpu.matmul %74, %75, %cst_76 {dimension_numbers = #tpu.dot_dimension_numbers<[1], [0], [0], [1], [0, 0, 1, 1], [], []>} : vector<256x4xbf16>, vector<4x16xbf16>, vector<256x16xf32> -> vector<256x16xf32>
    %c0_77 = arith.constant 0 : index
    %c0_78 = arith.constant 0 : index
    %77 = vector.load %arg7[%c0_77, %c0_78] : memref<1x16xf32, #tpu.memory_space<vmem>>, vector<1x16xf32>
    %78 = vector.broadcast %77 : vector<1x16xf32> to vector<256x16xf32>
    %79 = arith.addf %76, %78 : vector<256x16xf32>
    %c0_79 = arith.constant 0 : index
    %c0_80 = arith.constant 0 : index
    %80 = vector.load %arg8[%c0_79, %c0_80] : memref<8x16xbf16, #tpu.memory_space<vmem>>, vector<8x16xbf16>
    %cst_81 = arith.constant dense<0.000000e+00> : vector<256x16xf32>
    %81 = tpu.matmul %1, %80, %cst_81 {dimension_numbers = #tpu.dot_dimension_numbers<[1], [0], [0], [1], [0, 0, 1, 1], [], []>} : vector<256x8xbf16>, vector<8x16xbf16>, vector<256x16xf32> -> vector<256x16xf32>
    %c0_82 = arith.constant 0 : index
    %c0_83 = arith.constant 0 : index
    %82 = vector.load %arg9[%c0_82, %c0_83] : memref<1x16xf32, #tpu.memory_space<vmem>>, vector<1x16xf32>
    %83 = vector.broadcast %82 : vector<1x16xf32> to vector<256x16xf32>
    %84 = arith.addf %81, %83 : vector<256x16xf32>
    %85 = arith.addf %79, %84 : vector<256x16xf32>
    %cst_84 = arith.constant 0.000000e+00 : f32
    %86 = vector.broadcast %cst_84 : f32 to vector<256x16xf32>
    %87 = arith.maximumf %85, %86 : vector<256x16xf32>
    %88 = vector.shape_cast %87 : vector<256x16xf32> to vector<1x16x16x16xf32>
    %c0_85 = arith.constant 0 : index
    %c0_86 = arith.constant 0 : index
    %c0_87 = arith.constant 0 : index
    %c0_88 = arith.constant 0 : index
    %89 = vector.load %arg10[%c0_85, %c0_86, %c0_87, %c0_88] : memref<1x16x16x16xf32, #tpu.memory_space<vmem>>, vector<1x16x16x16xf32>
    tpu.vector_store %arg10[%c0_85, %c0_86, %c0_87, %c0_88], %88 {strides = array<i32>} : memref<1x16x16x16xf32, #tpu.memory_space<vmem>>, vector<1x16x16x16xf32>,
    return
  }
  func.func @transform_0(%arg0: i32) -> (i32, i32, i32, i32) {
    %c0_i32 = arith.constant 0 : i32
    %c0_i32_0 = arith.constant 0 : i32
    %c0_i32_1 = arith.constant 0 : i32
    %c0_i32_2 = arith.constant 0 : i32
    return %arg0, %c0_i32, %c0_i32_0, %c0_i32_1 : i32, i32, i32, i32
  }
  func.func @transform_1(%arg0: i32) -> (i32, i32) {
    %c0_i32 = arith.constant 0 : i32
    %c0_i32_0 = arith.constant 0 : i32
    %c0_i32_1 = arith.constant 0 : i32
    return %c0_i32, %c0_i32_0 : i32, i32
  }
  func.func @transform_2(%arg0: i32) -> (i32, i32) {
    %c0_i32 = arith.constant 0 : i32
    %c0_i32_0 = arith.constant 0 : i32
    %c0_i32_1 = arith.constant 0 : i32
    return %c0_i32, %c0_i32_0 : i32, i32
  }
  func.func @transform_3(%arg0: i32) -> (i32, i32, i32) {
    %c0_i32 = arith.constant 0 : i32
    %c0_i32_0 = arith.constant 0 : i32
    %c0_i32_1 = arith.constant 0 : i32
    %c0_i32_2 = arith.constant 0 : i32
    return %c0_i32, %c0_i32_0, %c0_i32_1 : i32, i32, i32
  }
  func.func @transform_4(%arg0: i32) -> (i32, i32) {
    %c0_i32 = arith.constant 0 : i32
    %c0_i32_0 = arith.constant 0 : i32
    %c0_i32_1 = arith.constant 0 : i32
    return %c0_i32, %c0_i32_0 : i32, i32
  }
  func.func @transform_5(%arg0: i32) -> (i32, i32) {
    %c0_i32 = arith.constant 0 : i32
    %c0_i32_0 = arith.constant 0 : i32
    %c0_i32_1 = arith.constant 0 : i32
    return %c0_i32, %c0_i32_0 : i32, i32
  }
  func.func @transform_6(%arg0: i32) -> (i32, i32) {
    %c0_i32 = arith.constant 0 : i32
    %c0_i32_0 = arith.constant 0 : i32
    %c0_i32_1 = arith.constant 0 : i32
    return %c0_i32, %c0_i32_0 : i32, i32
  }
  func.func @transform_7(%arg0: i32) -> (i32, i32) {
    %c0_i32 = arith.constant 0 : i32
    %c0_i32_0 = arith.constant 0 : i32
    %c0_i32_1 = arith.constant 0 : i32
    return %c0_i32, %c0_i32_0 : i32, i32
  }
  func.func @transform_8(%arg0: i32) -> (i32, i32) {
    %c0_i32 = arith.constant 0 : i32
    %c0_i32_0 = arith.constant 0 : i32
    %c0_i32_1 = arith.constant 0 : i32
    return %c0_i32, %c0_i32_0 : i32, i32
  }
  func.func @transform_9(%arg0: i32) -> (i32, i32, i32, i32) {
    %c0_i32 = arith.constant 0 : i32
    %c0_i32_0 = arith.constant 0 : i32
    %c0_i32_1 = arith.constant 0 : i32
    %c0_i32_2 = arith.constant 0 : i32
    return %arg0, %c0_i32, %c0_i32_0, %c0_i32_1 : i32, i32, i32, i32
  }
}

</mosaic_0001>

<bundles_post_ra>
// kernel: bottleneck_forward.1
= control target key start
LH: loop header
LB: loop body
LE: loop exit
PB: predicated region body
PF: predicated region fallthrough
CT: control target
= control target key end

     0   :  { %s7751_s30 = smov 0   ;;  %s10524_s0 = inlined_call_operand.vmem [shape: bf16[2,16,16,8], index: 0, kind: input, shape index: {}]   ;;  %s10525_s1 = inlined_call_operand.vmem [shape: bf16[8,4], index: 1, kind: input, shape index: {}]   ;;  %s10526_s2 = inlined_call_operand.vmem [shape: f32[1,4], index: 2, kind: input, shape index: {}]   ;;  %s10527_s3 = inlined_call_operand.vmem [shape: bf16[9,4,4], index: 3, kind: input, shape index: {}]   ;;  %s10528_s4 = inlined_call_operand.vmem [shape: f32[1,4], index: 4, kind: input, shape index: {}]   ;;  %s10529_s5 = inlined_call_operand.vmem [shape: bf16[4,16], index: 5, kind: input, shape index: {}]   ;;  %s10530_s6 = inlined_call_operand.vmem [shape: f32[1,16], index: 6, kind: input, shape index: {}]   ;;  %s10531_s7 = inlined_call_operand.vmem [shape: bf16[8,16], index: 7, kind: input, shape index: {}]   ;;  %s10532_s8 = inlined_call_operand.vmem [shape: f32[1,16], index: 8, kind: input, shape index: {}]   ;;  %s10533_s9 = inlined_call_operand.vmem [shape: f32[2,16,16,16], index: 9, kind: output, shape index: {}]  }
   0x1 LB: > { %s6482_s10 = sadd.s32 4294967295, %s7698_s30   ;;  %p6486_p0 = scmp.ge.s32.totalorder %s7698_s30, 1  ;;  %s7698_s30 = sphi %s7751_s30, %s19_s30  }
   0x2   : > { %p287_p1 = scmp.lt.s32.totalorder %s7698_s30, 3 }
   0x4   : > { %p288_p2 = pnand %p6486_p0, %p287_p1 }
   0x6   : > { %291 = sbr.rel (%p288_p2) target bundleno = 1042 (0x412), region = 56 }
   0xb   : > { %v366_v0 = vld [vmem:[%s10525_s1] sm:$0xf]  ;;  %vm503_vm0 = vcmask 1043456   ;;  %p323_p3 = scmp.lt.s32.totalorder %s6482_s10, 1  ;;  %vm454_vm1 = vcmask 64512   ;;  %vm700_vm2 = vcmask 27648  }
   0xc   : > { %7583 = vmatprep.subr.msk.bf16.mxu0 %vm503_vm0, %v366_v0  ;;  %v505_v1 = vsel %vm503_vm0, %v366_v0, 0  ;;  %v7700_v18 = vmov 0   ;;  %vm703_vm3 = vcmask 24576   ;;  %v1325_v19 = vld [vmem:[%s10527_s3] sm:$0x3]  ;;  %vm1828_vm4 = vcmask 1041408  }
   0xd   : > { %7176 = vmatpush3.bf16.msra.mxu0 %v505_v1  ;;  %s10687_s10 = smov (!%p323_p3, %s6482_s10), 1  ;;  %708 = vst.msk [vmem:[#allocation2 + $0x18] sm:$0xf] %vm700_vm2, %v7700_v18  ;;  %701 = vst.msk [vmem:[#allocation2] sm:$0xf] %vm700_vm2, %v7700_v18  ;;  %v2122_v20 = vsel %vm1828_vm4, %v1325_v19, 0 }
   0xe   : > { %s6937_s13 = sshll.u32 %s10687_s10, 7  ;;  %702 = vst.msk [vmem:[#allocation2 + $0x4] sm:$0xf] %vm700_vm2, %v7700_v18  ;;  %705 = vst.msk [vmem:[#allocation2 + $0xc] sm:$0xf] %vm700_vm2, %v7700_v18  ;;  %7585 = vmatprep.subr.msk.bf16.mxu0 %vm1828_vm4, %v1325_v19  ;;  %vm1779_vm5 = vcmask 31744  }
   0xf   : > { %s7770_s16 = scalar_lea.vmem %s10524_s0, %s6937_s13  ;;  %706 = vst.msk [vmem:[#allocation2 + $0x10] sm:$0xf] %vm700_vm2, %v7700_v18  ;;  %709 = vst.msk [vmem:[#allocation2 + $0x1c] sm:$0xf] %vm700_vm2, %v7700_v18  ;;  %vm1342_vm6 = vsmask.f32 3328 }
  0x10   : > { %v7604_v2 = vld [vmem:[%s7770_s16] sm:$0xff]   ;;  %v7605_v3 = vld [vmem:[%s7770_s16 + $0x8] sm:$0xff]   ;;  %v7606_v4 = vld [vmem:[%s7770_s16 + $0x10] sm:$0xff]   ;;  %711 = vst.msk [vmem:[#allocation2 + $0x24] sm:$0xf] %vm700_vm2, %v7700_v18  ;;  %vm2333_vm15 = vcmask 1042432  }
  0x11   : > { %7177 = vmatprep.mubr.msk.bf16.mxu0 %vm454_vm1, %v7604_v2  ;;  %v7607_v5 = vld [vmem:[%s7770_s16 + $0x18] sm:$0xff]   ;;  %v7608_v6 = vld [vmem:[%s7770_s16 + $0x20] sm:$0xff]   ;;  %v7609_v7 = vld [vmem:[%s7770_s16 + $0x28] sm:$0xff]   ;;  %712 = vst.msk [vmem:[#allocation2 + $0x28] sm:$0xf] %vm700_vm2, %v7700_v18  ;;  %s6938_s13 = sshll.u32 %s10687_s10, 8 }
  0x12   : > { %7178 = vmatmul.mubr.msk.bf16.vlgmr.msra.gmra.mxu0 %vm454_vm1, %v7605_v3  ;;  %v7610_v8 = vld [vmem:[%s7770_s16 + $0x30] sm:$0xff]   ;;  %v7611_v9 = vld [vmem:[%s7770_s16 + $0x38] sm:$0xff]   ;;  %v7612_v10 = vld [vmem:[%s7770_s16 + $0x40] sm:$0xff]   ;;  %714 = vst.msk [vmem:[#allocation2 + $0x30] sm:$0xf] %vm700_vm2, %v7700_v18  ;;  %s10369_s17 = scalar_lea.vmem %s10533_s9, %s6938_s13 }
  0x13   : > { %7181 = vmatprep.mubr.msk.bf16.mxu0 %vm454_vm1, %v7606_v4  ;;  %v7613_v11 = vld [vmem:[%s7770_s16 + $0x48] sm:$0xff]   ;;  %v7614_v12 = vld [vmem:[%s7770_s16 + $0x50] sm:$0xff]   ;;  %v7615_v13 = vld [vmem:[%s7770_s16 + $0x58] sm:$0xff]   ;;  %715 = vst.msk [vmem:[#allocation2 + $0x34] sm:$0xf] %vm700_vm2, %v7700_v18  ;;  %7244 = vmatpush3.bf16.msra.mxu0 %v2122_v20 }
  0x14   : > { %v7616_v14 = vld [vmem:[%s7770_s16 + $0x60] sm:$0xff]   ;;  %v7617_v15 = vld [vmem:[%s7770_s16 + $0x68] sm:$0xff]   ;;  %v7618_v16 = vld [vmem:[%s7770_s16 + $0x70] sm:$0xff]   ;;  %717 = vst.msk [vmem:[#allocation2 + $0x3c] sm:$0xf] %vm700_vm2, %v7700_v18 }
  0x15   : > { %v7619_v17 = vld [vmem:[%s7770_s16 + $0x78] sm:$0xff]   ;;  %718 = vst.msk [vmem:[#allocation2 + $0x40] sm:$0xf] %vm700_vm2, %v7700_v18  ;;  %720 = vst.msk [vmem:[#allocation2 + $0x48] sm:$0xf] %vm700_vm2, %v7700_v18 }
  0x16   : > { %721 = vst.msk [vmem:[#allocation2 + $0x4c] sm:$0xf] %vm700_vm2, %v7700_v18  ;;  %723 = vst.msk [vmem:[#allocation2 + $0x54] sm:$0xf] %vm700_vm2, %v7700_v18  ;;  %v1293_v21 = vld [vmem:[#allocation2] sm:$0xf] }
  0x17   : > { %724 = vst.msk [vmem:[#allocation2 + $0x58] sm:$0xf] %vm700_vm2, %v7700_v18  ;;  %726 = vst.msk [vmem:[#allocation2 + $0x60] sm:$0xf] %vm700_vm2, %v7700_v18  ;;  %v1294_v22 = vld [vmem:[#allocation2 + $0x4] sm:$0xf] }
  0x18   : > { %727 = vst.msk [vmem:[#allocation2 + $0x64] sm:$0xf] %vm700_vm2, %v7700_v18  ;;  %729 = vst.msk [vmem:[#allocation2 + $0x6c] sm:$0xf] %vm700_vm2, %v7700_v18  ;;  %v6589_v23 = vcombine.low %v1293_v21, %v1294_v22  ;;  %v1346_v24 = vshrl.u32 %v1293_v21, 16  ;;  %v1349_v25 = vshll.u32 %v1293_v21, 16 }
  0x19   : > { %730 = vst.msk [vmem:[#allocation2 + $0x70] sm:$0xf] %vm700_vm2, %v7700_v18  ;;  %732 = vst.msk [vmem:[#allocation2 + $0x78] sm:$0xf] %vm700_vm2, %v7700_v18  ;;  %v1355_v26 = vshll.u32 %v1294_v22, 16  ;;  %v1359_v27 = vshrl.u32 %v1294_v22, 16 }
  0x1a   : > { %7182 = vmatmul.mubr.msk.bf16.gmra.mxu0 %vm454_vm1, %v7607_v5  ;;  %733 = vst.msk [vmem:[#allocation2 + $0x7c] sm:$0xf] %vm700_vm2, %v7700_v18  ;;  %735 = vst.msk [vmem:[#allocation2 + $0x84] sm:$0xf] %vm700_vm2, %v7700_v18  ;;  %v1348_v28 = vrot.slane %v1346_v24, 4  ;;  %v1351_v29 = vrot.slane %v1349_v25, 5 }
  0x1b   : > { %7185 = vmatprep.mubr.msk.bf16.mxu0 %vm454_vm1, %v7608_v6  ;;  %736 = vst.msk [vmem:[#allocation2 + $0x88] sm:$0xf] %vm700_vm2, %v7700_v18  ;;  %738 = vst.msk [vmem:[#allocation2 + $0x90] sm:$0xf] %vm700_vm2, %v7700_v18  ;;  %v1357_v30 = vrot.slane %v1355_v26, 5  ;;  %v1361_v31 = vrot.slane %v1359_v27, 4 }
  0x1c   : > { %739 = vst.msk [vmem:[#allocation2 + $0x94] sm:$0xf] %vm700_vm2, %v7700_v18  ;;  %741 = vst.msk [vmem:[#allocation2 + $0x9c] sm:$0xf] %vm700_vm2, %v7700_v18  ;;  %vm1343_vm7 = vsmask.f32 7440  ;;  %v1352_v33 = vor.u32 %v1351_v29, %v1348_v28 }
  0x1d   : > { %742 = vst.msk [vmem:[#allocation2 + $0xa0] sm:$0xf] %vm700_vm2, %v7700_v18  ;;  %744 = vst.msk [vmem:[#allocation2 + $0xa8] sm:$0xf] %vm700_vm2, %v7700_v18  ;;  %v1362_v34 = vor.u32 %v1361_v31, %v1357_v30  ;;  %v6556_v39 = vld [vmem:[%s10527_s3 + $0x2] sm:$0x3] }
  0x1e   : > { %745 = vst.msk [vmem:[#allocation2 + $0xac] sm:$0xf] %vm700_vm2, %v7700_v18  ;;  %747 = vst.msk [vmem:[#allocation2 + $0xb4] sm:$0xf] %vm700_vm2, %v7700_v18  ;;  %v1353_v36 = vrot.slane %v1352_v33, 4  ;;  %7584 = vmatprep.subr.msk.bf16.mxu1 %vm1828_vm4, %v6556_v39  ;;  %v1830_v41 = vsel %vm1828_vm4, %v6556_v39, 0 }
  0x1f   : > { %748 = vst.msk [vmem:[#allocation2 + $0xb8] sm:$0xf] %vm700_vm2, %v7700_v18  ;;  %750 = vst.msk [vmem:[#allocation2 + $0xc0] sm:$0xf] %vm700_vm2, %v7700_v18  ;;  %v1363_v37 = vrot.slane %v1362_v34, 4  ;;  %7210 = vmatpush3.bf16.msra.mxu1 %v1830_v41 }
  0x20   : > { %751 = vst.msk [vmem:[#allocation2 + $0xc4] sm:$0xf] %vm700_vm2, %v7700_v18  ;;  %753 = vst.msk [vmem:[#allocation2 + $0xcc] sm:$0xf] %vm700_vm2, %v7700_v18  ;;  %v6637_v45 = vld [vmem:[%s10527_s3 + $0x4] sm:$0x3] }
  0x21   : > { %754 = vst.msk [vmem:[#allocation2 + $0xd0] sm:$0xf] %vm700_vm2, %v7700_v18  ;;  %vm7870_vm8 = vmor %vm1342_vm6, %vm1343_vm7  ;;  %7586 = vmatprep.subr.msk.bf16.mxu1 %vm1828_vm4, %v6637_v45  ;;  %v7888_v46 = vld [vmem:[%s10526_s2] ss:$0 sm:$0xff]  ;;  %vm1177_vm9 = vsmask.f32 7938 }
  0x22   : > { %7186 = vmatmul.mubr.msk.bf16.gmra.mxu0 %vm454_vm1, %v7609_v7  ;;  %710 = vst.msk [vmem:[#allocation2 + $0x20] sm:$0x1] %vm703_vm3, %v7700_v18  ;;  %704 = vst.msk [vmem:[#allocation2 + $0x8] sm:$0x1] %vm703_vm3, %v7700_v18  ;;  %v1358_v42 = vsel %vm7870_vm8, %v1353_v36, %v1357_v30  ;;  %vm852_vm10 = vsmask.f32 256 }
  0x23   : > { %7189 = vmatprep.mubr.msk.bf16.mxu0 %vm454_vm1, %v7610_v8  ;;  %707 = vst.msk [vmem:[#allocation2 + $0x14] sm:$0x1] %vm703_vm3, %v7700_v18  ;;  %713 = vst.msk [vmem:[#allocation2 + $0x2c] sm:$0x1] %vm703_vm3, %v7700_v18  ;;  %vm853_vm11 = vsmask.f32 4368 }
  0x24   : > { %716 = vst.msk [vmem:[#allocation2 + $0x38] sm:$0x1] %vm703_vm3, %v7700_v18  ;;  %719 = vst.msk [vmem:[#allocation2 + $0x44] sm:$0x1] %vm703_vm3, %v7700_v18  ;;  %v1188_v4 = vld [vmem:[#allocation2 + $0x18] sm:$0xf] }
  0x25   : > { %722 = vst.msk [vmem:[#allocation2 + $0x50] sm:$0x1] %vm703_vm3, %v7700_v18  ;;  %725 = vst.msk [vmem:[#allocation2 + $0x5c] sm:$0x1] %vm703_vm3, %v7700_v18 }
  0x26   : > { %728 = vst.msk [vmem:[#allocation2 + $0x68] sm:$0x1] %vm703_vm3, %v7700_v18  ;;  %731 = vst.msk [vmem:[#allocation2 + $0x74] sm:$0x1] %vm703_vm3, %v7700_v18 }
  0x27   : > { %734 = vst.msk [vmem:[#allocation2 + $0x80] sm:$0x1] %vm703_vm3, %v7700_v18  ;;  %737 = vst.msk [vmem:[#allocation2 + $0x8c] sm:$0x1] %vm703_vm3, %v7700_v18 }
  0x28   : > { %740 = vst.msk [vmem:[#allocation2 + $0x98] sm:$0x1] %vm703_vm3, %v7700_v18  ;;  %743 = vst.msk [vmem:[#allocation2 + $0xa4] sm:$0x1] %vm703_vm3, %v7700_v18 }
  0x29   : > { %746 = vst.msk [vmem:[#allocation2 + $0xb0] sm:$0x1] %vm703_vm3, %v7700_v18  ;;  %749 = vst.msk [vmem:[#allocation2 + $0xbc] sm:$0x1] %vm703_vm3, %v7700_v18  ;;  %v7864_v32 = vld [vmem:[#allocation2 + $0x8] sm:$0x1] }
  0x2a   : > { %7190 = vmatmul.mubr.msk.bf16.gmra.mxu0 %vm454_vm1, %v7611_v9  ;;  %752 = vst.msk [vmem:[#allocation2 + $0xc8] sm:$0x1] %vm703_vm3, %v7700_v18  ;;  %755 = vst.msk [vmem:[#allocation2 + $0xd4] sm:$0x1] %vm703_vm3, %v7700_v18  ;;  %v1365_v35 = vshll.u32 %v7864_v32, 16  ;;  %v2341_v62 = vrot.slane %v7864_v32, 5 }
  0x2b   : > { %7193 = vmatprep.mubr.msk.bf16.mxu0 %vm454_vm1, %v7612_v10  ;;  %vm7896_vm12 = vmand %vm700_vm2, %vm1177_vm9  ;;  %v7902_v9 = vsel %vm1828_vm4, %v6637_v45, 0  ;;  %v1192_v26 = vld [vmem:[#allocation2 + $0x20] sm:$0x1]  ;;  %v1185_v45 = vld [vmem:[#allocation2 + $0x14] sm:$0x1] }
  0x2c   : > { %v1367_v38 = vrot.slane %v1365_v35, 5  ;;  %vm7909_vm13 = vmor %vm852_vm10, %vm853_vm11 }
  0x2d   : > { %vm7915_vm14 = vmand %vm703_vm3, %vm852_vm10 }
  0x2e   : > { %v1368_v43 = vsel %vm7870_vm8, %v1363_v37, %v1367_v38 }
  0x2f   : > { %v6557_v44 = vcombine.low %v1358_v42, %v1368_v43 }
  0x31   : > { %7211 = vmatprep.mubr.msk.bf16.mxu1 %vm1779_vm5, %v6557_v44 }
  0x32   : > { %7194 = vmatmul.mubr.msk.bf16.gmra.mxu0 %vm454_vm1, %v7613_v11 }
  0x33   : > { %7197 = vmatprep.mubr.msk.bf16.mxu0 %vm454_vm1, %v7614_v12 }
  0x3a   : > { %7198 = vmatmul.mubr.msk.bf16.gmra.mxu0 %vm454_vm1, %v7615_v13 }
  0x3b   : > { %7201 = vmatprep.mubr.msk.bf16.mxu0 %vm454_vm1, %v7616_v14  ;;  %v1179_v14 = vld [vmem:[#allocation2 + $0xc] sm:$0xf] }
  0x42   : > { %7202 = vmatmul.mubr.msk.bf16.gmra.mxu0 %vm454_vm1, %v7617_v15 }
  0x43   : > { %7205 = vmatprep.mubr.msk.bf16.mxu0 %vm454_vm1, %v7618_v16 }
  0x4a   : > { %7206 = vmatmul.mubr.msk.bf16.gmra.mxu0 %vm454_vm1, %v7619_v17 }
  0x4b   : > { %7245 = vmatprep.mubr.msk.bf16.mxu0 %vm1779_vm5, %v6589_v23 }
  0xd2   : > { %v7179_v47 = vpop.f32.mrf.mxu0 }
  0xd3   : > { %v550_v48 = vadd.f32 %v7179_v47, %v7888_v46 }
  0xd4   : > { %v541_v49 = vpop.f32.mrf.mxu0 }
  0xd5   : > { %v670_v50 = vmax.f32 %v550_v48, 0.0  ;;  %v542_v51 = vadd.f32 %v7888_v46, %v541_v49 }
  0xd6   : > { %v7180_v52 = vpop.f32.mrf.mxu0 }
  0xd7   : > { %v6941_v53 = vpack.c.bf16 %v670_v50, %v670_v50  ;;  %v668_v54 = vmax.f32 %v542_v51, 0.0  ;;  %v553_v55 = vadd.f32 %v7180_v52, %v7888_v46 }
  0xd8   : > { %v544_v56 = vpop.f32.mrf.mxu0 }
  0xd9   : > { %v873_v57 = vshrl.u32 %v6941_v53, 16  ;;  %v6939_v58 = vpack.c.bf16 %v668_v54, %v668_v54  ;;  %v671_v59 = vmax.f32 %v553_v55, 0.0  ;;  %v545_v60 = vadd.f32 %v7888_v46, %v544_v56  ;;  %v1202_v54 = vld [vmem:[#allocation2 + $0x30] sm:$0xf] }
  0xda   : > { %v7183_v61 = vpop.f32.mrf.mxu0  ;;  %v876_v0 = vshll.u32 %v6941_v53, 16 }
  0xdb   : > { %v875_v63 = vrot.slane %v873_v57, 7  ;;  %v856_v1 = vshrl.u32 %v6939_v58, 16  ;;  %v6942_v2 = vpack.c.bf16 %v671_v59, %v671_v59  ;;  %v859_v5 = vshll.u32 %v6939_v58, 16 }
  0xdc   : > { %v669_v6 = vmax.f32 %v545_v60, 0.0  ;;  %v566_v7 = vadd.f32 %v7183_v61, %v7888_v46  ;;  %v557_v8 = vpop.f32.mrf.mxu0 }
  0xdd   : > { %v878_v10 = vor.u32 %v876_v0, %v875_v63  ;;  %v879_v11 = vrot.slane %v875_v63, 4  ;;  %v858_v12 = vrot.slane %v856_v1, 7  ;;  %v881_v13 = vshrl.u32 %v6942_v2, 16 }
  0xde   : > { %v884_v15 = vshll.u32 %v6942_v2, 16  ;;  %v6940_v16 = vpack.c.bf16 %v669_v6, %v669_v6  ;;  %v674_v17 = vmax.f32 %v566_v7, 0.0  ;;  %v558_v18 = vadd.f32 %v7888_v46, %v557_v8  ;;  %v7184_v19 = vpop.f32.mrf.mxu0  ;;  %v1195_v7 = vld [vmem:[#allocation2 + $0x24] sm:$0xf] }
  0xdf   : > { %v1189_v20 = vsel %vm7896_vm12, %v878_v10, %v1188_v4  ;;  %v861_v21 = vor.u32 %v859_v5, %v858_v12  ;;  %v862_v22 = vrot.slane %v858_v12, 4  ;;  %v883_v24 = vrot.slane %v881_v13, 7 }
  0xe0   : > { %1190 = vst [vmem:[#allocation2 + $0x18] sm:$0xf] %v1189_v20  ;;  %v864_v27 = vshrl.u32 %v6940_v16, 16  ;;  %v867_v28 = vshll.u32 %v6940_v16, 16  ;;  %v6945_v29 = vpack.c.bf16 %v674_v17, %v674_v17  ;;  %v672_v30 = vmax.f32 %v558_v18, 0.0  ;;  %v560_v31 = vpop.f32.mrf.mxu0 }
  0xe1   : > { %v1180_v33 = vsel %vm7896_vm12, %v861_v21, %v1179_v14  ;;  %v886_v34 = vor.u32 %v884_v15, %v883_v24  ;;  %v888_v35 = vrot.slane %v883_v24, 4  ;;  %v569_v36 = vadd.f32 %v7184_v19, %v7888_v46  ;;  %v1206_v16 = vld [vmem:[#allocation2 + $0x38] sm:$0x1] }
  0xe2   : > { %1181 = vst [vmem:[#allocation2 + $0xc] sm:$0xf] %v1180_v33  ;;  %v866_v37 = vrot.slane %v864_v27, 7  ;;  %v907_v38 = vshrl.u32 %v6945_v29, 16  ;;  %v910_v39 = vshll.u32 %v6945_v29, 16  ;;  %v6943_v41 = vpack.c.bf16 %v672_v30, %v672_v30  ;;  %v7187_v42 = vpop.f32.mrf.mxu0 }
  0xe3   : > { %v887_v43 = vsel %vm7909_vm13, %v879_v11, %v886_v34  ;;  %v1193_v44 = vsel %vm7915_vm14, %v888_v35, %v1192_v26  ;;  %v675_v47 = vmax.f32 %v569_v36, 0.0  ;;  %v561_v48 = vadd.f32 %v7888_v46, %v560_v31  ;;  %v1199_v29 = vld [vmem:[#allocation2 + $0x2c] sm:$0x1]  ;;  %v6670_v36 = vld [vmem:[%s10527_s3 + $0x6] sm:$0x3] }
  0xe4   : > { %1191 = vst.msk [vmem:[#allocation2 + $0x1c] sm:$0xf] %vm700_vm2, %v887_v43  ;;  %1194 = vst [vmem:[#allocation2 + $0x20] sm:$0x1] %v1193_v44  ;;  %v869_v49 = vor.u32 %v867_v28, %v866_v37  ;;  %v871_v50 = vrot.slane %v866_v37, 4  ;;  %v909_v51 = vrot.slane %v907_v38, 7  ;;  %v573_v53 = vpop.f32.mrf.mxu0  ;;  %v582_v58 = vadd.f32 %v7187_v42, %v7888_v46  ;;  %7587 = vmatprep.subr.msk.bf16.mxu0 %vm1828_vm4, %v6670_v36 }
  0xe5   : > { %v890_v52 = vshrl.u32 %v6943_v41, 16  ;;  %v893_v55 = vshll.u32 %v6943_v41, 16  ;;  %v6946_v56 = vpack.c.bf16 %v675_v47, %v675_v47  ;;  %v673_v57 = vmax.f32 %v561_v48, 0.0  ;;  %v1230_v36 = vld [vmem:[#allocation2 + $0x60] sm:$0xf] }
  0xe6   : > { %v870_v59 = vsel %vm7909_vm13, %v862_v22, %v869_v49  ;;  %v1186_v60 = vsel %vm7915_vm14, %v871_v50, %v1185_v45  ;;  %v912_v61 = vor.u32 %v910_v39, %v909_v51  ;;  %v913_v63 = vrot.slane %v909_v51, 4  ;;  %v7188_v0 = vpop.f32.mrf.mxu0  ;;  %v1216_v50 = vld [vmem:[#allocation2 + $0x48] sm:$0xf] }
  0xe7   : > { %1182 = vst.msk [vmem:[#allocation2 + $0x10] sm:$0xf] %vm700_vm2, %v870_v59  ;;  %1187 = vst [vmem:[#allocation2 + $0x14] sm:$0x1] %v1186_v60  ;;  %v892_v1 = vrot.slane %v890_v52, 7  ;;  %v915_v2 = vshrl.u32 %v6946_v56, 16  ;;  %v6944_v5 = vpack.c.bf16 %v673_v57, %v673_v57  ;;  %v574_v10 = vadd.f32 %v7888_v46, %v573_v53 }
  0xe8   : > { %v918_v4 = vshll.u32 %v6946_v56, 16  ;;  %v1203_v6 = vsel %vm7896_vm12, %v912_v61, %v1202_v54  ;;  %v678_v8 = vmax.f32 %v582_v58, 0.0  ;;  %v585_v11 = vadd.f32 %v7188_v0, %v7888_v46  ;;  %v576_v12 = vpop.f32.mrf.mxu0  ;;  %v1209_v58 = vld [vmem:[#allocation2 + $0x3c] sm:$0xf] }
  0xe9   : > { %1204 = vst [vmem:[#allocation2 + $0x30] sm:$0xf] %v1203_v6  ;;  %v895_v13 = vor.u32 %v893_v55, %v892_v1  ;;  %v896_v14 = vrot.slane %v892_v1, 4  ;;  %v917_v15 = vrot.slane %v915_v2, 7  ;;  %v898_v17 = vshrl.u32 %v6944_v5, 16 }
  0xea   : > { %v901_v18 = vshll.u32 %v6944_v5, 16  ;;  %v6949_v19 = vpack.c.bf16 %v678_v8, %v678_v8  ;;  %v676_v20 = vmax.f32 %v574_v10, 0.0  ;;  %v679_v21 = vmax.f32 %v585_v11, 0.0  ;;  %v7191_v22 = vpop.f32.mrf.mxu0  ;;  %v1220_v5 = vld [vmem:[#allocation2 + $0x50] sm:$0x1] }
  0xeb   : > { %v1196_v24 = vsel %vm7896_vm12, %v895_v13, %v1195_v7  ;;  %v920_v26 = vor.u32 %v918_v4, %v917_v15  ;;  %v922_v27 = vrot.slane %v917_v15, 4  ;;  %v900_v28 = vrot.slane %v898_v17, 7  ;;  %v7969_v17 = vld [vmem:[#allocation2 + $0x18] sm:$0xf] }
  0xec   : > { %1197 = vst [vmem:[#allocation2 + $0x24] sm:$0xf] %v1196_v24  ;;  %v941_v30 = vshrl.u32 %v6949_v19, 16  ;;  %v944_v31 = vshll.u32 %v6949_v19, 16  ;;  %v6947_v33 = vpack.c.bf16 %v676_v20, %v676_v20  ;;  %v6950_v34 = vpack.c.bf16 %v679_v21, %v679_v21  ;;  %v589_v35 = vpop.f32.mrf.mxu0 }
  0xed   : > { %v921_v37 = vsel %vm7909_vm13, %v913_v63, %v920_v26  ;;  %v1207_v38 = vsel %vm7915_vm14, %v922_v27, %v1206_v16  ;;  %v903_v39 = vor.u32 %v901_v18, %v900_v28  ;;  %v905_v41 = vrot.slane %v900_v28, 4 }
  0xee   : > { %1205 = vst.msk [vmem:[#allocation2 + $0x34] sm:$0xf] %vm700_vm2, %v921_v37  ;;  %1208 = vst [vmem:[#allocation2 + $0x38] sm:$0x1] %v1207_v38  ;;  %v943_v42 = vrot.slane %v941_v30, 7  ;;  %v924_v43 = vshrl.u32 %v6947_v33, 16  ;;  %v7192_v47 = vpop.f32.mrf.mxu0  ;;  %v577_v52 = vadd.f32 %v7888_v46, %v576_v12  ;;  %v598_v60 = vadd.f32 %v7191_v22, %v7888_v46 }
  0xef   : > { %v927_v44 = vshll.u32 %v6947_v33, 16  ;;  %v949_v45 = vshrl.u32 %v6950_v34, 16  ;;  %v904_v48 = vsel %vm7909_vm13, %v896_v14, %v903_v39  ;;  %v1200_v49 = vsel %vm7915_vm14, %v905_v41, %v1199_v29  ;;  %v7962_v12 = vld [vmem:[#allocation2 + $0x10] sm:$0xf]  ;;  %v7974_v22 = vld [vmem:[#allocation2 + $0xc] sm:$0xf] }
  0xf0   : > { %v952_v51 = vshll.u32 %v6950_v34, 16  ;;  %1198 = vst.msk [vmem:[#allocation2 + $0x28] sm:$0xf] %vm700_vm2, %v904_v48  ;;  %1201 = vst [vmem:[#allocation2 + $0x2c] sm:$0x1] %v1200_v49  ;;  %v946_v53 = vor.u32 %v944_v31, %v943_v42  ;;  %v947_v54 = vrot.slane %v943_v42, 4  ;;  %v592_v57 = vpop.f32.mrf.mxu0  ;;  %v590_v61 = vadd.f32 %v7888_v46, %v589_v35 }
  0xf1   : > { %v926_v55 = vrot.slane %v924_v43, 7  ;;  %v951_v56 = vrot.slane %v949_v45, 7  ;;  %v677_v59 = vmax.f32 %v577_v52, 0.0  ;;  %v601_v63 = vadd.f32 %v7192_v47, %v7888_v46  ;;  %v1213_v31 = vld [vmem:[#allocation2 + $0x44] sm:$0x1] }
  0xf2   : > { %v1217_v0 = vsel %vm7896_vm12, %v946_v53, %v1216_v50  ;;  %v7960_v6 = vpop.f32.mrf.mxu0  ;;  %v682_v10 = vmax.f32 %v598_v60, 0.0  ;;  %v680_v11 = vmax.f32 %v590_v61, 0.0  ;;  %v593_v16 = vadd.f32 %v7888_v46, %v592_v57  ;;  %v1223_v45 = vld [vmem:[#allocation2 + $0x54] sm:$0xf] }
  0xf3   : > { %v929_v1 = vor.u32 %v927_v44, %v926_v55  ;;  %v930_v2 = vrot.slane %v926_v55, 4  ;;  %v954_v4 = vor.u32 %v952_v51, %v951_v56  ;;  %1218 = vst [vmem:[#allocation2 + $0x48] sm:$0xf] %v1217_v0  ;;  %v956_v7 = vrot.slane %v951_v56, 4  ;;  %v1234_v51 = vld [vmem:[#allocation2 + $0x68] sm:$0x1] }
  0xf4   : > { %v6948_v8 = vpack.c.bf16 %v677_v59, %v677_v59  ;;  %v683_v15 = vmax.f32 %v601_v63, 0.0  ;;  %v6953_v21 = vpack.c.bf16 %v682_v10, %v682_v10  ;;  %v605_v24 = vpop.f32.mrf.mxu0  ;;  %v6951_v26 = vpack.c.bf16 %v680_v11, %v680_v11 }
  0xf5   : > { %v1210_v13 = vsel %vm7896_vm12, %v929_v1, %v1209_v58  ;;  %v955_v14 = vsel %vm7909_vm13, %v947_v54, %v954_v4  ;;  %v1221_v18 = vsel %vm7915_vm14, %v956_v7, %v1220_v5  ;;  %v681_v28 = vmax.f32 %v593_v16, 0.0  ;;  %v7987_v58 = vld [vmem:[#allocation2 + $0x1c] sm:$0xf]  ;;  %v1299_v7 = vld [vmem:[#allocation2 + $0x24] sm:$0xf] }
  0xf6   : > { %1211 = vst [vmem:[#allocation2 + $0x3c] sm:$0xf] %v1210_v13  ;;  %1219 = vst.msk [vmem:[#allocation2 + $0x4c] sm:$0xf] %vm700_vm2, %v955_v14  ;;  %v932_v19 = vshrl.u32 %v6948_v8, 16  ;;  %v935_v20 = vshll.u32 %v6948_v8, 16  ;;  %v6954_v27 = vpack.c.bf16 %v683_v15, %v683_v15  ;;  %v6590_v29 = vcombine.low %v7974_v22, %v7962_v12  ;;  %v7196_v48 = vpop.f32.mrf.mxu0 }
  0xf7   : > { %1222 = vst [vmem:[#allocation2 + $0x50] sm:$0x1] %v1221_v18  ;;  %v975_v33 = vshrl.u32 %v6953_v21, 16  ;;  %v978_v34 = vshll.u32 %v6953_v21, 16  ;;  %v1394_v35 = vshrl.u32 %v7969_v17, 16  ;;  %v958_v37 = vshrl.u32 %v6951_v26, 16 }
  0xf8   : > { %v934_v30 = vrot.slane %v932_v19, 7  ;;  %v961_v38 = vshll.u32 %v6951_v26, 16  ;;  %v983_v39 = vshrl.u32 %v6954_v27, 16  ;;  %v986_v41 = vshll.u32 %v6954_v27, 16  ;;  %7246 = vmatmul.mubr.msk.bf16.vlgmr.msra.gmra.mxu0 %vm1779_vm5, %v6590_v29  ;;  %v608_v5 = vpop.f32.mrf.mxu0  ;;  %v1227_v19 = vld [vmem:[#allocation2 + $0x5c] sm:$0x1] }
  0xf9   : > { %v977_v44 = vrot.slane %v975_v33, 7  ;;  %v6952_v47 = vpack.c.bf16 %v681_v28, %v681_v28  ;;  %v960_v49 = vrot.slane %v958_v37, 7  ;;  %v7980_v52 = vrot.slane %v1394_v35, 4  ;;  %v8010_v33 = vld [vmem:[#allocation2 + $0x28] sm:$0xf] }
  0xfa   : > { %v937_v42 = vor.u32 %v935_v20, %v934_v30  ;;  %v939_v43 = vrot.slane %v934_v30, 4  ;;  %v985_v50 = vrot.slane %v983_v39, 7  ;;  %v1397_v53 = vshll.u32 %v7969_v17, 16 }
  0xfb   : > { %v980_v56 = vor.u32 %v978_v34, %v977_v44  ;;  %v981_v57 = vrot.slane %v977_v44, 4  ;;  %v963_v59 = vor.u32 %v961_v38, %v960_v49  ;;  %v964_v60 = vrot.slane %v960_v49, 4  ;;  %v8023_v44 = vpop.f32.mrf.mxu0 }
  0xfc   : > { %v938_v54 = vsel %vm7909_vm13, %v930_v2, %v937_v42  ;;  %v1214_v55 = vsel %vm7915_vm14, %v939_v43, %v1213_v31  ;;  %v988_v61 = vor.u32 %v986_v41, %v985_v50  ;;  %v990_v63 = vrot.slane %v985_v50, 4  ;;  %v1244_v50 = vld [vmem:[#allocation2 + $0x78] sm:$0xf] }
  0xfd   : > { %1212 = vst.msk [vmem:[#allocation2 + $0x40] sm:$0xf] %vm700_vm2, %v938_v54  ;;  %1215 = vst [vmem:[#allocation2 + $0x44] sm:$0x1] %v1214_v55  ;;  %v1231_v0 = vsel %vm7896_vm12, %v980_v56, %v1230_v36  ;;  %v966_v1 = vshrl.u32 %v6952_v47, 16  ;;  %v969_v4 = vshll.u32 %v6952_v47, 16  ;;  %v1224_v8 = vsel %vm7896_vm12, %v963_v59, %v1223_v45 }
  0xfe   : > { %v7992_v2 = vrot.slane %v1397_v53, 5  ;;  %1232 = vst [vmem:[#allocation2 + $0x60] sm:$0xf] %v1231_v0  ;;  %v989_v10 = vsel %vm7909_vm13, %v981_v57, %v988_v61  ;;  %v1235_v11 = vsel %vm7915_vm14, %v990_v63, %v1234_v51  ;;  %v1407_v13 = vshrl.u32 %v7987_v58, 16  ;;  %1225 = vst [vmem:[#allocation2 + $0x54] sm:$0xf] %v1224_v8  ;;  %v621_v8 = vpop.f32.mrf.mxu0 }
  0xff   : > { %1233 = vst.msk [vmem:[#allocation2 + $0x64] sm:$0xf] %vm700_vm2, %v989_v10  ;;  %1236 = vst [vmem:[#allocation2 + $0x68] sm:$0x1] %v1235_v11  ;;  %v968_v14 = vrot.slane %v966_v1, 7  ;;  %v6591_v15 = vcombine.low %v7969_v17, %v7987_v58  ;;  %v614_v16 = vadd.f32 %v7960_v6, %v7888_v46  ;;  %v606_v18 = vadd.f32 %v7888_v46, %v605_v24 }
 0x100   : > { %v617_v20 = vadd.f32 %v7196_v48, %v7888_v46  ;;  %v609_v21 = vadd.f32 %v7888_v46, %v608_v5  ;;  %v1418_v26 = vshrl.u32 %v1299_v7, 16  ;;  %v1421_v27 = vshll.u32 %v1299_v7, 16  ;;  %v1237_v51 = vld [vmem:[#allocation2 + $0x6c] sm:$0xf] }
 0x101   : > { %v971_v28 = vor.u32 %v969_v4, %v968_v14  ;;  %v973_v29 = vrot.slane %v968_v14, 4  ;;  %7249 = vmatprep.mubr.msk.bf16.mxu0 %vm1779_vm5, %v6591_v15  ;;  %v686_v30 = vmax.f32 %v614_v16, 0.0  ;;  %v684_v31 = vmax.f32 %v606_v18, 0.0  ;;  %v1241_v4 = vld [vmem:[#allocation2 + $0x74] sm:$0x1] }
 0x102   : > { %v687_v17 = vmax.f32 %v617_v20, 0.0  ;;  %v685_v34 = vmax.f32 %v609_v21, 0.0  ;;  %v8012_v6 = vrot.slane %v1418_v26, 4  ;;  %v8014_v24 = vrot.slane %v1421_v27, 5  ;;  %v8030_v21 = vld [vmem:[#allocation2 + $0x14] sm:$0x1] }
 0x103   : > { %v972_v35 = vsel %vm7909_vm13, %v964_v60, %v971_v28  ;;  %v1228_v36 = vsel %vm7915_vm14, %v973_v29, %v1227_v19  ;;  %v6957_v37 = vpack.c.bf16 %v686_v30, %v686_v30  ;;  %v6955_v38 = vpack.c.bf16 %v684_v31, %v684_v31  ;;  %v1248_v60 = vld [vmem:[#allocation2 + $0x80] sm:$0x1]  ;;  %v8036_v29 = vld [vmem:[#allocation2 + $0x34] sm:$0xf] }
 0x104   : > { %1226 = vst.msk [vmem:[#allocation2 + $0x58] sm:$0xf] %vm700_vm2, %v972_v35  ;;  %1229 = vst [vmem:[#allocation2 + $0x5c] sm:$0x1] %v1228_v36  ;;  %v6958_v39 = vpack.c.bf16 %v687_v17, %v687_v17  ;;  %v6956_v41 = vpack.c.bf16 %v685_v34, %v685_v34  ;;  %v1431_v42 = vshrl.u32 %v8010_v33, 16  ;;  %v6592_v43 = vcombine.low %v1299_v7, %v8010_v33  ;;  %v7200_v35 = vpop.f32.mrf.mxu0 }
 0x105   : > { %v1009_v45 = vshrl.u32 %v6957_v37, 16  ;;  %v1012_v47 = vshll.u32 %v6957_v37, 16  ;;  %v992_v48 = vshrl.u32 %v6955_v38, 16  ;;  %v995_v49 = vshll.u32 %v6955_v38, 16 }
 0x106   : > { %v1017_v53 = vshrl.u32 %v6958_v39, 16  ;;  %v1020_v54 = vshll.u32 %v6958_v39, 16  ;;  %v1000_v55 = vshrl.u32 %v6956_v41, 16  ;;  %v1003_v56 = vshll.u32 %v6956_v41, 16  ;;  %7250 = vmatmul.mubr.msk.bf16.gmra.mxu0 %vm1779_vm5, %v6592_v43  ;;  %v8257_v23 = vld [vmem:[#allocation2 + $0x68] sm:$0x1] }
 0x107   : > { %v1011_v57 = vrot.slane %v1009_v45, 7  ;;  %v994_v59 = vrot.slane %v992_v48, 7  ;;  %v1370_v61 = vshrl.u32 %v7974_v22, 16  ;;  %v1373_v63 = vshll.u32 %v7974_v22, 16 }
 0x108   : > { %v1019_v0 = vrot.slane %v1017_v53, 7  ;;  %v1002_v1 = vrot.slane %v1000_v55, 7  ;;  %v1379_v5 = vshll.u32 %v7962_v12, 16  ;;  %v1383_v7 = vshrl.u32 %v7962_v12, 16  ;;  %v1301_v12 = vld [vmem:[#allocation2 + $0x30] sm:$0xf] }
 0x109   : > { %v1014_v10 = vor.u32 %v1012_v47, %v1011_v57  ;;  %v1015_v11 = vrot.slane %v1011_v57, 4  ;;  %v997_v14 = vor.u32 %v995_v49, %v994_v59  ;;  %v998_v15 = vrot.slane %v994_v59, 4  ;;  %v1328_v53 = vld [vmem:[#allocation2 + $0x20] sm:$0x1]  ;;  %v624_v59 = vpop.f32.mrf.mxu0 }
 0x10a   : > { %v1022_v16 = vor.u32 %v1020_v54, %v1019_v0  ;;  %v1024_v18 = vrot.slane %v1019_v0, 4  ;;  %v1005_v19 = vor.u32 %v1003_v56, %v1002_v1  ;;  %v1007_v20 = vrot.slane %v1002_v1, 4 }
 0x10b   : > { %v1245_v22 = vsel %vm7896_vm12, %v1014_v10, %v1244_v50  ;;  %v1238_v26 = vsel %vm7896_vm12, %v997_v14, %v1237_v51  ;;  %v1372_v27 = vrot.slane %v1370_v61, 4  ;;  %v1375_v28 = vrot.slane %v1373_v63, 5 }
 0x10c   : > { %1246 = vst [vmem:[#allocation2 + $0x78] sm:$0xf] %v1245_v22  ;;  %1239 = vst [vmem:[#allocation2 + $0x6c] sm:$0xf] %v1238_v26  ;;  %v1023_v30 = vsel %vm7909_vm13, %v1015_v11, %v1022_v16  ;;  %v1249_v31 = vsel %vm7915_vm14, %v1024_v18, %v1248_v60  ;;  %v1006_v17 = vsel %vm7909_vm13, %v998_v15, %v1005_v19  ;;  %v1381_v37 = vrot.slane %v1379_v5, 5 }
 0x10d   : > { %v1242_v34 = vsel %vm7915_vm14, %v1007_v20, %v1241_v4  ;;  %1247 = vst.msk [vmem:[#allocation2 + $0x7c] sm:$0xf] %vm700_vm2, %v1023_v30  ;;  %1250 = vst [vmem:[#allocation2 + $0x80] sm:$0x1] %v1249_v31  ;;  %v1376_v36 = vor.u32 %v1375_v28, %v1372_v27  ;;  %v1385_v38 = vrot.slane %v1383_v7, 4  ;;  %v1389_v39 = vshll.u32 %v8030_v21, 16 }
 0x10e   : > { %1240 = vst.msk [vmem:[#allocation2 + $0x70] sm:$0xf] %vm700_vm2, %v1006_v17  ;;  %1243 = vst [vmem:[#allocation2 + $0x74] sm:$0x1] %v1242_v34  ;;  %v2348_v41 = vrot.slane %v8030_v21, 5  ;;  %v1442_v43 = vshrl.u32 %v1301_v12, 16  ;;  %v6593_v51 = vcombine.low %v1301_v12, %v8036_v29  ;;  %v630_v56 = vadd.f32 %v8023_v44, %v7888_v46 }
 0x10f   : > { %v1445_v45 = vshll.u32 %v1301_v12, 16  ;;  %v1455_v47 = vshrl.u32 %v8036_v29, 16  ;;  %v1377_v48 = vrot.slane %v1376_v36, 4  ;;  %v1386_v49 = vor.u32 %v1385_v38, %v1381_v37  ;;  %v8071_v11 = vld [vmem:[#allocation2 + $0x3c] sm:$0xf] }
 0x110   : > { %v1391_v50 = vrot.slane %v1389_v39, 5  ;;  %v8052_v54 = vrot.slane %v1442_v43, 4  ;;  %v1400_v57 = vor.u32 %v7992_v2, %v7980_v52  ;;  %7253 = vmatprep.mubr.msk.bf16.mxu0 %vm1779_vm5, %v6593_v51  ;;  %v1403_v63 = vshll.u32 %v7987_v58, 16  ;;  %v8078_v20 = vld [vmem:[%s10527_s3 + $0x8] sm:$0x3] }
 0x111   : > { %v8054_v55 = vrot.slane %v1445_v45, 5  ;;  %v1382_v60 = vsel %vm7870_vm8, %v1377_v48, %v1381_v37  ;;  %v1387_v61 = vrot.slane %v1386_v49, 4  ;;  %v1409_v0 = vrot.slane %v1407_v13, 4  ;;  %v1258_v12 = vld [vmem:[#allocation2 + $0x90] sm:$0xf] }
 0x112   : > { %v690_v1 = vmax.f32 %v630_v56, 0.0  ;;  %v1401_v4 = vrot.slane %v1400_v57, 4  ;;  %v1413_v5 = vshll.u32 %v1328_v53, 16  ;;  %v622_v44 = vadd.f32 %v7888_v46, %v621_v8 }
 0x113   : > { %v1392_v52 = vsel %vm7870_vm8, %v1387_v61, %v1391_v50  ;;  %v1405_v2 = vrot.slane %v1403_v63, 5  ;;  %v633_v7 = vadd.f32 %v7200_v35, %v7888_v46  ;;  %v625_v10 = vadd.f32 %v7888_v46, %v624_v59  ;;  %v8084_v35 = vpop.f32.mrf.mxu0  ;;  %v8092_v50 = vld [vmem:[#allocation2 + $0x40] sm:$0xf]  ;;  %v1262_v59 = vld [vmem:[#allocation2 + $0x98] sm:$0x1] }
 0x114   : > { %v6558_v14 = vcombine.low %v1382_v60, %v1392_v52  ;;  %v6961_v15 = vpack.c.bf16 %v690_v1, %v690_v1  ;;  %v1415_v16 = vrot.slane %v1413_v5, 5  ;;  %v688_v58 = vmax.f32 %v622_v44, 0.0  ;;  %v1255_v60 = vld [vmem:[#allocation2 + $0x8c] sm:$0x1] }
 0x115   : > { %v1406_v13 = vsel %vm7870_vm8, %v1401_v4, %v1405_v2  ;;  %v1410_v18 = vor.u32 %v1409_v0, %v1405_v2  ;;  %v691_v19 = vmax.f32 %v633_v7, 0.0  ;;  %v689_v8 = vmax.f32 %v625_v10, 0.0  ;;  %v8096_v4 = vld [vmem:[#allocation2 + $0x2c] sm:$0x1]  ;;  %v637_v5 = vpop.f32.mrf.mxu0  ;;  %v1305_v10 = vld [vmem:[#allocation2 + $0x48] sm:$0xf] }
 0x116   : > { %7212 = vmatmul.mubr.msk.bf16.vlgmr.msra.gmra.mxu1 %vm1779_vm5, %v6558_v14  ;;  %v1043_v22 = vshrl.u32 %v6961_v15, 16  ;;  %v1046_v26 = vshll.u32 %v6961_v15, 16  ;;  %v6959_v27 = vpack.c.bf16 %v688_v58, %v688_v58  ;;  %v1466_v28 = vshrl.u32 %v8071_v11, 16 }
 0x117   : > { %7278 = vmatpush3.bf16.msra.mxu1 %v7902_v9  ;;  %v1411_v30 = vrot.slane %v1410_v18, 4  ;;  %v6962_v31 = vpack.c.bf16 %v691_v19, %v691_v19  ;;  %v6960_v17 = vpack.c.bf16 %v689_v8, %v689_v8  ;;  %v1469_v34 = vshll.u32 %v8071_v11, 16  ;;  %v1251_v9 = vld [vmem:[#allocation2 + $0x84] sm:$0xf] }
 0x118   : > { %v1045_v36 = vrot.slane %v1043_v22, 7  ;;  %v1026_v37 = vshrl.u32 %v6959_v27, 16  ;;  %v1029_v38 = vshll.u32 %v6959_v27, 16  ;;  %v8086_v39 = vrot.slane %v1466_v28, 4  ;;  %7588 = vmatprep.subr.msk.bf16.mxu1 %vm1828_vm4, %v8078_v20  ;;  %v8109_v22 = vld [vmem:[#allocation2 + $0x4c] sm:$0xf] }
 0x119   : > { %v1416_v43 = vsel %vm7870_vm8, %v1411_v30, %v1415_v16  ;;  %v1051_v45 = vshrl.u32 %v6962_v31, 16  ;;  %v1054_v48 = vshll.u32 %v6962_v31, 16  ;;  %v1034_v49 = vshrl.u32 %v6960_v17, 16 }
 0x11a   : > { %v1048_v51 = vor.u32 %v1046_v26, %v1045_v36  ;;  %v1049_v53 = vrot.slane %v1045_v36, 4  ;;  %v6559_v56 = vcombine.low %v1406_v13, %v1416_v43  ;;  %v1028_v57 = vrot.slane %v1026_v37, 7 }
 0x11b   : > { %v1053_v61 = vrot.slane %v1051_v45, 7  ;;  %v1036_v63 = vrot.slane %v1034_v49, 7  ;;  %v1037_v0 = vshll.u32 %v6960_v17, 16  ;;  %v8094_v1 = vrot.slane %v1469_v34, 5 }
 0x11c   : > { %v1259_v44 = vsel %vm7896_vm12, %v1048_v51, %v1258_v12  ;;  %7215 = vmatprep.mubr.msk.bf16.mxu1 %vm1779_vm5, %v6559_v56  ;;  %v1031_v52 = vor.u32 %v1029_v38, %v1028_v57  ;;  %v1032_v2 = vrot.slane %v1028_v57, 4  ;;  %v1479_v7 = vshrl.u32 %v8092_v50, 16  ;;  %v7204_v12 = vpop.f32.mrf.mxu0  ;;  %v8127_v38 = vld [vmem:[#allocation2 + $0x38] sm:$0x1] }
 0x11d   : > { %1260 = vst [vmem:[#allocation2 + $0x90] sm:$0xf] %v1259_v44  ;;  %v1056_v14 = vor.u32 %v1054_v48, %v1053_v61  ;;  %v1058_v15 = vrot.slane %v1053_v61, 4  ;;  %v1039_v16 = vor.u32 %v1037_v0, %v1036_v63  ;;  %v1041_v58 = vrot.slane %v1036_v63, 4 }
 0x11e   : > { %v1252_v13 = vsel %vm7896_vm12, %v1031_v52, %v1251_v9  ;;  %v6594_v18 = vcombine.low %v8071_v11, %v8092_v50  ;;  %v1424_v19 = vor.u32 %v8014_v24, %v8012_v6  ;;  %v1427_v8 = vshll.u32 %v8010_v33, 16 }
 0x11f   : > { %1253 = vst [vmem:[#allocation2 + $0x84] sm:$0xf] %v1252_v13  ;;  %v1057_v26 = vsel %vm7909_vm13, %v1049_v53, %v1056_v14  ;;  %v1263_v27 = vsel %vm7915_vm14, %v1058_v15, %v1262_v59  ;;  %v1040_v28 = vsel %vm7909_vm13, %v1032_v2, %v1039_v16  ;;  %v1256_v11 = vsel %vm7915_vm14, %v1041_v58, %v1255_v60  ;;  %v640_v53 = vpop.f32.mrf.mxu0  ;;  %v1307_v2 = vld [vmem:[#allocation2 + $0x54] sm:$0xf]  ;;  %v8151_v15 = vld [vmem:[#allocation2 + $0x58] sm:$0xf] }
 0x120   : > { %1261 = vst.msk [vmem:[#allocation2 + $0x94] sm:$0xf] %vm700_vm2, %v1057_v26  ;;  %1264 = vst [vmem:[#allocation2 + $0x98] sm:$0x1] %v1263_v27  ;;  %7254 = vmatmul.mubr.msk.bf16.gmra.mxu0 %vm1779_vm5, %v6594_v18  ;;  %v1425_v6 = vrot.slane %v1424_v19, 4  ;;  %v1429_v24 = vrot.slane %v1427_v8, 5  ;;  %v6595_v37 = vcombine.low %v1305_v10, %v8109_v22  ;;  %v646_v48 = vadd.f32 %v8084_v35, %v7888_v46 }
 0x121   : > { %1254 = vst.msk [vmem:[#allocation2 + $0x88] sm:$0xf] %vm700_vm2, %v1040_v28  ;;  %1257 = vst [vmem:[#allocation2 + $0x8c] sm:$0x1] %v1256_v11  ;;  %v1433_v30 = vrot.slane %v1431_v42, 4  ;;  %v1437_v31 = vshll.u32 %v8096_v4, 16  ;;  %v1448_v49 = vor.u32 %v8054_v55, %v8052_v54  ;;  %v638_v63 = vadd.f32 %v7888_v46, %v637_v5 }
 0x122   : > { %v1490_v17 = vshrl.u32 %v1305_v10, 16  ;;  %v1493_v34 = vshll.u32 %v1305_v10, 16  ;;  %v1503_v36 = vshrl.u32 %v8109_v22, 16  ;;  %v1430_v43 = vsel %vm7870_vm8, %v1425_v6, %v1429_v24  ;;  %7257 = vmatprep.mubr.msk.bf16.mxu0 %vm1779_vm5, %v6595_v37  ;;  %v1272_v6 = vld [vmem:[#allocation2 + $0xa8] sm:$0xf] }
 0x123   : > { %v1434_v9 = vor.u32 %v1433_v30, %v1429_v24  ;;  %v1439_v45 = vrot.slane %v1437_v31, 5  ;;  %v1451_v51 = vshll.u32 %v8036_v29, 16  ;;  %v694_v57 = vmax.f32 %v646_v48, 0.0 }
 0x124   : > { %v8133_v33 = vrot.slane %v1490_v17, 4  ;;  %v8135_v42 = vrot.slane %v1493_v34, 5  ;;  %v1457_v59 = vrot.slane %v1455_v47, 4  ;;  %v1461_v60 = vshll.u32 %v8127_v38, 16 }
 0x125   : > { %v1435_v56 = vrot.slane %v1434_v9, 4  ;;  %v1449_v35 = vrot.slane %v1448_v49, 4  ;;  %v1453_v61 = vrot.slane %v1451_v51, 5  ;;  %v649_v0 = vadd.f32 %v7204_v12, %v7888_v46 }
 0x126   : > { %v6965_v54 = vpack.c.bf16 %v694_v57, %v694_v57  ;;  %v1463_v55 = vrot.slane %v1461_v60, 5  ;;  %v641_v52 = vadd.f32 %v7888_v46, %v640_v53  ;;  %v692_v14 = vmax.f32 %v638_v63, 0.0  ;;  %v8154_v46 = vpop.f32.mrf.mxu0  ;;  %v1265_v57 = vld [vmem:[#allocation2 + $0x9c] sm:$0xf]  ;;  %v1276_v60 = vld [vmem:[#allocation2 + $0xb0] sm:$0x1] }
 0x127   : > { %v1440_v44 = vsel %vm7870_vm8, %v1435_v56, %v1439_v45  ;;  %v1454_v29 = vsel %vm7870_vm8, %v1449_v35, %v1453_v61  ;;  %v1458_v47 = vor.u32 %v1457_v59, %v1453_v61  ;;  %v695_v58 = vmax.f32 %v649_v0, 0.0 }
 0x128   : > { %v6560_v10 = vcombine.low %v1430_v43, %v1440_v44  ;;  %v1077_v16 = vshrl.u32 %v6965_v54, 16  ;;  %v1080_v5 = vshll.u32 %v6965_v54, 16  ;;  %v693_v13 = vmax.f32 %v641_v52, 0.0  ;;  %v653_v53 = vpop.f32.mrf.mxu0  ;;  %v1269_v54 = vld [vmem:[#allocation2 + $0xa4] sm:$0x1] }
 0x129   : > { %v1459_v18 = vrot.slane %v1458_v47, 4  ;;  %v6963_v19 = vpack.c.bf16 %v692_v14, %v692_v14  ;;  %v1514_v8 = vshrl.u32 %v1307_v2, 16  ;;  %v1517_v26 = vshll.u32 %v1307_v2, 16 }
 0x12a   : > { %7216 = vmatmul.mubr.msk.bf16.gmra.mxu1 %vm1779_vm5, %v6560_v10  ;;  %v1079_v27 = vrot.slane %v1077_v16, 7  ;;  %v6966_v28 = vpack.c.bf16 %v695_v58, %v695_v58  ;;  %v6964_v11 = vpack.c.bf16 %v693_v13, %v693_v13  ;;  %v1527_v12 = vshrl.u32 %v8151_v15, 16 }
 0x12b   : > { %v1464_v24 = vsel %vm7870_vm8, %v1459_v18, %v1463_v55  ;;  %v1060_v30 = vshrl.u32 %v6963_v19, 16  ;;  %v1063_v31 = vshll.u32 %v6963_v19, 16  ;;  %v8159_v17 = vrot.slane %v1514_v8, 4  ;;  %v8167_v55 = vld [vmem:[#allocation2 + $0x44] sm:$0x1]  ;;  %v7208_v19 = vpop.f32.mrf.mxu0 }
 0x12c   : > { %v1082_v34 = vor.u32 %v1080_v5, %v1079_v27  ;;  %v1083_v37 = vrot.slane %v1079_v27, 4  ;;  %v6561_v43 = vcombine.low %v1454_v29, %v1464_v24  ;;  %v1085_v9 = vshrl.u32 %v6966_v28, 16  ;;  %v8177_v18 = vld [vmem:[#allocation2 + $0x64] sm:$0xf] }
 0x12d   : > { %v1062_v45 = vrot.slane %v1060_v30, 7  ;;  %v1088_v48 = vshll.u32 %v6966_v28, 16  ;;  %v1068_v49 = vshrl.u32 %v6964_v11, 16  ;;  %v1071_v51 = vshll.u32 %v6964_v11, 16 }
 0x12e   : > { %v1273_v56 = vsel %vm7896_vm12, %v1082_v34, %v1272_v6  ;;  %7219 = vmatprep.mubr.msk.bf16.mxu1 %vm1779_vm5, %v6561_v43  ;;  %v1087_v59 = vrot.slane %v1085_v9, 7  ;;  %v8164_v35 = vrot.slane %v1517_v26, 5  ;;  %v6596_v61 = vcombine.low %v1307_v2, %v8151_v15  ;;  %v1309_v2 = vld [vmem:[#allocation2 + $0x60] sm:$0xf]  ;;  %v8189_v6 = vld [vmem:[#allocation2 + $0x50] sm:$0x1] }
 0x12f   : > { %1274 = vst [vmem:[#allocation2 + $0xa8] sm:$0xf] %v1273_v56  ;;  %v1065_v63 = vor.u32 %v1063_v31, %v1062_v45  ;;  %v1066_v0 = vrot.slane %v1062_v45, 4  ;;  %v1070_v44 = vrot.slane %v1068_v49, 7  ;;  %v1472_v52 = vor.u32 %v8094_v1, %v8086_v39  ;;  %v7668_v45 = vld [vmem:[%s10526_s2] ss:$0 sm:$0xff]  ;;  %v656_v49 = vpop.f32.mrf.mxu0 }
 0x130   : > { %v1090_v10 = vor.u32 %v1088_v48, %v1087_v59  ;;  %v1092_v29 = vrot.slane %v1087_v59, 4  ;;  %7258 = vmatmul.mubr.msk.bf16.gmra.mxu0 %vm1779_vm5, %v6596_v61  ;;  %v1475_v47 = vshll.u32 %v8092_v50, 16  ;;  %v1481_v14 = vrot.slane %v1479_v7, 4 }
 0x131   : > { %v1266_v16 = vsel %vm7896_vm12, %v1065_v63, %v1265_v57  ;;  %v1073_v5 = vor.u32 %v1071_v51, %v1070_v44  ;;  %v1075_v58 = vrot.slane %v1070_v44, 4  ;;  %v1473_v13 = vrot.slane %v1472_v52, 4 }
 0x132   : > { %1267 = vst [vmem:[#allocation2 + $0x9c] sm:$0xf] %v1266_v16  ;;  %v1091_v39 = vsel %vm7909_vm13, %v1083_v37, %v1090_v10  ;;  %v1277_v1 = vsel %vm7915_vm14, %v1092_v29, %v1276_v60  ;;  %v1477_v8 = vrot.slane %v1475_v47, 5  ;;  %v1485_v7 = vshll.u32 %v8167_v55, 16  ;;  %v8213_v10 = vld [vmem:[#allocation2 + $0x6c] sm:$0xf] }
 0x133   : > { %1275 = vst.msk [vmem:[#allocation2 + $0xac] sm:$0xf] %vm700_vm2, %v1091_v39  ;;  %1278 = vst [vmem:[#allocation2 + $0xb0] sm:$0x1] %v1277_v1  ;;  %v1074_v26 = vsel %vm7909_vm13, %v1066_v0, %v1073_v5  ;;  %v1270_v27 = vsel %vm7915_vm14, %v1075_v58, %v1269_v54  ;;  %v1538_v28 = vshrl.u32 %v1309_v2, 16  ;;  %v1541_v11 = vshll.u32 %v1309_v2, 16 }
 0x134   : > { %1268 = vst.msk [vmem:[#allocation2 + $0xa0] sm:$0xf] %vm700_vm2, %v1074_v26  ;;  %1271 = vst [vmem:[#allocation2 + $0xa4] sm:$0x1] %v1270_v27  ;;  %v1478_v24 = vsel %vm7870_vm8, %v1473_v13, %v1477_v8  ;;  %v1482_v30 = vor.u32 %v1481_v14, %v1477_v8  ;;  %v1487_v31 = vrot.slane %v1485_v7, 5  ;;  %v1551_v34 = vshrl.u32 %v8177_v18, 16 }
 0x135   : > { %v8195_v37 = vrot.slane %v1538_v28, 4  ;;  %v8197_v43 = vrot.slane %v1541_v11, 5  ;;  %v6597_v9 = vcombine.low %v1309_v2, %v8177_v18  ;;  %v662_v48 = vadd.f32 %v7668_v45, %v8154_v46 }
 0x136   : > { %v1483_v51 = vrot.slane %v1482_v30, 4  ;;  %v1496_v56 = vor.u32 %v8135_v42, %v8133_v33  ;;  %v1499_v57 = vshll.u32 %v8109_v22, 16  ;;  %v1505_v59 = vrot.slane %v1503_v36, 4 }
 0x137   : > { %7261 = vmatprep.mubr.msk.bf16.mxu0 %vm1779_vm5, %v6597_v9  ;;  %v698_v60 = vmax.f32 %v662_v48, 0.0  ;;  %v1509_v61 = vshll.u32 %v8189_v6, 16  ;;  %v654_v63 = vadd.f32 %v7668_v45, %v653_v53  ;;  %v665_v0 = vadd.f32 %v7668_v45, %v7208_v19  ;;  %v1286_v19 = vld [vmem:[#allocation2 + $0xc0] sm:$0xf] }
 0x138   : > { %v1488_v46 = vsel %vm7870_vm8, %v1483_v51, %v1487_v31  ;;  %v1497_v44 = vrot.slane %v1496_v56, 4  ;;  %v1501_v54 = vrot.slane %v1499_v57, 5  ;;  %v657_v52 = vadd.f32 %v7668_v45, %v656_v49  ;;  %v8224_v45 = vld [vmem:[#allocation2 + $0x70] sm:$0xf]  ;;  %v1279_v57 = vld [vmem:[#allocation2 + $0xb4] sm:$0xf] }
 0x139   : > { %v6562_v33 = vcombine.low %v1478_v24, %v1488_v46  ;;  %v6969_v42 = vpack.c.bf16 %v698_v60, %v698_v60  ;;  %v1511_v29 = vrot.slane %v1509_v61, 5  ;;  %v696_v47 = vmax.f32 %v654_v63, 0.0  ;;  %v1290_v60 = vld [vmem:[#allocation2 + $0xc8] sm:$0x1] }
 0x13a   : > { %v1502_v36 = vsel %vm7870_vm8, %v1497_v44, %v1501_v54  ;;  %v1506_v14 = vor.u32 %v1505_v59, %v1501_v54  ;;  %v699_v2 = vmax.f32 %v665_v0, 0.0  ;;  %v697_v16 = vmax.f32 %v657_v52, 0.0  ;;  %v1283_v52 = vld [vmem:[#allocation2 + $0xbc] sm:$0x1] }
 0x13b   : > { %7220 = vmatmul.mubr.msk.bf16.gmra.mxu1 %vm1779_vm5, %v6562_v33  ;;  %v1111_v53 = vshrl.u32 %v6969_v42, 16  ;;  %v1114_v5 = vshll.u32 %v6969_v42, 16  ;;  %v6967_v58 = vpack.c.bf16 %v696_v47, %v696_v47  ;;  %v1562_v13 = vshrl.u32 %v8213_v10, 16  ;;  %v8232_v42 = vld [vmem:[#allocation2 + $0x5c] sm:$0x1] }
 0x13c   : > { %v1507_v39 = vrot.slane %v1506_v14, 4  ;;  %v6970_v1 = vpack.c.bf16 %v699_v2, %v699_v2  ;;  %v6968_v8 = vpack.c.bf16 %v697_v16, %v697_v16  ;;  %v1565_v7 = vshll.u32 %v8213_v10, 16  ;;  %v1313_v2 = vld [vmem:[#allocation2 + $0x78] sm:$0xf]  ;;  %v8234_v16 = vld [vmem:[#allocation2 + $0x7c] sm:$0xf] }
 0x13d   : > { %v1113_v26 = vrot.slane %v1111_v53, 7  ;;  %v1094_v27 = vshrl.u32 %v6967_v58, 16  ;;  %v1097_v28 = vshll.u32 %v6967_v58, 16  ;;  %v8220_v11 = vrot.slane %v1562_v13, 4 }
 0x13e   : > { %v1512_v24 = vsel %vm7870_vm8, %v1507_v39, %v1511_v29  ;;  %v1119_v30 = vshrl.u32 %v6970_v1, 16  ;;  %v1122_v31 = vshll.u32 %v6970_v1, 16  ;;  %v1102_v9 = vshrl.u32 %v6968_v8, 16 }
 0x13f   : > { %v1116_v48 = vor.u32 %v1114_v5, %v1113_v26  ;;  %v1117_v49 = vrot.slane %v1113_v26, 4  ;;  %v6563_v51 = vcombine.low %v1502_v36, %v1512_v24  ;;  %v1096_v56 = vrot.slane %v1094_v27, 7 }
 0x140   : > { %v1121_v59 = vrot.slane %v1119_v30, 7  ;;  %v1104_v61 = vrot.slane %v1102_v9, 7  ;;  %v1105_v63 = vshll.u32 %v6968_v8, 16  ;;  %v8226_v0 = vrot.slane %v1565_v7, 5 }
 0x141   : > { %v1287_v46 = vsel %vm7896_vm12, %v1116_v48, %v1286_v19  ;;  %7223 = vmatprep.mubr.msk.bf16.mxu1 %vm1779_vm5, %v6563_v51  ;;  %v1099_v44 = vor.u32 %v1097_v28, %v1096_v56  ;;  %v1100_v54 = vrot.slane %v1096_v56, 4  ;;  %v1575_v33 = vshrl.u32 %v8224_v45, 16  ;;  %v1315_v28 = vld [vmem:[#allocation2 + $0x84] sm:$0xf] }
 0x142   : > { %1288 = vst [vmem:[#allocation2 + $0xc0] sm:$0xf] %v1287_v46  ;;  %v1124_v29 = vor.u32 %v1122_v31, %v1121_v59  ;;  %v1126_v47 = vrot.slane %v1121_v59, 4  ;;  %v1107_v36 = vor.u32 %v1105_v63, %v1104_v61  ;;  %v1109_v14 = vrot.slane %v1104_v61, 4 }
 0x143   : > { %v1280_v53 = vsel %vm7896_vm12, %v1099_v44, %v1279_v57  ;;  %v6598_v5 = vcombine.low %v8213_v10, %v8224_v45  ;;  %v1520_v58 = vor.u32 %v8164_v35, %v8159_v17  ;;  %v1523_v13 = vshll.u32 %v8151_v15, 16  ;;  %v8271_v57 = vld [vmem:[#allocation2 + $0x74] sm:$0x1] }
 0x144   : > { %1281 = vst [vmem:[#allocation2 + $0xb4] sm:$0xf] %v1280_v53  ;;  %v1125_v19 = vsel %vm7909_vm13, %v1117_v49, %v1124_v29  ;;  %v1291_v39 = vsel %vm7915_vm14, %v1126_v47, %v1290_v60  ;;  %v1108_v1 = vsel %vm7909_vm13, %v1100_v54, %v1107_v36  ;;  %v1284_v3 = vsel %vm7915_vm14, %v1109_v14, %v1283_v52  ;;  %v1317_v54 = vld [vmem:[#allocation2 + $0x90] sm:$0xf]  ;;  %v8280_v36 = vld [vmem:[#allocation2 + $0x94] sm:$0xf] }
 0x145   : > { %1289 = vst.msk [vmem:[#allocation2 + $0xc4] sm:$0xf] %vm700_vm2, %v1125_v19  ;;  %1292 = vst [vmem:[#allocation2 + $0xc8] sm:$0x1] %v1291_v39  ;;  %7262 = vmatmul.mubr.msk.bf16.gmra.mxu0 %vm1779_vm5, %v6598_v5  ;;  %v1521_v17 = vrot.slane %v1520_v58, 4  ;;  %v1525_v35 = vrot.slane %v1523_v13, 5  ;;  %v6599_v27 = vcombine.low %v1313_v2, %v8234_v16  ;;  %v1544_v9 = vor.u32 %v8197_v43, %v8195_v37 }
 0x146   : > { %1282 = vst.msk [vmem:[#allocation2 + $0xb8] sm:$0xf] %vm700_vm2, %v1108_v1  ;;  %1285 = vst [vmem:[#allocation2 + $0xbc] sm:$0x1] %v1284_v3  ;;  %v1529_v10 = vrot.slane %v1527_v12, 4  ;;  %v1533_v8 = vshll.u32 %v8232_v42, 16 }
 0x147   : > { %v1586_v7 = vshrl.u32 %v1313_v2, 16  ;;  %v1589_v25 = vshll.u32 %v1313_v2, 16  ;;  %v1599_v26 = vshrl.u32 %v8234_v16, 16  ;;  %v1526_v24 = vsel %vm7870_vm8, %v1521_v17, %v1525_v35  ;;  %v8265_v12 = vld [vmem:[#allocation2 + $0x88] sm:$0xf]  ;;  %7265 = vmatprep.mubr.msk.bf16.mxu0 %vm1779_vm5, %v6599_v27 }
 0x148   : > { %v1530_v30 = vor.u32 %v1529_v10, %v1525_v35  ;;  %v1535_v31 = vrot.slane %v1533_v8, 5  ;;  %v1547_v51 = vshll.u32 %v8177_v18, 16  ;;  %v1553_v56 = vrot.slane %v1551_v34, 4  ;;  %v8292_v8 = vld [vmem:[#allocation2 + $0x80] sm:$0x1] }
 0x149   : > { %v1588_v48 = vrot.slane %v1586_v7, 4  ;;  %v1591_v49 = vrot.slane %v1589_v25, 5  ;;  %v1545_v60 = vrot.slane %v1544_v9, 4  ;;  %v1557_v61 = vshll.u32 %v8257_v23, 16  ;;  %v1319_v25 = vld [vmem:[#allocation2 + $0x9c] sm:$0xf] }
 0x14a   : > { %v1531_v59 = vrot.slane %v1530_v30, 4  ;;  %v1610_v63 = vshrl.u32 %v1315_v28, 16  ;;  %v1549_v46 = vrot.slane %v1547_v51, 5  ;;  %v1613_v37 = vshll.u32 %v1315_v28, 16  ;;  %v8297_v30 = vld [vmem:[#allocation2 + $0xa0] sm:$0xf] }
 0x14b   : > { %v1623_v43 = vshrl.u32 %v8265_v12, 16  ;;  %v6600_v44 = vcombine.low %v1315_v28, %v8265_v12  ;;  %v1559_v29 = vrot.slane %v1557_v61, 5  ;;  %v1568_v34 = vor.u32 %v8226_v0, %v8220_v11 }
 0x14c   : > { %v1536_v52 = vsel %vm7870_vm8, %v1531_v59, %v1535_v31  ;;  %v1612_v47 = vrot.slane %v1610_v63, 4  ;;  %v1550_v2 = vsel %vm7870_vm8, %v1545_v60, %v1549_v46  ;;  %v1554_v53 = vor.u32 %v1553_v56, %v1549_v46 }
 0x14d   : > { %v6564_v14 = vcombine.low %v1526_v24, %v1536_v52  ;;  %v1615_v5 = vrot.slane %v1613_v37, 5  ;;  %7266 = vmatmul.mubr.msk.bf16.gmra.mxu0 %vm1779_vm5, %v6600_v44  ;;  %v1569_v58 = vrot.slane %v1568_v34, 4  ;;  %v1571_v13 = vshll.u32 %v8224_v45, 16  ;;  %v8306_v44 = vld [vmem:[#allocation2 + $0x8c] sm:$0x1] }
 0x14e   : > { %v1577_v19 = vrot.slane %v1575_v33, 4  ;;  %v1581_v39 = vshll.u32 %v8271_v57, 16  ;;  %v1555_v11 = vrot.slane %v1554_v53, 4  ;;  %v1634_v0 = vshrl.u32 %v1317_v54, 16 }
 0x14f   : > { %7224 = vmatmul.mubr.msk.bf16.gmra.mxu1 %vm1779_vm5, %v6564_v14  ;;  %v1637_v1 = vshll.u32 %v1317_v54, 16  ;;  %v1647_v3 = vshrl.u32 %v8280_v36, 16  ;;  %v1573_v17 = vrot.slane %v1571_v13, 5  ;;  %v6601_v10 = vcombine.low %v1317_v54, %v8280_v36  ;;  %v8316_v13 = vld [vmem:[#allocation2 + $0xac] sm:$0xf] }
 0x150   : > { %v1583_v35 = vrot.slane %v1581_v39, 5  ;;  %v1592_v7 = vor.u32 %v1591_v49, %v1588_v48  ;;  %v1560_v33 = vsel %vm7870_vm8, %v1555_v11, %v1559_v29  ;;  %v1636_v27 = vrot.slane %v1634_v0, 4 }
 0x151   : > { %v1639_v28 = vrot.slane %v1637_v1, 5  ;;  %v1595_v24 = vshll.u32 %v8234_v16, 16  ;;  %v6565_v31 = vcombine.low %v1550_v2, %v1560_v33  ;;  %v1574_v9 = vsel %vm7870_vm8, %v1569_v58, %v1573_v17  ;;  %7269 = vmatprep.mubr.msk.bf16.mxu0 %vm1779_vm5, %v6601_v10  ;;  %v8319_v1 = vld [vmem:[#allocation2 + $0x98] sm:$0x1] }
 0x152   : > { %v1578_v51 = vor.u32 %v1577_v19, %v1573_v17  ;;  %v1593_v56 = vrot.slane %v1592_v7, 4  ;;  %v1601_v48 = vrot.slane %v1599_v26, 4  ;;  %v1605_v49 = vshll.u32 %v8292_v8, 16  ;;  %v1321_v26 = vld [vmem:[#allocation2 + $0xa8] sm:$0xf] }
 0x153   : > { %v1597_v59 = vrot.slane %v1595_v24, 5  ;;  %v1658_v60 = vshrl.u32 %v1319_v25, 16  ;;  %7227 = vmatprep.mubr.msk.bf16.mxu1 %vm1779_vm5, %v6565_v31  ;;  %v1661_v63 = vshll.u32 %v1319_v25, 16  ;;  %v1671_v46 = vshrl.u32 %v8297_v30, 16  ;;  %v1323_v17 = vld [vmem:[#allocation2 + $0xb4] sm:$0xf] }
 0x154   : > { %v1579_v61 = vrot.slane %v1578_v51, 4  ;;  %v6602_v37 = vcombine.low %v1319_v25, %v8297_v30  ;;  %v1607_v29 = vrot.slane %v1605_v49, 5  ;;  %v1616_v53 = vor.u32 %v1615_v5, %v1612_v47 }
 0x155   : > { %v1598_v54 = vsel %vm7870_vm8, %v1593_v56, %v1597_v59  ;;  %v1602_v52 = vor.u32 %v1601_v48, %v1597_v59  ;;  %v8310_v34 = vrot.slane %v1658_v60, 4  ;;  %v1663_v2 = vrot.slane %v1661_v63, 5  ;;  %v8328_v56 = vld [vmem:[#allocation2 + $0xb8] sm:$0xf] }
 0x156   : > { %v1584_v14 = vsel %vm7870_vm8, %v1579_v61, %v1583_v35  ;;  %7270 = vmatmul.mubr.msk.bf16.gmra.mxu0 %vm1779_vm5, %v6602_v37  ;;  %v1619_v58 = vshll.u32 %v8265_v12, 16  ;;  %v1625_v11 = vrot.slane %v1623_v43, 4  ;;  %v1629_v0 = vshll.u32 %v8306_v44, 16 }
 0x157   : > { %v6566_v19 = vcombine.low %v1574_v9, %v1584_v14  ;;  %v1603_v39 = vrot.slane %v1602_v52, 4  ;;  %v1617_v10 = vrot.slane %v1616_v53, 4  ;;  %v1682_v25 = vshrl.u32 %v1321_v26, 16  ;;  %v8334_v52 = vld [vmem:[#allocation2 + $0xa4] sm:$0x1] }
 0x158   : > { %v1621_v7 = vrot.slane %v1619_v58, 5  ;;  %v1685_v35 = vshll.u32 %v1321_v26, 16  ;;  %v1631_v5 = vrot.slane %v1629_v0, 5  ;;  %v1695_v33 = vshrl.u32 %v8316_v13, 16 }
 0x159   : > { %7228 = vmatmul.mubr.msk.bf16.gmra.mxu1 %vm1779_vm5, %v6566_v19  ;;  %v1608_v47 = vsel %vm7870_vm8, %v1603_v39, %v1607_v29  ;;  %v6603_v24 = vcombine.low %v1321_v26, %v8316_v13  ;;  %v1684_v51 = vrot.slane %v1682_v25, 4  ;;  %v1640_v48 = vor.u32 %v1639_v28, %v1636_v27  ;;  %v7636_v19 = vld [vmem:[#allocation2 + $0xc] sm:$0xff]  }
 0x15a   : > { %v6567_v43 = vcombine.low %v1598_v54, %v1608_v47  ;;  %v1622_v31 = vsel %vm7870_vm8, %v1617_v10, %v1621_v7  ;;  %v1626_v9 = vor.u32 %v1625_v11, %v1621_v7  ;;  %v1687_v59 = vrot.slane %v1685_v35, 5  ;;  %v8344_v7 = vld [vmem:[#allocation2 + $0xb0] sm:$0x1] }
 0x15b   : > { %7273 = vmatprep.mubr.msk.bf16.mxu0 %vm1779_vm5, %v6603_v24  ;;  %v1643_v49 = vshll.u32 %v8280_v36, 16  ;;  %v1649_v60 = vrot.slane %v1647_v3, 4  ;;  %v1653_v63 = vshll.u32 %v8319_v1, 16  ;;  %v1706_v37 = vshrl.u32 %v1323_v17, 16 }
 0x15c   : > { %7231 = vmatprep.mubr.msk.bf16.mxu1 %vm1779_vm5, %v6567_v43  ;;  %v1627_v61 = vrot.slane %v1626_v9, 4  ;;  %v1709_v54 = vshll.u32 %v1323_v17, 16  ;;  %v1641_v29 = vrot.slane %v1640_v48, 4  ;;  %v1719_v14 = vshrl.u32 %v8328_v56, 16  ;;  %v2285_v9 = vld [vmem:[#allocation2] sm:$0xe] }
 0x15d   : > { %v1645_v26 = vrot.slane %v1643_v49, 5  ;;  %v6604_v53 = vcombine.low %v1323_v17, %v8328_v56  ;;  %v1655_v28 = vrot.slane %v1653_v63, 5  ;;  %v1708_v3 = vrot.slane %v1706_v37, 4 }
 0x15e   : > { %v1632_v27 = vsel %vm7870_vm8, %v1627_v61, %v1631_v5  ;;  %v1711_v58 = vrot.slane %v1709_v54, 5  ;;  %vm2334_vm2 = vcmask 1046532   ;;  %v1664_v10 = vor.u32 %v1663_v2, %v8310_v34  ;;  %v8354_v34 = vld [vmem:[%s10527_s3 + $0xa] sm:$0x3]  ;;  %v8363_v61 = vld [vmem:[#allocation2 + $0xbc] sm:$0x1] }
 0x15f   : > { %v6568_v39 = vcombine.low %v1622_v31, %v1632_v27  ;;  %v1646_v11 = vsel %vm7870_vm8, %v1641_v29, %v1645_v26  ;;  %v1650_v0 = vor.u32 %v1649_v60, %v1645_v26  ;;  %7274 = vmatmul.mubr.msk.bf16.gmra.mxu0 %vm1779_vm5, %v6604_v53  ;;  %v1667_v17 = vshll.u32 %v8297_v30, 16  ;;  %v7669_v60 = vld [vmem:[%s10527_s3 + $0x6] sm:$0x3]  ;;  %v2286_v53 = vld [vmem:[#allocation2 + $0xc] sm:$0xe]  ;;  %vm8388_vm3 = vmor %vm2333_vm15, %vm2334_vm2 }
 0x160   : > { %v1673_v25 = vrot.slane %v1671_v46, 4  ;;  %v1677_v35 = vshll.u32 %v8334_v52, 16  ;;  %7313 = vmatprep.mubr.msk.bf16.mxu0 %vm1779_vm5, %v7636_v19  ;;  %v1688_v47 = vor.u32 %v1687_v59, %v1684_v51  ;;  %v1665_v24 = vrot.slane %v1664_v10, 4  ;;  %v7637_v19 = vld [vmem:[#allocation2 + $0x18] sm:$0xff]   ;;  %v7638_v10 = vld [vmem:[#allocation2 + $0x24] sm:$0xff]  }
 0x161   : > { %7232 = vmatmul.mubr.msk.bf16.gmra.mxu1 %vm1779_vm5, %v6568_v39  ;;  %v1651_v5 = vrot.slane %v1650_v0, 4  ;;  %v1691_v43 = vshll.u32 %v8316_v13, 16  ;;  %v1697_v31 = vrot.slane %v1695_v33, 4  ;;  %v1669_v2 = vrot.slane %v1667_v17, 5 }
 0x162   : > { %v1679_v46 = vrot.slane %v1677_v35, 5  ;;  %v1689_v48 = vrot.slane %v1688_v47, 4  ;;  %v1701_v49 = vshll.u32 %v8344_v7, 16  ;;  %v2905_v33 = vsel %vm1828_vm4, %v7669_v60, 0  ;;  %v7670_v47 = vld [vmem:[#allocation2 + $0x4] sm:$0xf] }
 0x163   : > { %v1656_v51 = vsel %vm7870_vm8, %v1651_v5, %v1655_v28  ;;  %v1693_v59 = vrot.slane %v1691_v43, 5  ;;  %v1712_v63 = vor.u32 %v1711_v58, %v1708_v3  ;;  %v1670_v54 = vsel %vm7870_vm8, %v1665_v24, %v1669_v2  ;;  %7312 = vmatpush3.bf16.msra.mxu0 %v2905_v33  ;;  %v2288_v33 = vld [vmem:[#allocation2 + $0x24] sm:$0xe] }
 0x164   : > { %v6569_v37 = vcombine.low %v1646_v11, %v1656_v51  ;;  %v1674_v29 = vor.u32 %v1673_v25, %v1669_v2  ;;  %v1703_v26 = vrot.slane %v1701_v49, 5  ;;  %v1715_v0 = vshll.u32 %v8328_v56, 16  ;;  %7589 = vmatprep.subr.msk.bf16.mxu0 %vm1828_vm4, %v8354_v34  ;;  %v7671_v2 = vld [vmem:[#allocation2 + $0x10] sm:$0xf] }
 0x165   : > { %v1694_v27 = vsel %vm7870_vm8, %v1689_v48, %v1693_v59  ;;  %v1698_v28 = vor.u32 %v1697_v31, %v1693_v59  ;;  %v1713_v39 = vrot.slane %v1712_v63, 4  ;;  %v1721_v58 = vrot.slane %v1719_v14, 4 }
 0x166   : > { %7235 = vmatprep.mubr.msk.bf16.mxu1 %vm1779_vm5, %v6569_v37  ;;  %v1675_v3 = vrot.slane %v1674_v29, 4  ;;  %v1725_v11 = vshll.u32 %v8363_v61, 16  ;;  %v6621_v17 = vrot.slane %v2285_v9, 9  ;;  %v1717_v35 = vrot.slane %v1715_v0, 5  ;;  %v2287_v9 = vld [vmem:[#allocation2 + $0x18] sm:$0xe] }
 0x167   : > { %v1699_v25 = vrot.slane %v1698_v28, 4  ;;  %7314 = vmatmul.mubr.msk.bf16.vlgmr.msra.gmra.mxu0 %vm1779_vm5, %v7637_v19  ;;  %v2338_v5 = vrot.slane %v7670_v47, 5  ;;  %v6622_v24 = vrot.slane %v2286_v53, 9  ;;  %v2345_v48 = vrot.slane %v7671_v2, 5  ;;  %v7672_v28 = vld [vmem:[#allocation2 + $0x1c] sm:$0xf] }
 0x168   : > { %v1680_v43 = vsel %vm7870_vm8, %v1675_v3, %v1679_v46  ;;  %v1727_v31 = vrot.slane %v1725_v11, 5  ;;  %7317 = vmatprep.mubr.msk.bf16.mxu0 %vm1779_vm5, %v7638_v10  ;;  %v8380_v14 = vsel %vm1828_vm4, %v8078_v20, 0  ;;  %v1718_v59 = vsel %vm7870_vm8, %v1713_v39, %v1717_v35  ;;  %v7673_v39 = vld [vmem:[#allocation2 + $0x20] sm:$0x1]  ;;  %v2289_v10 = vld [vmem:[#allocation2 + $0x30] sm:$0xe] }
 0x169   : > { %v6570_v49 = vcombine.low %v1670_v54, %v1680_v43  ;;  %v1704_v51 = vsel %vm7870_vm8, %v1699_v25, %v1703_v26  ;;  %v1722_v60 = vor.u32 %v1721_v58, %v1717_v35  ;;  %v2339_v20 = vsel %vm8388_vm3, %v6621_v17, %v2338_v5  ;;  %v7674_v58 = vld [vmem:[#allocation2 + $0x28] sm:$0xf]  ;;  %v7639_v35 = vld [vmem:[#allocation2 + $0x30] sm:$0xff]   ;;  %v7640_v43 = vld [vmem:[#allocation2 + $0x3c] sm:$0xff]  }
 0x16a   : > { %v6571_v63 = vcombine.low %v1694_v27, %v1704_v51  ;;  %v2340_v37 = vrot.slane %v2338_v5, 4  ;;  %v8396_v54 = vsel %vm8388_vm3, %v6622_v24, %v2345_v48  ;;  %v2347_v26 = vrot.slane %v2345_v48, 4 }
 0x16b   : > { %7236 = vmatmul.mubr.msk.bf16.gmra.mxu1 %vm1779_vm5, %v6570_v49  ;;  %v1723_v29 = vrot.slane %v1722_v60, 4  ;;  %v6623_v53 = vrot.slane %v2287_v9, 9  ;;  %v2352_v19 = vrot.slane %v7672_v28, 5  ;;  %v2355_v0 = vrot.slane %v7673_v39, 5  ;;  %v7675_v9 = vld [vmem:[#allocation2 + $0x34] sm:$0xf] }
 0x16c   : > { %7239 = vmatprep.mubr.msk.bf16.mxu1 %vm1779_vm5, %v6571_v63  ;;  %v2342_v27 = vsel %vm8388_vm3, %v2340_v37, %v2341_v62  ;;  %v6624_v3 = vrot.slane %v2288_v33, 9  ;;  %v2359_v11 = vrot.slane %v7674_v58, 5  ;;  %v8410_v47 = vsel %vm8388_vm3, %v2347_v26, %v2348_v41  ;;  %v2290_v62 = vld [vmem:[#allocation2 + $0x3c] sm:$0xe]  ;;  %v2291_v63 = vld [vmem:[#allocation2 + $0x48] sm:$0xe] }
 0x16d   : > { %v1728_v17 = vsel %vm7870_vm8, %v1723_v29, %v1727_v31  ;;  %v6638_v25 = vcombine.low %v2339_v20, %v2342_v27  ;;  %v8414_v32 = vsel %vm8388_vm3, %v6623_v53, %v2352_v19  ;;  %v6639_v24 = vcombine.low %v8396_v54, %v8410_v47  ;;  %v2292_v26 = vld [vmem:[#allocation2 + $0x54] sm:$0xe] }
 0x16e   : > { %v6572_v5 = vcombine.low %v1718_v59, %v1728_v17  ;;  %v2354_v2 = vrot.slane %v2352_v19, 4  ;;  %v8420_v31 = vsel %vm8388_vm3, %v6624_v3, %v2359_v11  ;;  %v2361_v21 = vrot.slane %v2359_v11, 4  ;;  %v2293_v3 = vld [vmem:[#allocation2 + $0x60] sm:$0xe]  ;;  %v2294_v17 = vld [vmem:[#allocation2 + $0x6c] sm:$0xe] }
 0x16f   : > { %7318 = vmatmul.mubr.msk.bf16.gmra.mxu0 %vm1779_vm5, %v7639_v35  ;;  %v2362_v41 = vrot.slane %v8096_v4, 5  ;;  %v6625_v48 = vrot.slane %v2289_v10, 9  ;;  %v2366_v49 = vrot.slane %v7675_v9, 5  ;;  %v2369_v59 = vrot.slane %v8127_v38, 5  ;;  %v7641_v35 = vld [vmem:[#allocation2 + $0x48] sm:$0xff]  }
 0x170   : > { %7321 = vmatprep.mubr.msk.bf16.mxu0 %vm1779_vm5, %v7640_v43  ;;  %v8427_v51 = vsel %vm8388_vm3, %v2354_v2, %v2355_v0  ;;  %v6626_v60 = vrot.slane %v2290_v62, 9  ;;  %v2373_v33 = vrot.slane %v8092_v50, 5  ;;  %v2376_v28 = vrot.slane %v8167_v55, 5  ;;  %v7642_v62 = vld [vmem:[#allocation2 + $0x54] sm:$0xff]  }
 0x171   : > { %v6640_v20 = vcombine.low %v8414_v32, %v8427_v51  ;;  %v8435_v4 = vsel %vm8388_vm3, %v2361_v21, %v2362_v41  ;;  %v8439_v37 = vsel %vm8388_vm3, %v6625_v48, %v2366_v49  ;;  %v2368_v29 = vrot.slane %v2366_v49, 4  ;;  %v2295_v9 = vld [vmem:[#allocation2 + $0x78] sm:$0xe] }
 0x172   : > { %v6641_v38 = vcombine.low %v8420_v31, %v8435_v4  ;;  %v8445_v50 = vsel %vm8388_vm3, %v6626_v60, %v2373_v33  ;;  %v2375_v53 = vrot.slane %v2373_v33, 4  ;;  %v6627_v27 = vrot.slane %v2291_v63, 9  ;;  %v2296_v60 = vld [vmem:[#allocation2 + $0x84] sm:$0xe] }
 0x173   : > { %7240 = vmatmul.mubr.msk.bf16.gmra.mxu1 %vm1779_vm5, %v6572_v5  ;;  %v8451_v19 = vsel %vm8388_vm3, %v2368_v29, %v2369_v59  ;;  %v2380_v39 = vrot.slane %v8109_v22, 5  ;;  %v2383_v0 = vrot.slane %v8189_v6, 5  ;;  %v6628_v11 = vrot.slane %v2292_v26, 9  ;;  %v2297_v29 = vld [vmem:[#allocation2 + $0x90] sm:$0xe] }
 0x174   : > { %7279 = vmatprep.mubr.msk.bf16.mxu1 %vm1779_vm5, %v6638_v25  ;;  %v6642_v58 = vcombine.low %v8439_v37, %v8451_v19  ;;  %v8460_v55 = vsel %vm8388_vm3, %v2375_v53, %v2376_v28  ;;  %v2387_v10 = vrot.slane %v8151_v15, 5  ;;  %v2390_v32 = vrot.slane %v8232_v42, 5 }
 0x175   : > { %v6643_v22 = vcombine.low %v8445_v50, %v8460_v55  ;;  %v8467_v6 = vsel %vm8388_vm3, %v6627_v27, %v2380_v39  ;;  %v2382_v25 = vrot.slane %v2380_v39, 4  ;;  %v6629_v2 = vrot.slane %v2293_v3, 9  ;;  %v8509_v39 = vld [vmem:[%s10527_s3 + $0xc] sm:$0x3]  ;;  %v2298_v3 = vld [vmem:[#allocation2 + $0x9c] sm:$0xe] }
 0x176   : > { %v8472_v5 = vsel %vm8388_vm3, %v6628_v11, %v2387_v10  ;;  %v2389_v43 = vrot.slane %v2387_v10, 4  ;;  %v2394_v15 = vrot.slane %v8177_v18, 5  ;;  %v2397_v41 = vrot.slane %v8257_v23, 5  ;;  %v3826_v10 = vld [vmem:[#allocation2 + $0xc] sm:$0xe] }
 0x177   : > { %7322 = vmatmul.mubr.msk.bf16.gmra.mxu0 %vm1779_vm5, %v7641_v35  ;;  %v8478_v21 = vsel %vm8388_vm3, %v2382_v25, %v2383_v0  ;;  %v6630_v48 = vrot.slane %v2294_v17, 9  ;;  %v2401_v42 = vrot.slane %v8224_v45, 5  ;;  %v2404_v63 = vrot.slane %v8271_v57, 5  ;;  %v7643_v17 = vld [vmem:[#allocation2 + $0x60] sm:$0xff]   ;;  %v8536_v25 = vld [vmem:[#allocation2 + $0x10] sm:$0xf] }
 0x178   : > { %7325 = vmatprep.mubr.msk.bf16.mxu0 %vm1779_vm5, %v7642_v62  ;;  %v6644_v49 = vcombine.low %v8467_v6, %v8478_v21  ;;  %v8487_v18 = vsel %vm8388_vm3, %v2389_v43, %v2390_v32  ;;  %v8491_v51 = vsel %vm8388_vm3, %v6629_v2, %v2394_v15  ;;  %v2396_v59 = vrot.slane %v2394_v15, 4  ;;  %v7644_v32 = vld [vmem:[#allocation2 + $0x6c] sm:$0xff]   ;;  %v8546_v15 = vld [vmem:[#allocation2 + $0x14] sm:$0x1]  ;;  %v7648_v21 = vld [vmem:[#allocation2 + $0x9c] sm:$0xff]  }
 0x179   : > { %v6645_v23 = vcombine.low %v8472_v5, %v8487_v18  ;;  %v8497_v45 = vsel %vm8388_vm3, %v6630_v48, %v2401_v42  ;;  %v2403_v33 = vrot.slane %v2401_v42, 4  ;;  %v6631_v53 = vrot.slane %v2295_v9, 9  ;;  %v7649_v18 = vld [vmem:[#allocation2 + $0xa8] sm:$0xff]  }
 0x17a   : > { %v8502_v26 = vsel %vm8388_vm3, %v2396_v59, %v2397_v41  ;;  %v2408_v28 = vrot.slane %v8234_v16, 5  ;;  %v2411_v27 = vrot.slane %v8292_v8, 5  ;;  %v6632_v16 = vrot.slane %v2296_v60, 9 }
 0x17b   : > { %7280 = vmatmul.mubr.msk.bf16.vlgmr.msra.gmra.mxu1 %vm1779_vm5, %v6639_v24  ;;  %v6646_v57 = vcombine.low %v8491_v51, %v8502_v26  ;;  %v8519_v0 = vsel %vm8388_vm3, %v2403_v33, %v2404_v63  ;;  %v2415_v8 = vrot.slane %v8265_v12, 5  ;;  %v2418_v11 = vrot.slane %v8306_v44, 5  ;;  %v3827_v33 = vld [vmem:[#allocation2 + $0x18] sm:$0xe]  ;;  %v3831_v26 = vld [vmem:[#allocation2 + $0x48] sm:$0xe] }
 0x17c   : > { %7346 = vmatpush3.bf16.msra.mxu1 %v8380_v14  ;;  %7283 = vmatprep.mubr.msk.bf16.mxu1 %vm1779_vm5, %v6640_v20  ;;  %v6647_v54 = vcombine.low %v8497_v45, %v8519_v0  ;;  %v8528_v47 = vsel %vm8388_vm3, %v6631_v53, %v2408_v28  ;;  %v2410_v24 = vrot.slane %v2408_v28, 4  ;;  %v6633_v14 = vrot.slane %v2297_v29, 9 }
 0x17d   : > { %v8533_v12 = vsel %vm8388_vm3, %v6632_v16, %v2415_v8  ;;  %v2417_v35 = vrot.slane %v2415_v8, 4  ;;  %v2422_v20 = vrot.slane %v8280_v36, 5  ;;  %7590 = vmatprep.subr.msk.bf16.mxu1 %vm1828_vm4, %v8509_v39  ;;  %v2425_v44 = vrot.slane %v8319_v1, 5  ;;  %v2299_v1 = vld [vmem:[#allocation2 + $0xa8] sm:$0xe] }
 0x17e   : > { %v8542_v62 = vsel %vm8388_vm3, %v2410_v24, %v2411_v27  ;;  %v6634_v43 = vrot.slane %v2298_v3, 9  ;;  %v2429_v2 = vrot.slane %v8297_v30, 5  ;;  %v2432_v60 = vrot.slane %v8334_v52, 5  ;;  %v8573_v27 = vld [vmem:[#allocation2 + $0x1c] sm:$0xf] }
 0x17f   : > { %7326 = vmatmul.mubr.msk.bf16.gmra.mxu0 %vm1779_vm5, %v7643_v17  ;;  %v6648_v36 = vcombine.low %v8528_v47, %v8542_v62  ;;  %v8553_v41 = vsel %vm8388_vm3, %v2417_v35, %v2418_v11  ;;  %v8557_v48 = vsel %vm8388_vm3, %v6633_v14, %v2422_v20  ;;  %v2424_v42 = vrot.slane %v2422_v20, 4  ;;  %v8582_v24 = vld [vmem:[#allocation2 + $0x20] sm:$0x1]  ;;  %v2300_v11 = vld [vmem:[#allocation2 + $0xb4] sm:$0xe] }
 0x180   : > { %7329 = vmatprep.mubr.msk.bf16.mxu0 %vm1779_vm5, %v7644_v32  ;;  %v6649_v30 = vcombine.low %v8533_v12, %v8553_v41  ;;  %v8564_v9 = vsel %vm8388_vm3, %v6634_v43, %v2429_v2  ;;  %v2431_v59 = vrot.slane %v2429_v2, 4  ;;  %v6736_v29 = vrot.slane %v3826_v10, 9  ;;  %v3828_v20 = vld [vmem:[#allocation2 + $0x24] sm:$0xe]  ;;  %v8610_v32 = vld [vmem:[#allocation2 + $0x28] sm:$0xf] }
 0x181   : > { %v8569_v63 = vsel %vm8388_vm3, %v2424_v42, %v2425_v44  ;;  %v3892_v53 = vrot.slane %v8536_v25, 5  ;;  %v3895_v28 = vrot.slane %v8546_v15, 5  ;;  %v6635_v52 = vrot.slane %v2299_v1, 9  ;;  %v7645_v44 = vld [vmem:[#allocation2 + $0x78] sm:$0xff]   ;;  %v8618_v2 = vld [vmem:[#allocation2 + $0x2c] sm:$0x1] }
 0x182   : > { %v6650_v16 = vcombine.low %v8557_v48, %v8569_v63  ;;  %v8579_v8 = vsel %vm8388_vm3, %v2431_v59, %v2432_v60  ;;  %v2436_v3 = vrot.slane %v8316_v13, 5  ;;  %v2439_v14 = vrot.slane %v8344_v7, 5  ;;  %v8598_v13 = vld [vmem:[%s10527_s3 + $0xe] sm:$0x3]  ;;  %v7646_v42 = vld [vmem:[#allocation2 + $0x84] sm:$0xff]  }
 0x183   : > { %7284 = vmatmul.mubr.msk.bf16.gmra.mxu1 %vm1779_vm5, %v6641_v38  ;;  %v8592_v17 = vsel %vm8388_vm3, %v6736_v29, %v3892_v53  ;;  %v3894_v35 = vrot.slane %v3892_v53, 4  ;;  %v4101_v38 = vsel %vm1828_vm4, %v8354_v34, 0  ;;  %v6737_v7 = vrot.slane %v3827_v33, 9  ;;  %v3100_v33 = vld [vmem:[#allocation2 + $0xc] sm:$0xf] }
 0x184   : > { %7287 = vmatprep.mubr.msk.bf16.mxu1 %vm1779_vm5, %v6642_v58  ;;  %v8606_v31 = vsel %vm8388_vm3, %v6635_v52, %v2436_v3  ;;  %v2438_v4 = vrot.slane %v2436_v3, 4  ;;  %7380 = vmatpush3.bf16.msra.mxu0 %v4101_v38  ;;  %v3899_v37 = vrot.slane %v8573_v27, 5  ;;  %v3902_v19 = vrot.slane %v8582_v24, 5 }
 0x185   : > { %v8614_v43 = vsel %vm8388_vm3, %v3894_v35, %v3895_v28  ;;  %v6636_v58 = vrot.slane %v2300_v11, 9  ;;  %v2443_v59 = vrot.slane %v8328_v56, 5  ;;  %v2446_v60 = vrot.slane %v8363_v61, 5  ;;  %7591 = vmatprep.subr.msk.bf16.mxu0 %vm1828_vm4, %v8598_v13 }
 0x186   : > { %v6753_v34 = vcombine.low %v8592_v17, %v8614_v43  ;;  %v8624_v1 = vsel %vm8388_vm3, %v2438_v4, %v2439_v14  ;;  %v8635_v53 = vsel %vm8388_vm3, %v6737_v7, %v3899_v37  ;;  %v3901_v28 = vrot.slane %v3899_v37, 4 }
 0x187   : > { %7330 = vmatmul.mubr.msk.bf16.gmra.mxu0 %vm1779_vm5, %v7645_v44  ;;  %v6738_v52 = vrot.slane %v3828_v20, 9  ;;  %v8640_v56 = vsel %vm8388_vm3, %v6636_v58, %v2443_v59  ;;  %v2445_v61 = vrot.slane %v2443_v59, 4  ;;  %v3906_v3 = vrot.slane %v8610_v32, 5  ;;  %v3829_v20 = vld [vmem:[#allocation2 + $0x30] sm:$0xe] }
 0x188   : > { %7333 = vmatprep.mubr.msk.bf16.mxu0 %vm1779_vm5, %v7646_v42  ;;  %v3909_v11 = vrot.slane %v8618_v2, 5  ;;  %v8646_v35 = vsel %vm8388_vm3, %v3901_v28, %v3902_v19  ;;  %v3149_v14 = vshrl.u32 %v3100_v33, 16  ;;  %v3152_v4 = vshll.u32 %v3100_v33, 16  ;;  %v8659_v42 = vld [vmem:[#allocation2 + $0x34] sm:$0xf] }
 0x189   : > { %v3158_v38 = vshll.u32 %v8536_v25, 16  ;;  %v8653_v44 = vsel %vm8388_vm3, %v2445_v61, %v2446_v60  ;;  %v8657_v37 = vsel %vm8388_vm3, %v6738_v52, %v3906_v3  ;;  %v3908_v58 = vrot.slane %v3906_v3, 4  ;;  %v8661_v19 = vld [vmem:[#allocation2 + $0x38] sm:$0x1]  ;;  %v7647_v3 = vld [vmem:[#allocation2 + $0x90] sm:$0xff]  }
 0x18a   : > { %v3151_v33 = vrot.slane %v3149_v14, 4  ;;  %v3154_v60 = vrot.slane %v3152_v4, 5  ;;  %v3103_v61 = vld [vmem:[#allocation2 + $0x18] sm:$0xf]  ;;  %v3162_v50 = vshrl.u32 %v8536_v25, 16  ;;  %v3168_v55 = vshll.u32 %v8546_v15, 16 }
 0x18b   : > { %7288 = vmatmul.mubr.msk.bf16.gmra.mxu1 %vm1779_vm5, %v6643_v22  ;;  %v3160_v28 = vrot.slane %v3158_v38, 5  ;;  %v8675_v52 = vsel %vm8388_vm3, %v3908_v58, %v3909_v11  ;;  %v6739_v22 = vrot.slane %v3829_v20, 9  ;;  %v3913_v38 = vrot.slane %v8659_v42, 5  ;;  %v3830_v58 = vld [vmem:[#allocation2 + $0x3c] sm:$0xe] }
 0x18c   : > { %7291 = vmatprep.mubr.msk.bf16.mxu1 %vm1779_vm5, %v6644_v49  ;;  %v3155_v4 = vor.u32 %v3154_v60, %v3151_v33  ;;  %v3916_v6 = vrot.slane %v8661_v19, 5  ;;  %v3164_v49 = vrot.slane %v3162_v50, 4  ;;  %v3170_v59 = vrot.slane %v3168_v55, 5  ;;  %v8689_v60 = vld [vmem:[#allocation2 + $0x40] sm:$0xf] }
 0x18d   : > { %v3173_v29 = vshrl.u32 %v3103_v61, 16  ;;  %v3176_v11 = vshll.u32 %v3103_v61, 16  ;;  %v8686_v15 = vsel %vm8388_vm3, %v6739_v22, %v3913_v38  ;;  %v3915_v20 = vrot.slane %v3913_v38, 4  ;;  %v8693_v14 = vld [vmem:[#allocation2 + $0x44] sm:$0x1] }
 0x18e   : > { %v3156_v25 = vrot.slane %v3155_v4, 4  ;;  %v3182_v33 = vshll.u32 %v8573_v27, 16  ;;  %v3165_v10 = vor.u32 %v3164_v49, %v3160_v28  ;;  %v3186_v61 = vshrl.u32 %v8573_v27, 16 }
 0x18f   : > { %7334 = vmatmul.mubr.msk.bf16.gmra.mxu0 %vm1779_vm5, %v7647_v3  ;;  %v3175_v50 = vrot.slane %v3173_v29, 4  ;;  %v3178_v55 = vrot.slane %v3176_v11, 5  ;;  %v8699_v22 = vsel %vm8388_vm3, %v3915_v20, %v3916_v6  ;;  %v3192_v38 = vshll.u32 %v8582_v24, 16  ;;  %v3106_v11 = vld [vmem:[#allocation2 + $0x24] sm:$0xf] }
 0x190   : > { %7337 = vmatprep.mubr.msk.bf16.mxu0 %vm1779_vm5, %v7648_v21  ;;  %v3161_v3 = vsel %vm7870_vm8, %v3156_v25, %v3160_v28  ;;  %v3184_v4 = vrot.slane %v3182_v33, 5  ;;  %v3166_v7 = vrot.slane %v3165_v10, 4  ;;  %v6756_v21 = vcombine.low %v8686_v15, %v8699_v22 }
 0x191   : > { %v3179_v29 = vor.u32 %v3178_v55, %v3175_v50  ;;  %v3188_v49 = vrot.slane %v3186_v61, 4  ;;  %v3194_v27 = vrot.slane %v3192_v38, 5  ;;  %v6740_v28 = vrot.slane %v3830_v58, 9  ;;  %v7650_v50 = vld [vmem:[#allocation2 + $0xb4] sm:$0xff]   ;;  %v8729_v61 = vld [vmem:[#allocation2 + $0x4c] sm:$0xf] }
 0x192   : > { %v3920_v6 = vrot.slane %v8689_v60, 5  ;;  %v3923_v25 = vrot.slane %v8693_v14, 5  ;;  %v3171_v24 = vsel %vm7870_vm8, %v3166_v7, %v3170_v59  ;;  %v8718_v5 = vsel %vm1828_vm4, %v8509_v39, 0 }
 0x193   : > { %7292 = vmatmul.mubr.msk.bf16.gmra.mxu1 %vm1779_vm5, %v6645_v23  ;;  %v3180_v10 = vrot.slane %v3179_v29, 4  ;;  %v3189_v20 = vor.u32 %v3188_v49, %v3184_v4  ;;  %v8720_v23 = vcombine.low %v3161_v3, %v3171_v24  ;;  %v3197_v51 = vshrl.u32 %v3106_v11, 16 }
 0x194   : > { %7295 = vmatprep.mubr.msk.bf16.mxu1 %vm1779_vm5, %v6646_v57  ;;  %v8724_v58 = vsel %vm8388_vm3, %v6740_v28, %v3920_v6  ;;  %v3922_v33 = vrot.slane %v3920_v6, 4  ;;  %v3109_v57 = vld [vmem:[#allocation2 + $0x30] sm:$0xf]  ;;  %v3200_v55 = vshll.u32 %v3106_v11, 16  ;;  %v3206_v39 = vshll.u32 %v8610_v32, 16 }
 0x195   : > { %v3185_v7 = vsel %vm7870_vm8, %v3180_v10, %v3184_v4  ;;  %v3190_v59 = vrot.slane %v3189_v20, 4  ;;  %v3199_v38 = vrot.slane %v3197_v51, 4  ;;  %v3210_v29 = vshrl.u32 %v8610_v32, 16  ;;  %v8738_v28 = vld [vmem:[#allocation2 + $0x50] sm:$0x1] }
 0x196   : > { %v8734_v3 = vsel %vm8388_vm3, %v3922_v33, %v3923_v25  ;;  %v3216_v49 = vshll.u32 %v8618_v2, 16  ;;  %v3202_v6 = vrot.slane %v3200_v55, 5  ;;  %v3208_v24 = vrot.slane %v3206_v39, 5  ;;  %v8755_v39 = vld [vmem:[#allocation2 + $0x58] sm:$0xf] }
 0x197   : > { %7338 = vmatmul.mubr.msk.bf16.gmra.mxu0 %vm1779_vm5, %v7649_v18  ;;  %v3195_v4 = vsel %vm7870_vm8, %v3190_v59, %v3194_v27  ;;  %v6757_v11 = vcombine.low %v8724_v58, %v8734_v3  ;;  %v3212_v25 = vrot.slane %v3210_v29, 4  ;;  %v6741_v18 = vrot.slane %v3831_v26, 9 }
 0x198   : > { %7341 = vmatprep.mubr.msk.bf16.mxu0 %vm1779_vm5, %v7650_v50  ;;  %v8745_v10 = vcombine.low %v3185_v7, %v3195_v4  ;;  %v3218_v20 = vrot.slane %v3216_v49, 5  ;;  %v3203_v32 = vor.u32 %v3202_v6, %v3199_v38  ;;  %v3927_v2 = vrot.slane %v8729_v61, 5  ;;  %v3832_v50 = vld [vmem:[#allocation2 + $0x54] sm:$0xe] }
 0x199   : > { %v3930_v33 = vrot.slane %v8738_v28, 5  ;;  %v3221_v51 = vshrl.u32 %v3109_v57, 16  ;;  %v3213_v27 = vor.u32 %v3212_v25, %v3208_v24  ;;  %v3224_v59 = vshll.u32 %v3109_v57, 16  ;;  %v7651_v57 = vld [vmem:[#allocation2 + $0xc0] sm:$0xff]   ;;  %v3112_v25 = vld [vmem:[#allocation2 + $0x3c] sm:$0xf] }
 0x19a   : > { %v3230_v7 = vshll.u32 %v8659_v42, 16  ;;  %v3234_v55 = vshrl.u32 %v8659_v42, 16  ;;  %v3204_v26 = vrot.slane %v3203_v32, 4  ;;  %v8763_v38 = vsel %vm8388_vm3, %v6741_v18, %v3927_v2 }
 0x19b   : > { %7296 = vmatmul.mubr.msk.bf16.gmra.mxu1 %vm1779_vm5, %v6647_v54  ;;  %v3929_v45 = vrot.slane %v3927_v2, 4  ;;  %v3223_v0 = vrot.slane %v3221_v51, 4  ;;  %v8765_v54 = vld [vmem:[#allocation2 + $0x5c] sm:$0x1]  ;;  %v3214_v29 = vrot.slane %v3213_v27, 4  ;;  %v3226_v49 = vrot.slane %v3224_v59, 5 }
 0x19c   : > { %7299 = vmatprep.mubr.msk.bf16.mxu1 %vm1779_vm5, %v6648_v36  ;;  %v3232_v42 = vrot.slane %v3230_v7, 5  ;;  %v3236_v4 = vrot.slane %v3234_v55, 4  ;;  %v3209_v6 = vsel %vm7870_vm8, %v3204_v26, %v3208_v24  ;;  %v3240_v62 = vshll.u32 %v8661_v19, 16  ;;  %v8787_v55 = vld [vmem:[#allocation2 + $0x64] sm:$0xf] }
 0x19d   : > { %v8771_v47 = vsel %vm8388_vm3, %v3929_v45, %v3930_v33  ;;  %v6742_v36 = vrot.slane %v3832_v50, 9  ;;  %v3219_v18 = vsel %vm7870_vm8, %v3214_v29, %v3218_v20  ;;  %v3227_v2 = vor.u32 %v3226_v49, %v3223_v0  ;;  %v3833_v45 = vld [vmem:[#allocation2 + $0x60] sm:$0xe] }
 0x19e   : > { %v6758_v32 = vcombine.low %v8763_v38, %v8771_v47  ;;  %v3237_v51 = vor.u32 %v3236_v4, %v3232_v42  ;;  %v8783_v24 = vcombine.low %v3209_v6, %v3219_v18  ;;  %v3242_v19 = vrot.slane %v3240_v62, 5  ;;  %v8803_v4 = vld [vmem:[#allocation2 + $0x68] sm:$0x1] }
 0x19f   : > { %7342 = vmatmul.mubr.msk.bf16.gmra.mxu0 %vm1779_vm5, %v7651_v57  ;;  %v3934_v33 = vrot.slane %v8755_v39, 5  ;;  %v3937_v50 = vrot.slane %v8765_v54, 5  ;;  %v3228_v27 = vrot.slane %v3227_v2, 4  ;;  %v3245_v20 = vshrl.u32 %v3112_v25, 16  ;;  %v3115_v6 = vld [vmem:[#allocation2 + $0x48] sm:$0xf] }
 0x1a0   : > { %7381 = vmatprep.mubr.msk.bf16.mxu0 %vm1779_vm5, %v6753_v34  ;;  %v3238_v59 = vrot.slane %v3237_v51, 4  ;;  %v3248_v7 = vshll.u32 %v3112_v25, 16  ;;  %v3254_v43 = vshll.u32 %v8689_v60, 16  ;;  %v3258_v34 = vshrl.u32 %v8689_v60, 16 }
 0x1a1   : > { %v8791_v26 = vsel %vm8388_vm3, %v6742_v36, %v3934_v33  ;;  %v3936_v17 = vrot.slane %v3934_v33, 4  ;;  %v3233_v0 = vsel %vm7870_vm8, %v3228_v27, %v3232_v42  ;;  %v3247_v29 = vrot.slane %v3245_v20, 4  ;;  %v3834_v27 = vld [vmem:[#allocation2 + $0x6c] sm:$0xe] }
 0x1a2   : > { %v3243_v57 = vsel %vm7870_vm8, %v3238_v59, %v3242_v19  ;;  %v3250_v49 = vrot.slane %v3248_v7, 5  ;;  %v3256_v41 = vrot.slane %v3254_v43, 5  ;;  %v3264_v36 = vshll.u32 %v8693_v14, 16  ;;  %v3118_v59 = vld [vmem:[#allocation2 + $0x54] sm:$0xf] }
 0x1a3   : > { %7300 = vmatmul.mubr.msk.bf16.gmra.mxu1 %vm1779_vm5, %v6649_v30  ;;  %v8809_v60 = vcombine.low %v3233_v0, %v3243_v57  ;;  %v8813_v12 = vsel %vm8388_vm3, %v3936_v17, %v3937_v50  ;;  %v3260_v30 = vrot.slane %v3258_v34, 4  ;;  %v6743_v25 = vrot.slane %v3833_v45, 9  ;;  %v8833_v17 = vld [vmem:[#allocation2 + $0x70] sm:$0xf]  ;;  %v8838_v57 = vld [vmem:[#allocation2 + $0x74] sm:$0x1] }
 0x1a4   : > { %7303 = vmatprep.mubr.msk.bf16.mxu1 %vm1779_vm5, %v6650_v16  ;;  %v6759_v42 = vcombine.low %v8791_v26, %v8813_v12  ;;  %v3251_v62 = vor.u32 %v3250_v49, %v3247_v29  ;;  %v3941_v48 = vrot.slane %v8787_v55, 5  ;;  %v3944_v63 = vrot.slane %v8803_v4, 5 }
 0x1a5   : > { %v3261_v18 = vor.u32 %v3260_v30, %v3256_v41  ;;  %v3269_v16 = vshrl.u32 %v3115_v6, 16  ;;  %v10552_v2 = vcombine.low %v8635_v53, %v8646_v35  ;;  %v3266_v19 = vrot.slane %v3264_v36, 5 }
 0x1a6   : > { %v3252_v51 = vrot.slane %v3251_v62, 4  ;;  %v3272_v33 = vshll.u32 %v3115_v6, 16  ;;  %v3278_v50 = vshll.u32 %v8729_v61, 16  ;;  %v10553_v14 = vcombine.low %v8657_v37, %v8675_v52 }
 0x1a7   : > { %7382 = vmatmul.mubr.msk.bf16.vlgmr.msra.gmra.mxu0 %vm1779_vm5, %v10552_v2  ;;  %v3262_v20 = vrot.slane %v3261_v18, 4  ;;  %v8831_v7 = vsel %vm8388_vm3, %v6743_v25, %v3941_v48  ;;  %v3943_v53 = vrot.slane %v3941_v48, 4  ;;  %v3271_v35 = vrot.slane %v3269_v16, 4  ;;  %v3835_v2 = vld [vmem:[#allocation2 + $0x78] sm:$0xe] }
 0x1a8   : > { %7385 = vmatprep.mubr.msk.bf16.mxu0 %vm1779_vm5, %v10553_v14  ;;  %v3257_v43 = vsel %vm7870_vm8, %v3252_v51, %v3256_v41  ;;  %v3274_v34 = vrot.slane %v3272_v33, 5  ;;  %v3280_v45 = vrot.slane %v3278_v50, 5  ;;  %v3282_v0 = vshrl.u32 %v8729_v61, 16  ;;  %v8867_v33 = vld [vmem:[#allocation2 + $0x7c] sm:$0xf] }
 0x1a9   : > { %v3267_v37 = vsel %vm7870_vm8, %v3262_v20, %v3266_v19  ;;  %v8844_v52 = vsel %vm8388_vm3, %v3943_v53, %v3944_v63  ;;  %v3288_v29 = vshll.u32 %v8738_v28, 16  ;;  %v6744_v49 = vrot.slane %v3834_v27, 9  ;;  %v8875_v20 = vld [vmem:[#allocation2 + $0x80] sm:$0x1] }
 0x1aa   : > { %v10554_v6 = vcombine.low %v8564_v9, %v8579_v8  ;;  %v8851_v41 = vcombine.low %v3257_v43, %v3267_v37  ;;  %v6760_v61 = vcombine.low %v8831_v7, %v8844_v52  ;;  %v3275_v30 = vor.u32 %v3274_v34, %v3271_v35  ;;  %v3121_v53 = vld [vmem:[#allocation2 + $0x60] sm:$0xf]  ;;  %v3838_v52 = vld [vmem:[#allocation2 + $0x9c] sm:$0xe] }
 0x1ab   : > { %v3284_v62 = vrot.slane %v3282_v0, 4  ;;  %v10555_v36 = vcombine.low %v8606_v31, %v8624_v1  ;;  %v3290_v25 = vrot.slane %v3288_v29, 5  ;;  %v3948_v28 = vrot.slane %v8833_v17, 5 }
 0x1ac   : > { %7304 = vmatmul.mubr.msk.bf16.gmra.mxu1 %vm1779_vm5, %v10554_v6  ;;  %v3951_v18 = vrot.slane %v8838_v57, 5  ;;  %v3293_v9 = vshrl.u32 %v3118_v59, 16  ;;  %v3276_v8 = vrot.slane %v3275_v30, 4  ;;  %v3296_v63 = vshll.u32 %v3118_v59, 16  ;;  %v3124_v30 = vld [vmem:[#allocation2 + $0x6c] sm:$0xf] }
 0x1ad   : > { %7307 = vmatprep.mubr.msk.bf16.mxu1 %vm1779_vm5, %v10555_v36  ;;  %v3285_v48 = vor.u32 %v3284_v62, %v3280_v45  ;;  %v3302_v16 = vshll.u32 %v8755_v39, 16  ;;  %v8864_v51 = vsel %vm8388_vm3, %v6744_v49, %v3948_v28  ;;  %v3950_v19 = vrot.slane %v3948_v28, 4 }
 0x1ae   : > { %v3295_v31 = vrot.slane %v3293_v9, 4  ;;  %v3306_v1 = vshrl.u32 %v8755_v39, 16  ;;  %v3281_v50 = vsel %vm7870_vm8, %v3276_v8, %v3280_v45  ;;  %v3298_v59 = vrot.slane %v3296_v63, 5 }
 0x1af   : > { %7386 = vmatmul.mubr.msk.bf16.gmra.mxu0 %vm1779_vm5, %v6756_v21  ;;  %v3286_v27 = vrot.slane %v3285_v48, 4  ;;  %v3304_v14 = vrot.slane %v3302_v16, 5  ;;  %v8883_v39 = vsel %vm8388_vm3, %v3950_v19, %v3951_v18  ;;  %v3312_v22 = vshll.u32 %v8765_v54, 16  ;;  %v8913_v48 = vld [vmem:[#allocation2 + $0x88] sm:$0xf] }
 0x1b0   : > { %7389 = vmatprep.mubr.msk.bf16.mxu0 %vm1779_vm5, %v6757_v11  ;;  %v3308_v15 = vrot.slane %v3306_v1, 4  ;;  %v6745_v21 = vrot.slane %v3835_v2, 9  ;;  %v6761_v43 = vcombine.low %v8864_v51, %v8883_v39  ;;  %v3299_v34 = vor.u32 %v3298_v59, %v3295_v31  ;;  %v8988_v39 = vld [vmem:[#allocation2 + $0xa0] sm:$0xf] }
 0x1b1   : > { %v3291_v35 = vsel %vm7870_vm8, %v3286_v27, %v3290_v25  ;;  %v3955_v58 = vrot.slane %v8867_v33, 5  ;;  %v3314_v45 = vrot.slane %v3312_v22, 5  ;;  %v3958_v0 = vrot.slane %v8875_v20, 5 }
 0x1b2   : > { %v8891_v3 = vcombine.low %v3281_v50, %v3291_v35  ;;  %v3309_v11 = vor.u32 %v3308_v15, %v3304_v14  ;;  %v10556_v54 = vcombine.low %v8640_v56, %v8653_v44  ;;  %v3300_v37 = vrot.slane %v3299_v34, 4  ;;  %v3836_v56 = vld [vmem:[#allocation2 + $0x84] sm:$0xe]  ;;  %v3837_v15 = vld [vmem:[#allocation2 + $0x90] sm:$0xe] }
 0x1b3   : > { %v8900_v29 = vsel %vm8388_vm3, %v6745_v21, %v3955_v58  ;;  %v3957_v49 = vrot.slane %v3955_v58, 4  ;;  %v3317_v6 = vshrl.u32 %v3121_v53, 16  ;;  %v3320_v36 = vshll.u32 %v3121_v53, 16  ;;  %v8935_v21 = vld [vmem:[#allocation2 + $0x94] sm:$0xf] }
 0x1b4   : > { %7308 = vmatmul.mubr.msk.bf16.gmra.mxu1 %vm1779_vm5, %v10556_v54  ;;  %v3310_v62 = vrot.slane %v3309_v11, 4  ;;  %v3326_v25 = vshll.u32 %v8787_v55, 16  ;;  %v3330_v28 = vshrl.u32 %v8787_v55, 16  ;;  %v3305_v44 = vsel %vm7870_vm8, %v3300_v37, %v3304_v14  ;;  %v8944_v35 = vld [vmem:[%s10527_s3 + $0x10] sm:$0x3] }
 0x1b5   : > { %7347 = vmatprep.mubr.msk.bf16.mxu1 %vm1779_vm5, %v8720_v23  ;;  %v8910_v18 = vsel %vm8388_vm3, %v3957_v49, %v3958_v0  ;;  %v3319_v9 = vrot.slane %v3317_v6, 4  ;;  %v3336_v8 = vshll.u32 %v8803_v4, 16  ;;  %v8915_v23 = vld [vmem:[#allocation2 + $0x8c] sm:$0x1]  ;;  %v3322_v16 = vrot.slane %v3320_v36, 5 }
 0x1b6   : > { %v3315_v63 = vsel %vm7870_vm8, %v3310_v62, %v3314_v45  ;;  %v6762_v55 = vcombine.low %v8900_v29, %v8910_v18  ;;  %v3328_v2 = vrot.slane %v3326_v25, 5  ;;  %v3332_v4 = vrot.slane %v3330_v28, 4  ;;  %v8948_v45 = vld [vmem:[#allocation2 + $0x98] sm:$0x1] }
 0x1b7   : > { %7390 = vmatmul.mubr.msk.bf16.gmra.mxu0 %vm1779_vm5, %v6758_v32  ;;  %v8925_v19 = vcombine.low %v3305_v44, %v3315_v63  ;;  %v3338_v31 = vrot.slane %v3336_v8, 5  ;;  %v6746_v1 = vrot.slane %v3836_v56, 9  ;;  %v3323_v50 = vor.u32 %v3322_v16, %v3319_v9  ;;  %v3127_v49 = vld [vmem:[#allocation2 + $0x78] sm:$0xf]  ;;  %v3130_v8 = vld [vmem:[#allocation2 + $0x84] sm:$0xf] }
 0x1b8   : > { %7393 = vmatprep.mubr.msk.bf16.mxu0 %vm1779_vm5, %v6759_v42  ;;  %v3962_v27 = vrot.slane %v8913_v48, 5  ;;  %v3965_v59 = vrot.slane %v8915_v23, 5  ;;  %v3341_v14 = vshrl.u32 %v3124_v30, 16  ;;  %v3333_v38 = vor.u32 %v3332_v4, %v3328_v2 }
 0x1b9   : > { %v3344_v47 = vshll.u32 %v3124_v30, 16  ;;  %v3350_v32 = vshll.u32 %v8833_v17, 16  ;;  %v3354_v22 = vshrl.u32 %v8833_v17, 16  ;;  %v3324_v53 = vrot.slane %v3323_v50, 4 }
 0x1ba   : > { %v8939_v26 = vsel %vm8388_vm3, %v6746_v1, %v3962_v27  ;;  %v3964_v12 = vrot.slane %v3962_v27, 4  ;;  %v3343_v42 = vrot.slane %v3341_v14, 4  ;;  %v3334_v34 = vrot.slane %v3333_v38, 4 }
 0x1bb   : > { %v3346_v58 = vrot.slane %v3344_v47, 5  ;;  %v3352_v17 = vrot.slane %v3350_v32, 5  ;;  %v3356_v11 = vrot.slane %v3354_v22, 4  ;;  %v3329_v0 = vsel %vm7870_vm8, %v3324_v53, %v3328_v2 }
 0x1bc   : > { %7348 = vmatmul.mubr.msk.bf16.vlgmr.msra.gmra.mxu1 %vm1779_vm5, %v8745_v10  ;;  %v8957_v54 = vsel %vm8388_vm3, %v3964_v12, %v3965_v59  ;;  %v3360_v10 = vshll.u32 %v8838_v57, 16  ;;  %v6747_v37 = vrot.slane %v3837_v15, 9  ;;  %v3339_v6 = vsel %vm7870_vm8, %v3334_v34, %v3338_v31  ;;  %v3839_v34 = vld [vmem:[#allocation2 + $0xa8] sm:$0xe] }
 0x1bd   : > { %7414 = vmatpush3.bf16.msra.mxu1 %v8718_v5  ;;  %7351 = vmatprep.mubr.msk.bf16.mxu1 %vm1779_vm5, %v8783_v24  ;;  %v6763_v5 = vcombine.low %v8939_v26, %v8957_v54  ;;  %v3347_v30 = vor.u32 %v3346_v58, %v3343_v42  ;;  %v3357_v62 = vor.u32 %v3356_v11, %v3352_v17  ;;  %v3969_v25 = vrot.slane %v8935_v21, 5  ;;  %v3133_v58 = vld [vmem:[#allocation2 + $0x90] sm:$0xf]  ;;  %v9012_v54 = vpop.f32.mrf.mxu0 }
 0x1be   : > { %7592 = vmatprep.subr.msk.bf16.mxu1 %vm1828_vm4, %v8944_v35  ;;  %v8966_v24 = vcombine.low %v3329_v0, %v3339_v6  ;;  %v3362_v36 = vrot.slane %v3360_v10, 5  ;;  %v3972_v57 = vrot.slane %v8948_v45, 5  ;;  %v3365_v44 = vshrl.u32 %v3127_v49, 16 }
 0x1bf   : > { %7394 = vmatmul.mubr.msk.bf16.gmra.mxu0 %vm1779_vm5, %v6760_v61  ;;  %v3348_v28 = vrot.slane %v3347_v30, 4  ;;  %v3358_v56 = vrot.slane %v3357_v62, 4  ;;  %v3368_v9 = vshll.u32 %v3127_v49, 16  ;;  %v8980_v63 = vsel %vm8388_vm3, %v6747_v37, %v3969_v25  ;;  %v9021_v30 = vld [vmem:[#allocation2 + $0xb0] sm:$0x1] }
 0x1c0   : > { %7397 = vmatprep.mubr.msk.bf16.mxu0 %vm1779_vm5, %v6761_v43  ;;  %v3971_v16 = vrot.slane %v3969_v25, 4  ;;  %v3374_v2 = vshll.u32 %v8867_v33, 16  ;;  %v3378_v7 = vshrl.u32 %v8867_v33, 16  ;;  %v3367_v31 = vrot.slane %v3365_v44, 4  ;;  %v8990_v43 = vld [vmem:[#allocation2 + $0xa4] sm:$0x1] }
 0x1c1   : > { %v3353_v61 = vsel %vm7870_vm8, %v3348_v28, %v3352_v17  ;;  %v3363_v4 = vsel %vm7870_vm8, %v3358_v56, %v3362_v36  ;;  %v3370_v51 = vrot.slane %v3368_v9, 5  ;;  %v3384_v15 = vshll.u32 %v8875_v20, 16  ;;  %v9033_v9 = vpop.f32.mrf.mxu0 }
 0x1c2   : > { %v8992_v1 = vcombine.low %v3353_v61, %v3363_v4  ;;  %v8996_v50 = vsel %vm8388_vm3, %v3971_v16, %v3972_v57  ;;  %v3376_v33 = vrot.slane %v3374_v2, 5  ;;  %v3380_v27 = vrot.slane %v3378_v7, 4  ;;  %v3840_v7 = vld [vmem:[#allocation2 + $0xb4] sm:$0xe] }
 0x1c3   : > { %v6764_v59 = vcombine.low %v8980_v63, %v8996_v50  ;;  %v3371_v14 = vor.u32 %v3370_v51, %v3367_v31  ;;  %v6748_v38 = vrot.slane %v3838_v52, 9  ;;  %v3976_v32 = vrot.slane %v8988_v39, 5  ;;  %v9043_v51 = vld [vmem:[#allocation2 + $0xb8] sm:$0xf] }
 0x1c4   : > { %7352 = vmatmul.mubr.msk.bf16.gmra.mxu1 %vm1779_vm5, %v8809_v60  ;;  %v3381_v47 = vor.u32 %v3380_v27, %v3376_v33  ;;  %v3979_v22 = vrot.slane %v8990_v43, 5  ;;  %v3389_v53 = vshrl.u32 %v3130_v8, 16  ;;  %v3386_v12 = vrot.slane %v3384_v15, 5  ;;  %v9047_v15 = vld [vmem:[#allocation2 + $0xbc] sm:$0x1] }
 0x1c5   : > { %7355 = vmatprep.mubr.msk.bf16.mxu1 %vm1779_vm5, %v8851_v41  ;;  %v3372_v26 = vrot.slane %v3371_v14, 4  ;;  %v3392_v42 = vshll.u32 %v3130_v8, 16  ;;  %v3398_v60 = vshll.u32 %v8913_v48, 16  ;;  %v3977_v20 = vsel %vm8388_vm3, %v6748_v38, %v3976_v32  ;;  %v9010_v41 = vld [vmem:[#allocation2 + $0xac] sm:$0xf] }
 0x1c6   : > { %v3382_v17 = vrot.slane %v3381_v47, 4  ;;  %v3978_v11 = vrot.slane %v3976_v32, 4  ;;  %v3391_v0 = vrot.slane %v3389_v53, 4  ;;  %v3402_v6 = vshrl.u32 %v8913_v48, 16  ;;  %v9052_v53 = vpop.f32.mrf.mxu0 }
 0x1c7   : > { %7398 = vmatmul.mubr.msk.bf16.gmra.mxu0 %vm1779_vm5, %v6762_v55  ;;  %v3377_v10 = vsel %vm7870_vm8, %v3372_v26, %v3376_v33  ;;  %v3394_v37 = vrot.slane %v3392_v42, 5  ;;  %v3400_v49 = vrot.slane %v3398_v60, 5  ;;  %v3408_v29 = vshll.u32 %v8915_v23, 16 }
 0x1c8   : > { %7401 = vmatprep.mubr.msk.bf16.mxu0 %vm1779_vm5, %v6763_v5  ;;  %v3387_v62 = vsel %vm7870_vm8, %v3382_v17, %v3386_v12  ;;  %v3980_v36 = vsel %vm8388_vm3, %v3978_v11, %v3979_v22  ;;  %v6749_v18 = vrot.slane %v3839_v34, 9  ;;  %v3404_v28 = vrot.slane %v3402_v6, 4  ;;  %v3136_v22 = vld [vmem:[#allocation2 + $0x9c] sm:$0xf]  ;;  %v9069_v6 = vpop.f32.mrf.mxu0 }
 0x1c9   : > { %v9029_v55 = vcombine.low %v3377_v10, %v3387_v62  ;;  %v6765_v25 = vcombine.low %v3977_v20, %v3980_v36  ;;  %v3395_v57 = vor.u32 %v3394_v37, %v3391_v0  ;;  %v3410_v56 = vrot.slane %v3408_v29, 5  ;;  %v3139_v20 = vld [vmem:[#allocation2 + $0xa8] sm:$0xf] }
 0x1ca   : > { %v3983_v48 = vrot.slane %v9010_v41, 5  ;;  %v3986_v44 = vrot.slane %v9021_v30, 5  ;;  %v3413_v5 = vshrl.u32 %v3133_v58, 16  ;;  %v3405_v16 = vor.u32 %v3404_v28, %v3400_v49 }
 0x1cb   : > { %v3396_v8 = vrot.slane %v3395_v57, 4  ;;  %v3416_v23 = vshll.u32 %v3133_v58, 16  ;;  %v3422_v2 = vshll.u32 %v8935_v21, 16  ;;  %v3426_v31 = vshrl.u32 %v8935_v21, 16  ;;  %v9080_v57 = vld [vmem:[#allocation2 + $0xc8] sm:$0x1] }
 0x1cc   : > { %7356 = vmatmul.mubr.msk.bf16.gmra.mxu1 %vm1779_vm5, %v8891_v3  ;;  %v3984_v52 = vsel %vm8388_vm3, %v6749_v18, %v3983_v48  ;;  %v3985_v61 = vrot.slane %v3983_v48, 4  ;;  %v3415_v4 = vrot.slane %v3413_v5, 4  ;;  %v3406_v33 = vrot.slane %v3405_v16, 4 }
 0x1cd   : > { %7359 = vmatprep.mubr.msk.bf16.mxu1 %vm1779_vm5, %v8925_v19  ;;  %v3401_v3 = vsel %vm7870_vm8, %v3396_v8, %v3400_v49  ;;  %v3418_v27 = vrot.slane %v3416_v23, 5  ;;  %v3424_v14 = vrot.slane %v3422_v2, 5  ;;  %v3428_v38 = vrot.slane %v3426_v31, 4  ;;  %v3841_v49 = vld [vmem:[#allocation2 + $0xc0] sm:$0xe] }
 0x1ce   : > { %v3987_v19 = vsel %vm8388_vm3, %v3985_v61, %v3986_v44  ;;  %v3432_v47 = vshll.u32 %v8948_v45, 16  ;;  %v6750_v32 = vrot.slane %v3840_v7, 9  ;;  %v3411_v21 = vsel %vm7870_vm8, %v3406_v33, %v3410_v56  ;;  %v9090_v7 = vpop.f32.mrf.mxu0  ;;  %v4655_v31 = vld [vmem:[#allocation2 + $0x18] sm:$0xf] }
 0x1cf   : > { %7402 = vmatmul.mubr.msk.bf16.gmra.mxu0 %vm1779_vm5, %v6764_v59  ;;  %v6766_v26 = vcombine.low %v3984_v52, %v3987_v19  ;;  %v3419_v12 = vor.u32 %v3418_v27, %v3415_v4  ;;  %v3990_v42 = vrot.slane %v9043_v51, 5  ;;  %v9062_v60 = vcombine.low %v3401_v3, %v3411_v21 }
 0x1d0   : > { %7405 = vmatprep.mubr.msk.bf16.mxu0 %vm1779_vm5, %v6765_v25  ;;  %v3429_v45 = vor.u32 %v3428_v38, %v3424_v14  ;;  %v3434_v34 = vrot.slane %v3432_v47, 5  ;;  %v3993_v58 = vrot.slane %v9047_v15, 5  ;;  %v3437_v59 = vshrl.u32 %v3136_v22, 16  ;;  %v9078_v25 = vld [vmem:[#allocation2 + $0xc4] sm:$0xf] }
 0x1d1   : > { %v3420_v17 = vrot.slane %v3419_v12, 4  ;;  %v3991_v63 = vsel %vm8388_vm3, %v6750_v32, %v3990_v42  ;;  %v3992_v50 = vrot.slane %v3990_v42, 4  ;;  %v3440_v0 = vshll.u32 %v3136_v22, 16  ;;  %v9105_v42 = vpop.f32.mrf.mxu0 }
 0x1d2   : > { %v3430_v11 = vrot.slane %v3429_v45, 4  ;;  %v3446_v10 = vshll.u32 %v8988_v39, 16  ;;  %v3450_v37 = vshrl.u32 %v8988_v39, 16  ;;  %v3439_v29 = vrot.slane %v3437_v59, 4 }
 0x1d3   : > { %v3425_v62 = vsel %vm7870_vm8, %v3420_v17, %v3424_v14  ;;  %v3994_v36 = vsel %vm8388_vm3, %v3992_v50, %v3993_v58  ;;  %v3456_v18 = vshll.u32 %v8990_v43, 16  ;;  %v3442_v28 = vrot.slane %v3440_v0, 5  ;;  %v3142_v50 = vld [vmem:[#allocation2 + $0xb4] sm:$0xf] }
 0x1d4   : > { %7360 = vmatmul.mubr.msk.bf16.gmra.mxu1 %vm1779_vm5, %v8966_v24  ;;  %v3435_v39 = vsel %vm7870_vm8, %v3430_v11, %v3434_v34  ;;  %v6767_v24 = vcombine.low %v3991_v63, %v3994_v36  ;;  %v3448_v56 = vrot.slane %v3446_v10, 5  ;;  %v3452_v44 = vrot.slane %v3450_v37, 4  ;;  %v9111_v63 = vld [vmem:[#allocation2 + $0x20] sm:$0x1] }
 0x1d5   : > { %7363 = vmatprep.mubr.msk.bf16.mxu1 %vm1779_vm5, %v8992_v1  ;;  %v9086_v48 = vcombine.low %v3425_v62, %v3435_v39  ;;  %v3458_v5 = vrot.slane %v3456_v18, 5  ;;  %v6751_v8 = vrot.slane %v3841_v49, 9  ;;  %v3443_v16 = vor.u32 %v3442_v28, %v3439_v29  ;;  %v9120_v39 = vpop.f32.mrf.mxu0 }
 0x1d6   : > { %v3997_v43 = vrot.slane %v9078_v25, 5  ;;  %v4000_v23 = vrot.slane %v9080_v57, 5  ;;  %v3461_v2 = vshrl.u32 %v3139_v20, 16  ;;  %v3453_v1 = vor.u32 %v3452_v44, %v3448_v56  ;;  %v9118_v18 = vpop.f32.mrf.mxu1  ;;  %v4658_v44 = vld [vmem:[#allocation2 + $0x24] sm:$0xf] }
 0x1d7   : > { %7406 = vmatmul.mubr.msk.bf16.gmra.mxu0 %vm1779_vm5, %v6766_v26  ;;  %v3464_v52 = vshll.u32 %v3139_v20, 16  ;;  %v3470_v61 = vshll.u32 %v9010_v41, 16  ;;  %v3474_v4 = vshrl.u32 %v9010_v41, 16  ;;  %v3444_v3 = vrot.slane %v3443_v16, 4  ;;  %v9103_v26 = vld [vmem:[#allocation2 + $0x1c] sm:$0xf] }
 0x1d8   : > { %7409 = vmatprep.mubr.msk.bf16.mxu0 %vm1779_vm5, %v6767_v24  ;;  %v3998_v33 = vsel %vm8388_vm3, %v6751_v8, %v3997_v43  ;;  %v3999_v27 = vrot.slane %v3997_v43, 4  ;;  %v3463_v14 = vrot.slane %v3461_v2, 4  ;;  %v3454_v19 = vrot.slane %v3453_v1, 4 }
 0x1d9   : > { %v3466_v38 = vrot.slane %v3464_v52, 5  ;;  %v3472_v47 = vrot.slane %v3470_v61, 5  ;;  %v3476_v32 = vrot.slane %v3474_v4, 4  ;;  %v3449_v22 = vsel %vm7870_vm8, %v3444_v3, %v3448_v56  ;;  %v9132_v3 = vld [vmem:[#allocation2 + $0x28] sm:$0xf] }
 0x1da   : > { %v4001_v21 = vsel %vm8388_vm3, %v3999_v27, %v4000_v23  ;;  %v3480_v41 = vshll.u32 %v9021_v30, 16  ;;  %v4704_v12 = vshrl.u32 %v4655_v31, 16  ;;  %v3459_v45 = vsel %vm7870_vm8, %v3454_v19, %v3458_v5  ;;  %v9134_v27 = vpop.f32.mrf.mxu1 }
 0x1db   : > { %v6768_v34 = vcombine.low %v3998_v33, %v4001_v21  ;;  %v3467_v58 = vor.u32 %v3466_v38, %v3463_v14  ;;  %v3477_v17 = vor.u32 %v3476_v32, %v3472_v47  ;;  %v6716_v30 = vcombine.low %v3449_v22, %v3459_v45  ;;  %v9136_v14 = vpop.f32.mrf.mxu0  ;;  %v9140_v32 = vld [vmem:[#allocation2 + $0x2c] sm:$0x1] }
 0x1dc   : > { %7364 = vmatmul.mubr.msk.bf16.gmra.mxu1 %vm1779_vm5, %v9029_v55  ;;  %v3482_v59 = vrot.slane %v3480_v41, 5  ;;  %v4706_v20 = vrot.slane %v4704_v12, 4  ;;  %v4707_v11 = vshll.u32 %v4655_v31, 16  ;;  %v4713_v55 = vshll.u32 %v9103_v26, 16  ;;  %10557 = vst [vmem:[#allocation3_spill] sm:$0xff] %v9136_v14 }
 0x1dd   : > { %7367 = vmatprep.mubr.msk.bf16.mxu1 %vm1779_vm5, %v9062_v60  ;;  %v3468_v0 = vrot.slane %v3467_v58, 4  ;;  %v3478_v10 = vrot.slane %v3477_v17, 4  ;;  %v4717_v37 = vshrl.u32 %v9103_v26, 16  ;;  %v4723_v62 = vshll.u32 %v9111_v63, 16  ;;  %v3145_v41 = vld [vmem:[#allocation2 + $0xc0] sm:$0xf] }
 0x1de   : > { %v4709_v49 = vrot.slane %v4707_v11, 5  ;;  %v3485_v36 = vshrl.u32 %v3142_v50, 16  ;;  %v3488_v29 = vshll.u32 %v3142_v50, 16  ;;  %v4715_v28 = vrot.slane %v4713_v55, 5  ;;  %v9321_v14 = vld [vmem:[#allocation2 + $0x8c] sm:$0x1] }
 0x1df   : > { %7410 = vmatmul.mubr.msk.bf16.gmra.mxu0 %vm1779_vm5, %v6768_v34  ;;  %v3473_v60 = vsel %vm7870_vm8, %v3468_v0, %v3472_v47  ;;  %v3483_v24 = vsel %vm7870_vm8, %v3478_v10, %v3482_v59  ;;  %v4719_v56 = vrot.slane %v4717_v37, 4  ;;  %v4725_v16 = vrot.slane %v4723_v62, 5  ;;  %v9150_v59 = vpop.f32.mrf.mxu1 }
 0x1e0   : > { %v6717_v5 = vcombine.low %v3473_v60, %v3483_v24  ;;  %v4710_v8 = vor.u32 %v4709_v49, %v4706_v20  ;;  %v3487_v43 = vrot.slane %v3485_v36, 4  ;;  %v3490_v2 = vrot.slane %v3488_v29, 5  ;;  %v9152_v20 = vpop.f32.mrf.mxu0  ;;  %v4661_v29 = vld [vmem:[#allocation2 + $0x30] sm:$0xf] }
 0x1e1   : > { %v4720_v23 = vor.u32 %v4719_v56, %v4715_v28  ;;  %v3494_v1 = vshll.u32 %v9043_v51, 16  ;;  %v3498_v52 = vshrl.u32 %v9043_v51, 16  ;;  %v3504_v4 = vshll.u32 %v9047_v15, 16 }
 0x1e2   : > { %v4711_v61 = vrot.slane %v4710_v8, 4  ;;  %v5186_v31 = vsel %vm1828_vm4, %v8598_v13, 0  ;;  %v4728_v33 = vshrl.u32 %v4658_v44, 16  ;;  %v3491_v38 = vor.u32 %v3490_v2, %v3487_v43  ;;  %v9163_v2 = vpop.f32.mrf.mxu1 }
 0x1e3   : > { %v4721_v19 = vrot.slane %v4720_v23, 4  ;;  %v3496_v47 = vrot.slane %v3494_v1, 5  ;;  %v3500_v51 = vrot.slane %v3498_v52, 4  ;;  %7448 = vmatpush3.bf16.msra.mxu0 %v5186_v31  ;;  %v3506_v15 = vrot.slane %v3504_v4, 5  ;;  %v9161_v23 = vld [vmem:[#allocation2 + $0x34] sm:$0xf]  ;;  %v9165_v1 = vpop.f32.mrf.mxu0 }
 0x1e4   : > { %7368 = vmatmul.mubr.msk.bf16.gmra.mxu1 %vm1779_vm5, %v9086_v48  ;;  %v4716_v13 = vsel %vm7870_vm8, %v4711_v61, %v4715_v28  ;;  %v4730_v22 = vrot.slane %v4728_v33, 4  ;;  %v4731_v21 = vshll.u32 %v4658_v44, 16  ;;  %v3492_v48 = vrot.slane %v3491_v38, 4  ;;  %v9172_v38 = vld [vmem:[#allocation2 + $0x38] sm:$0x1] }
 0x1e5   : > { %7371 = vmatprep.mubr.msk.bf16.mxu1 %vm1779_vm5, %v6716_v30  ;;  %v4726_v12 = vsel %vm7870_vm8, %v4721_v19, %v4725_v16  ;;  %v3501_v45 = vor.u32 %v3500_v51, %v3496_v47  ;;  %v4737_v34 = vshll.u32 %v9132_v3, 16  ;;  %v4741_v50 = vshrl.u32 %v9132_v3, 16 }
 0x1e6   : > { %v6819_v58 = vcombine.low %v4716_v13, %v4726_v12  ;;  %v4733_v17 = vrot.slane %v4731_v21, 5  ;;  %v4747_v30 = vshll.u32 %v9140_v32, 16  ;;  %v3497_v11 = vsel %vm7870_vm8, %v3492_v48, %v3496_v47  ;;  %v9178_v48 = vld [vmem:[#allocation2 + $0x40] sm:$0xf] }
 0x1e7   : > { %v3502_v0 = vrot.slane %v3501_v45, 4  ;;  %v4739_v10 = vrot.slane %v4737_v34, 5  ;;  %v3509_v55 = vshrl.u32 %v3145_v41, 16  ;;  %v4743_v49 = vrot.slane %v4741_v50, 4  ;;  %v9182_v34 = vpop.f32.mrf.mxu0 }
 0x1e8   : > { %7449 = vmatprep.mubr.msk.bf16.mxu0 %vm1779_vm5, %v6819_v58  ;;  %v4734_v37 = vor.u32 %v4733_v17, %v4730_v22  ;;  %v4749_v62 = vrot.slane %v4747_v30, 5  ;;  %v3512_v36 = vshll.u32 %v3145_v41, 16  ;;  %v3518_v28 = vshll.u32 %v9078_v25, 16  ;;  %v4664_v22 = vld [vmem:[#allocation2 + $0x3c] sm:$0xf] }
 0x1e9   : > { %v3507_v60 = vsel %vm7870_vm8, %v3502_v0, %v3506_v15  ;;  %v3511_v24 = vrot.slane %v3509_v55, 4  ;;  %v3522_v56 = vshrl.u32 %v9078_v25, 16  ;;  %v4744_v16 = vor.u32 %v4743_v49, %v4739_v10  ;;  %v9190_v49 = vld [vmem:[#allocation2 + $0x44] sm:$0x1] }
 0x1ea   : > { %v6718_v44 = vcombine.low %v3497_v11, %v3507_v60  ;;  %v4735_v8 = vrot.slane %v4734_v37, 4  ;;  %v3514_v43 = vrot.slane %v3512_v36, 5  ;;  %v3520_v52 = vrot.slane %v3518_v28, 5  ;;  %v9180_v45 = vpop.f32.mrf.mxu1 }
 0x1eb   : > { %v3524_v61 = vrot.slane %v3522_v56, 4  ;;  %v3528_v4 = vshll.u32 %v9080_v57, 16  ;;  %v4752_v31 = vshrl.u32 %v4661_v29, 16  ;;  %v4745_v33 = vrot.slane %v4744_v16, 4  ;;  %v7652_v56 = vld [vmem:[#allocation2 + $0x18] sm:$0xff]   ;;  %v9195_v16 = vpop.f32.mrf.mxu0 }
 0x1ec   : > { %7372 = vmatmul.mubr.msk.bf16.gmra.mxu1 %vm1779_vm5, %v6717_v5  ;;  %v4740_v25 = vsel %vm7870_vm8, %v4735_v8, %v4739_v10  ;;  %v3515_v19 = vor.u32 %v3514_v43, %v3511_v24  ;;  %v4755_v47 = vshll.u32 %v4661_v29, 16  ;;  %v4761_v5 = vshll.u32 %v9161_v23, 16  ;;  %v4667_v29 = vld [vmem:[#allocation2 + $0x48] sm:$0xf]  ;;  %v9193_v8 = vpop.f32.mrf.mxu1 }
 0x1ed   : > { %7375 = vmatprep.mubr.msk.bf16.mxu1 %vm1779_vm5, %v6718_v44  ;;  %v3525_v51 = vor.u32 %v3524_v61, %v3520_v52  ;;  %v3530_v13 = vrot.slane %v3528_v4, 5  ;;  %v4754_v15 = vrot.slane %v4752_v31, 4  ;;  %v4750_v57 = vsel %vm7870_vm8, %v4745_v33, %v4749_v62  ;;  %v9198_v31 = vld [vmem:[#allocation2 + $0x4c] sm:$0xf] }
 0x1ee   : > { %v3516_v21 = vrot.slane %v3515_v19, 4  ;;  %v4757_v41 = vrot.slane %v4755_v47, 5  ;;  %v4765_v12 = vshrl.u32 %v9161_v23, 16  ;;  %v6820_v58 = vcombine.low %v4740_v25, %v4750_v57 }
 0x1ef   : > { %v3526_v17 = vrot.slane %v3525_v51, 4  ;;  %v4763_v50 = vrot.slane %v4761_v5, 5  ;;  %v4771_v30 = vshll.u32 %v9172_v38, 16  ;;  %v4776_v10 = vshrl.u32 %v4664_v22, 16  ;;  %v9209_v5 = vld [vmem:[#allocation2 + $0x50] sm:$0x1] }
 0x1f0   : > { %v4758_v11 = vor.u32 %v4757_v41, %v4754_v15  ;;  %v4767_v0 = vrot.slane %v4765_v12, 4  ;;  %7450 = vmatmul.mubr.msk.bf16.vlgmr.msra.gmra.mxu0 %vm1779_vm5, %v6820_v58  ;;  %v3521_v55 = vsel %vm7870_vm8, %v3516_v21, %v3520_v52  ;;  %v4779_v62 = vshll.u32 %v4664_v22, 16  ;;  %v9217_v12 = vpop.f32.mrf.mxu0 }
 0x1f1   : > { %v3531_v37 = vsel %vm7870_vm8, %v3526_v17, %v3530_v13  ;;  %v4785_v36 = vshll.u32 %v9178_v48, 16  ;;  %v4778_v44 = vrot.slane %v4776_v10, 4  ;;  %v4773_v43 = vrot.slane %v4771_v30, 5 }
 0x1f2   : > { %v6719_v60 = vcombine.low %v3521_v55, %v3531_v37  ;;  %v4759_v24 = vrot.slane %v4758_v11, 4  ;;  %v4768_v28 = vor.u32 %v4767_v0, %v4763_v50  ;;  %v4781_v52 = vrot.slane %v4779_v62, 5  ;;  %v4670_v37 = vld [vmem:[#allocation2 + $0x54] sm:$0xf] }
 0x1f3   : > { %v4787_v61 = vrot.slane %v4785_v36, 5  ;;  %v4789_v4 = vshrl.u32 %v9178_v48, 16  ;;  %v4795_v33 = vshll.u32 %v9190_v49, 16  ;;  %v9204_v19 = vadd.f32 %v9012_v54, %v9118_v18  ;;  %v9215_v18 = vpop.f32.mrf.mxu1 }
 0x1f4   : > { %7376 = vmatmul.mubr.msk.bf16.gmra.mxu1 %vm1779_vm5, %v6719_v60  ;;  %v4769_v25 = vrot.slane %v4768_v28, 4  ;;  %v4800_v47 = vshrl.u32 %v4667_v29, 16  ;;  %v4764_v51 = vsel %vm7870_vm8, %v4759_v24, %v4763_v50  ;;  %v4782_v13 = vor.u32 %v4781_v52, %v4778_v44  ;;  %v9227_v24 = vld [vmem:[#allocation2 + $0x58] sm:$0xf] }
 0x1f5   : > { %7415 = vmatprep.mubr.msk.bf16.mxu1 %vm1779_vm5, %v7652_v56  ;;  %v4791_v15 = vrot.slane %v4789_v4, 4  ;;  %v4803_v22 = vshll.u32 %v4667_v29, 16  ;;  %v4809_v41 = vshll.u32 %v9198_v31, 16  ;;  %v4813_v54 = vshrl.u32 %v9198_v31, 16  ;;  %v7653_v56 = vld [vmem:[#allocation2 + $0x24] sm:$0xff]  }
 0x1f6   : > { %v4774_v57 = vsel %vm7870_vm8, %v4769_v25, %v4773_v43  ;;  %v4802_v21 = vrot.slane %v4800_v47, 4  ;;  %v4783_v17 = vrot.slane %v4782_v13, 4  ;;  %v4797_v11 = vrot.slane %v4795_v33, 5  ;;  %v9235_v4 = vld [vmem:[#allocation2 + $0x5c] sm:$0x1]  ;;  %v9237_v25 = vpop.f32.mrf.mxu1  ;;  %v7654_v33 = vld [vmem:[#allocation2 + $0x30] sm:$0xff]  }
 0x1f7   : > { %v6821_v58 = vcombine.low %v4764_v51, %v4774_v57  ;;  %v4792_v50 = vor.u32 %v4791_v15, %v4787_v61  ;;  %v4805_v30 = vrot.slane %v4803_v22, 5  ;;  %v4811_v0 = vrot.slane %v4809_v41, 5  ;;  %10558 = vst [vmem:[#allocation4_spill] sm:$0xff] %v9237_v25  ;;  %v4673_v15 = vld [vmem:[#allocation2 + $0x60] sm:$0xf] }
 0x1f8   : > { %v4815_v10 = vrot.slane %v4813_v54, 4  ;;  %v4819_v55 = vshll.u32 %v9209_v5, 16  ;;  %v5656_v29 = vsel %vm1828_vm4, %v8944_v35, 0  ;;  %v9225_v60 = vadd.f32 %v9033_v9, %v9134_v27  ;;  %v9239_v35 = vpop.f32.mrf.mxu0  ;;  %v9250_v54 = vld [vmem:[#allocation2 + $0x64] sm:$0xf] }
 0x1f9   : > { %7453 = vmatprep.mubr.msk.bf16.mxu0 %vm1779_vm5, %v6821_v58  ;;  %v4793_v62 = vrot.slane %v4792_v50, 4  ;;  %v4806_v36 = vor.u32 %v4805_v30, %v4802_v21  ;;  %v4788_v28 = vsel %vm7870_vm8, %v4783_v17, %v4787_v61  ;;  %v9233_v52 = vadd.f32 %v9052_v53, %v9150_v59 }
 0x1fa   : > { %v4816_v44 = vor.u32 %v4815_v10, %v4811_v0  ;;  %v4821_v43 = vrot.slane %v4819_v55, 5  ;;  %v4824_v47 = vshrl.u32 %v4670_v37, 16  ;;  %v4827_v61 = vshll.u32 %v4670_v37, 16  ;;  %v9261_v10 = vpop.f32.mrf.mxu0 }
 0x1fb   : > { %v4798_v9 = vsel %vm7870_vm8, %v4793_v62, %v4797_v11  ;;  %v4807_v27 = vrot.slane %v4806_v36, 4  ;;  %v4833_v53 = vshll.u32 %v9227_v24, 16  ;;  %v4837_v59 = vshrl.u32 %v9227_v24, 16  ;;  %v9259_v11 = vld [vmem:[#allocation2 + $0x68] sm:$0x1] }
 0x1fc   : > { %v6822_v51 = vcombine.low %v4788_v28, %v4798_v9  ;;  %7416 = vmatmul.mubr.msk.bf16.vlgmr.msra.gmra.mxu1 %vm1779_vm5, %v7653_v56  ;;  %v4817_v13 = vrot.slane %v4816_v44, 4  ;;  %v4826_v57 = vrot.slane %v4824_v47, 4  ;;  %v4829_v21 = vrot.slane %v4827_v61, 5 }
 0x1fd   : > { %v4812_v22 = vsel %vm7870_vm8, %v4807_v27, %v4811_v0  ;;  %7482 = vmatpush3.bf16.msra.mxu1 %v5656_v29  ;;  %7419 = vmatprep.mubr.msk.bf16.mxu1 %vm1779_vm5, %v7654_v33  ;;  %v4843_v41 = vshll.u32 %v9235_v4, 16  ;;  %v4835_v17 = vrot.slane %v4833_v53, 5  ;;  %v4839_v50 = vrot.slane %v4837_v59, 4  ;;  %v7221_v0 = vpop.f32.mrf.mxu1  ;;  %v4676_v33 = vld [vmem:[#allocation2 + $0x6c] sm:$0xf] }
 0x1fe   : > { %7454 = vmatmul.mubr.msk.bf16.gmra.mxu0 %vm1779_vm5, %v6822_v51  ;;  %v4822_v58 = vsel %vm7870_vm8, %v4817_v13, %v4821_v43  ;;  %v9257_v30 = vadd.f32 %v9090_v7, %v9180_v45  ;;  %v4830_v37 = vor.u32 %v4829_v21, %v4826_v57  ;;  %v4848_v36 = vshrl.u32 %v4673_v15, 16  ;;  %v7655_v7 = vld [vmem:[#allocation2 + $0x3c] sm:$0xff]   ;;  %v9271_v53 = vld [vmem:[#allocation2 + $0x70] sm:$0xf]  ;;  %v7656_v21 = vld [vmem:[#allocation2 + $0x48] sm:$0xff]  }
 0x1ff   : > { %v6823_v55 = vcombine.low %v4812_v22, %v4822_v58  ;;  %v4845_v62 = vrot.slane %v4843_v41, 5  ;;  %v4840_v29 = vor.u32 %v4839_v50, %v4835_v17  ;;  %v4851_v28 = vshll.u32 %v4673_v15, 16  ;;  %v1898_v59 = vpop.f32.mrf.mxu1  ;;  %v9273_v15 = vpop.f32.mrf.mxu0 }
 0x200   : > { %v4857_v56 = vshll.u32 %v9250_v54, 16  ;;  %v4861_v44 = vshrl.u32 %v9250_v54, 16  ;;  %v4831_v43 = vrot.slane %v4830_v37, 4  ;;  %v4850_v45 = vrot.slane %v4848_v36, 4 }
 0x201   : > { %7457 = vmatprep.mubr.msk.bf16.mxu0 %vm1779_vm5, %v6823_v55  ;;  %v4867_v9 = vshll.u32 %v9259_v11, 16  ;;  %v9269_v27 = vadd.f32 %v9105_v42, %v9193_v8  ;;  %v4841_v47 = vrot.slane %v4840_v29, 4  ;;  %v4853_v61 = vrot.slane %v4851_v28, 5  ;;  %v9281_v42 = vld [vmem:[#allocation2 + $0x74] sm:$0x1] }
 0x202   : > { %v4859_v51 = vrot.slane %v4857_v56, 5  ;;  %v4863_v13 = vrot.slane %v4861_v44, 4  ;;  %v4836_v22 = vsel %vm7870_vm8, %v4831_v43, %v4835_v17  ;;  %v9279_v41 = vadd.f32 %v9120_v39, %v9215_v18  ;;  %v4679_v39 = vld [vmem:[#allocation2 + $0x78] sm:$0xf]  ;;  %v7222_v43 = vpop.f32.mrf.mxu1 }
 0x203   : > { %10559 = vst [vmem:[#allocation5_spill] sm:$0xff] %v9269_v27  ;;  %v4869_v57 = vrot.slane %v4867_v9, 5  ;;  %v4846_v8 = vsel %vm7870_vm8, %v4841_v47, %v4845_v62  ;;  %v4854_v58 = vor.u32 %v4853_v61, %v4850_v45  ;;  %v4872_v55 = vshrl.u32 %v4676_v33, 16  ;;  %v9290_v62 = vld [vmem:[#allocation2 + $0x7c] sm:$0xf] }
 0x204   : > { %10560 = vst [vmem:[#allocation6_spill] sm:$0xff] %v9279_v41  ;;  %7420 = vmatmul.mubr.msk.bf16.gmra.mxu1 %vm1779_vm5, %v7655_v7  ;;  %v4864_v50 = vor.u32 %v4863_v13, %v4859_v51  ;;  %v6824_v37 = vcombine.low %v4836_v22, %v4846_v8  ;;  %v4875_v17 = vshll.u32 %v4676_v33, 16  ;;  %v4881_v36 = vshll.u32 %v9271_v53, 16  ;;  %v9298_v61 = vld [vmem:[#allocation2 + $0x80] sm:$0x1] }
 0x205   : > { %7423 = vmatprep.mubr.msk.bf16.mxu1 %vm1779_vm5, %v7656_v21  ;;  %v4885_v29 = vshrl.u32 %v9271_v53, 16  ;;  %v4855_v18 = vrot.slane %v4854_v58, 4  ;;  %v4874_v56 = vrot.slane %v4872_v55, 4  ;;  %v4891_v44 = vshll.u32 %v9281_v42, 16  ;;  %v9292_v7 = vpop.f32.mrf.mxu0 }
 0x206   : > { %v4865_v28 = vrot.slane %v4864_v50, 4  ;;  %7458 = vmatmul.mubr.msk.bf16.gmra.mxu0 %vm1779_vm5, %v6824_v37  ;;  %v4877_v45 = vrot.slane %v4875_v17, 5  ;;  %v4883_v9 = vrot.slane %v4881_v36, 5  ;;  %v9296_v47 = vadd.f32 %v9152_v20, %v7221_v0  ;;  %v7657_v17 = vld [vmem:[#allocation2 + $0x54] sm:$0xff]  }
 0x207   : > { %v4887_v33 = vrot.slane %v4885_v29, 4  ;;  %v4860_v13 = vsel %vm7870_vm8, %v4855_v18, %v4859_v51  ;;  %v4893_v21 = vrot.slane %v4891_v44, 5  ;;  %v4896_v8 = vshrl.u32 %v4679_v39, 16  ;;  %v9304_v58 = vpop.f32.mrf.mxu0  ;;  %v1901_v51 = vpop.f32.mrf.mxu1  ;;  %v4682_v18 = vld [vmem:[#allocation2 + $0x84] sm:$0xf] }
 0x208   : > { %10561 = vst [vmem:[#allocation7_spill] sm:$0xff] %v9296_v47  ;;  %v4870_v22 = vsel %vm7870_vm8, %v4865_v28, %v4869_v57  ;;  %v4878_v55 = vor.u32 %v4877_v45, %v4874_v56  ;;  %v4899_v36 = vshll.u32 %v4679_v39, 16  ;;  %v4905_v20 = vshll.u32 %v9290_v62, 16  ;;  %v7658_v56 = vld [vmem:[#allocation2 + $0x60] sm:$0xff]   ;;  %v9315_v39 = vld [vmem:[#allocation2 + $0x88] sm:$0xf] }
 0x209   : > { %v6825_v50 = vcombine.low %v4860_v13, %v4870_v22  ;;  %v4888_v37 = vor.u32 %v4887_v33, %v4883_v9  ;;  %v4898_v29 = vrot.slane %v4896_v8, 4  ;;  %v4909_v0 = vshrl.u32 %v9290_v62, 16  ;;  %v9309_v41 = vpop.f32.mrf.mxu0 }
 0x20a   : > { %v4915_v47 = vshll.u32 %v9298_v61, 16  ;;  %v4879_v57 = vrot.slane %v4878_v55, 4  ;;  %v4901_v44 = vrot.slane %v4899_v36, 5  ;;  %v9313_v45 = vadd.f32 %v9165_v1, %v1898_v59 }
 0x20b   : > { %7461 = vmatprep.mubr.msk.bf16.mxu0 %vm1779_vm5, %v6825_v50  ;;  %v4889_v28 = vrot.slane %v4888_v37, 4  ;;  %v4907_v33 = vrot.slane %v4905_v20, 5  ;;  %v4911_v13 = vrot.slane %v4909_v0, 4  ;;  %v9319_v8 = vadd.f32 %v9182_v34, %v7222_v43  ;;  %v9323_v50 = vpop.f32.mrf.mxu0 }
 0x20c   : > { %10562 = vst [vmem:[#allocation8_spill] sm:$0xff] %v9313_v45  ;;  %7424 = vmatmul.mubr.msk.bf16.gmra.mxu1 %vm1779_vm5, %v7657_v17  ;;  %v4917_v22 = vrot.slane %v4915_v47, 5  ;;  %10564 = vst [vmem:[#allocation10_spill] sm:$0xff] %v9323_v50  ;;  %v4884_v55 = vsel %vm7870_vm8, %v4879_v57, %v4883_v9  ;;  %v4902_v59 = vor.u32 %v4901_v44, %v4898_v29  ;;  %v4920_v34 = vshrl.u32 %v4682_v18, 16  ;;  %v4685_v29 = vld [vmem:[#allocation2 + $0x90] sm:$0xf] }
 0x20d   : > { %10563 = vst [vmem:[#allocation9_spill] sm:$0xff] %v9319_v8  ;;  %v4894_v1 = vsel %vm7870_vm8, %v4889_v28, %v4893_v21  ;;  %7427 = vmatprep.mubr.msk.bf16.mxu1 %vm1779_vm5, %v7658_v56  ;;  %v9331_v37 = vadd.f32 %v9195_v16, %v1901_v51  ;;  %v4912_v17 = vor.u32 %v4911_v13, %v4907_v33  ;;  %v4923_v43 = vshll.u32 %v4682_v18, 16  ;;  %v9333_v36 = vpop.f32.mrf.mxu0  ;;  %v9342_v18 = vld [vmem:[#allocation2 + $0x94] sm:$0xf]  ;;  %v9348_v50 = vld [vmem:[#allocation2 + $0x98] sm:$0x1] }
 0x20e   : > { %v6826_v47 = vcombine.low %v4884_v55, %v4894_v1  ;;  %v4903_v20 = vrot.slane %v4902_v59, 4  ;;  %v4929_v0 = vshll.u32 %v9315_v39, 16  ;;  %v4933_v9 = vshrl.u32 %v9315_v39, 16  ;;  %10567 = vst [vmem:[#allocation13_spill] sm:$0xff] %v9342_v18  ;;  %10568 = vst [vmem:[#allocation14_spill] sm:$0xff] %v9348_v50 }
 0x20f   : > { %10565 = vst [vmem:[#allocation11_spill] sm:$0xff] %v9331_v37  ;;  %v4939_v57 = vshll.u32 %v9321_v14, 16  ;;  %v7225_v21 = vpop.f32.mrf.mxu1  ;;  %v4913_v28 = vrot.slane %v4912_v17, 4  ;;  %v4922_v16 = vrot.slane %v4920_v34, 4  ;;  %v4925_v51 = vrot.slane %v4923_v43, 5  ;;  %v9344_v56 = vpop.f32.mrf.mxu0  ;;  %v7659_v34 = vld [vmem:[#allocation2 + $0x6c] sm:$0xff]  }
 0x210   : > { %7462 = vmatmul.mubr.msk.bf16.gmra.mxu0 %vm1779_vm5, %v6826_v47  ;;  %v9340_v44 = vadd.f32 %v9217_v12, %v7225_v21  ;;  %v4908_v13 = vsel %vm7870_vm8, %v4903_v20, %v4907_v33  ;;  %v4931_v55 = vrot.slane %v4929_v0, 5  ;;  %v4935_v1 = vrot.slane %v4933_v9, 4  ;;  %v7660_v20 = vld [vmem:[#allocation2 + $0x78] sm:$0xff]  }
 0x211   : > { %v4941_v59 = vrot.slane %v4939_v57, 5  ;;  %v1914_v37 = vpop.f32.mrf.mxu1  ;;  %v4918_v47 = vsel %vm7870_vm8, %v4913_v28, %v4917_v22  ;;  %v4926_v17 = vor.u32 %v4925_v51, %v4922_v16  ;;  %v4944_v12 = vshrl.u32 %v4685_v29, 16  ;;  %v9352_v21 = vpop.f32.mrf.mxu0  ;;  %v4688_v28 = vld [vmem:[#allocation2 + $0x9c] sm:$0xf] }
 0x212   : > { %10566 = vst [vmem:[#allocation12_spill] sm:$0xff] %v9340_v44  ;;  %v4947_v43 = vshll.u32 %v4685_v29, 16  ;;  %v6827_v44 = vcombine.low %v4908_v13, %v4918_v47  ;;  %v4936_v8 = vor.u32 %v4935_v1, %v4931_v55  ;;  %v4953_v45 = vshll.u32 %v9342_v18, 16 }
 0x213   : > { %v4957_v33 = vshrl.u32 %v9342_v18, 16  ;;  %v7226_v0 = vpop.f32.mrf.mxu1  ;;  %v4927_v9 = vrot.slane %v4926_v17, 4  ;;  %v4946_v57 = vrot.slane %v4944_v12, 4  ;;  %v4963_v22 = vshll.u32 %v9348_v50, 16  ;;  %v9358_v16 = vpop.f32.mrf.mxu0  ;;  %v9365_v17 = vld [vmem:[#allocation2 + $0xa0] sm:$0xf] }
 0x214   : > { %7428 = vmatmul.mubr.msk.bf16.gmra.mxu1 %vm1779_vm5, %v7659_v34  ;;  %v4949_v25 = vrot.slane %v4947_v43, 5  ;;  %10569 = vst [vmem:[#allocation15_spill] sm:$0xff] %v9358_v16  ;;  %7465 = vmatprep.mubr.msk.bf16.mxu0 %vm1779_vm5, %v6827_v44  ;;  %v4937_v29 = vrot.slane %v4936_v8, 4  ;;  %v4955_v51 = vrot.slane %v4953_v45, 5  ;;  %v9363_v1 = vadd.f32 %v9239_v35, %v1914_v37  ;;  %10571 = vst [vmem:[#allocation17_spill] sm:$0xff] %v9365_v17 }
 0x215   : > { %v4959_v13 = vrot.slane %v4957_v33, 4  ;;  %7431 = vmatprep.mubr.msk.bf16.mxu1 %vm1779_vm5, %v7660_v20  ;;  %v1917_v47 = vpop.f32.mrf.mxu1  ;;  %v4932_v34 = vsel %vm7870_vm8, %v4927_v9, %v4931_v55  ;;  %v9370_v43 = vadd.f32 %v9261_v10, %v7226_v0  ;;  %v9379_v35 = vld [vmem:[#allocation2 + $0xa4] sm:$0x1]  ;;  %v4968_v37 = vshrl.u32 %v4688_v28, 16  ;;  %v4691_v55 = vld [vmem:[#allocation2 + $0xa8] sm:$0xf] }
 0x216   : > { %10570 = vst [vmem:[#allocation16_spill] sm:$0xff] %v9363_v1  ;;  %v4950_v12 = vor.u32 %v4949_v25, %v4946_v57  ;;  %v9372_v16 = vpop.f32.mrf.mxu0  ;;  %v4942_v45 = vsel %vm7870_vm8, %v4937_v29, %v4941_v59  ;;  %v9377_v44 = vadd.f32 %v9273_v15, %v1917_v47  ;;  %10574 = vst [vmem:[#allocation20_spill] sm:$0xff] %v9379_v35  ;;  %v4971_v1 = vshll.u32 %v4688_v28, 16 }
 0x217   : > { %10572 = vst [vmem:[#allocation18_spill] sm:$0xff] %v9370_v43  ;;  %v4960_v8 = vor.u32 %v4959_v13, %v4955_v51  ;;  %v6828_v33 = vcombine.low %v4932_v34, %v4942_v45  ;;  %v4977_v25 = vshll.u32 %v9365_v17, 16  ;;  %v4965_v9 = vrot.slane %v4963_v22, 5  ;;  %v9385_v13 = vld [vmem:[#allocation2 + $0xac] sm:$0xf] }
 0x218   : > { %10573 = vst [vmem:[#allocation19_spill] sm:$0xff] %v9377_v44  ;;  %v4951_v20 = vrot.slane %v4950_v12, 4  ;;  %v9382_v10 = vpop.f32.mrf.mxu0  ;;  %v4970_v57 = vrot.slane %v4968_v37, 4  ;;  %v4981_v59 = vshrl.u32 %v9365_v17, 16  ;;  %10575 = vst [vmem:[#allocation21_spill] sm:$0xff] %v9385_v13  ;;  %v4973_v15 = vrot.slane %v4971_v1, 5 }
 0x219   : > { %v4961_v0 = vrot.slane %v4960_v8, 4  ;;  %v7229_v29 = vpop.f32.mrf.mxu1  ;;  %7466 = vmatmul.mubr.msk.bf16.gmra.mxu0 %vm1779_vm5, %v6828_v33  ;;  %v4979_v47 = vrot.slane %v4977_v25, 5  ;;  %v4987_v34 = vshll.u32 %v9379_v35, 16  ;;  %v7661_v12 = vld [vmem:[#allocation2 + $0x84] sm:$0xff]   ;;  %v9392_v45 = vld [vmem:[#allocation2 + $0xb0] sm:$0x1] }
 0x21a   : > { %v9390_v28 = vadd.f32 %v9292_v7, %v7229_v29  ;;  %10577 = vst [vmem:[#allocation23_spill] sm:$0xff] %v9392_v45  ;;  %v9394_v8 = vpop.f32.mrf.mxu0  ;;  %v4956_v22 = vsel %vm7870_vm8, %v4951_v20, %v4955_v51  ;;  %v4983_v44 = vrot.slane %v4981_v59, 4  ;;  %v4992_v33 = vshrl.u32 %v4691_v55, 16  ;;  %v7662_v1 = vld [vmem:[#allocation2 + $0x90] sm:$0xff]  }
 0x21b   : > { %v4966_v37 = vsel %vm7870_vm8, %v4961_v0, %v4965_v9  ;;  %v1930_v25 = vpop.f32.mrf.mxu1  ;;  %v4974_v35 = vor.u32 %v4973_v15, %v4970_v57  ;;  %v4995_v7 = vshll.u32 %v4691_v55, 16  ;;  %v5001_v29 = vshll.u32 %v9385_v13, 16  ;;  %v4694_v9 = vld [vmem:[#allocation2 + $0xb4] sm:$0xf] }
 0x21c   : > { %10576 = vst [vmem:[#allocation22_spill] sm:$0xff] %v9390_v28  ;;  %v6829_v43 = vcombine.low %v4956_v22, %v4966_v37  ;;  %7432 = vmatmul.mubr.msk.bf16.gmra.mxu1 %vm1779_vm5, %v7661_v12  ;;  %v9402_v28 = vpop.f32.mrf.mxu0  ;;  %v4984_v50 = vor.u32 %v4983_v44, %v4979_v47  ;;  %v4994_v27 = vrot.slane %v4992_v33, 4  ;;  %v5005_v51 = vshrl.u32 %v9385_v13, 16  ;;  %v9411_v12 = vld [vmem:[#allocation2 + $0xb8] sm:$0xf] }
 0x21d   : > { %10578 = vst [vmem:[#allocation24_spill] sm:$0xff] %v9402_v28  ;;  %v5011_v20 = vshll.u32 %v9392_v45, 16  ;;  %7435 = vmatprep.mubr.msk.bf16.mxu1 %vm1779_vm5, %v7662_v1  ;;  %v7230_v0 = vpop.f32.mrf.mxu1  ;;  %v4975_v57 = vrot.slane %v4974_v35, 4  ;;  %v4997_v59 = vrot.slane %v4995_v7, 5  ;;  %v5003_v15 = vrot.slane %v5001_v29, 5  ;;  %10580 = vst [vmem:[#allocation26_spill] sm:$0xff] %v9411_v12 }
 0x21e   : > { %7469 = vmatprep.mubr.msk.bf16.mxu0 %vm1779_vm5, %v6829_v43  ;;  %v9409_v55 = vadd.f32 %v9304_v58, %v1930_v25  ;;  %v4985_v44 = vrot.slane %v4984_v50, 4  ;;  %v4989_v22 = vrot.slane %v4987_v34, 5  ;;  %v5007_v37 = vrot.slane %v5005_v51, 4  ;;  %v9422_v29 = vld [vmem:[#allocation2 + $0xbc] sm:$0x1] }
 0x21f   : > { %v9414_v33 = vadd.f32 %v9309_v41, %v7230_v0  ;;  %v9416_v28 = vpop.f32.mrf.mxu1  ;;  %v9418_v1 = vpop.f32.mrf.mxu0  ;;  %v4980_v43 = vsel %vm7870_vm8, %v4975_v57, %v4979_v47  ;;  %v4998_v35 = vor.u32 %v4997_v59, %v4994_v27  ;;  %v5013_v7 = vrot.slane %v5011_v20, 5  ;;  %10583 = vst [vmem:[#allocation29_spill] sm:$0xff] %v9422_v29  ;;  %v4697_v0 = vld [vmem:[#allocation2 + $0xc0] sm:$0xf]  ;;  %v7664_v20 = vld [vmem:[#allocation2 + $0xa8] sm:$0xff]  }
 0x220   : > { %10579 = vst [vmem:[#allocation25_spill] sm:$0xff] %v9409_v55  ;;  %10582 = vst [vmem:[#allocation28_spill] sm:$0xff] %v9416_v28  ;;  %v5016_v58 = vshrl.u32 %v4694_v9, 16  ;;  %v4990_v50 = vsel %vm7870_vm8, %v4985_v44, %v4989_v22  ;;  %v5008_v34 = vor.u32 %v5007_v37, %v5003_v15  ;;  %v5019_v25 = vshll.u32 %v4694_v9, 16  ;;  %v7663_v47 = vld [vmem:[#allocation2 + $0x9c] sm:$0xff]  }
 0x221   : > { %10581 = vst [vmem:[#allocation27_spill] sm:$0xff] %v9414_v33  ;;  %v5025_v41 = vshll.u32 %v9411_v12, 16  ;;  %v7233_v51 = vpop.f32.mrf.mxu1  ;;  %v9427_v33 = vpop.f32.mrf.mxu0  ;;  %v6830_v28 = vcombine.low %v4980_v43, %v4990_v50  ;;  %v4999_v45 = vrot.slane %v4998_v35, 4  ;;  %v5029_v27 = vshrl.u32 %v9411_v12, 16  ;;  %v9431_v22 = vld [vmem:[#allocation2 + $0xc4] sm:$0xf] }
 0x222   : > { %v5018_v55 = vrot.slane %v5016_v58, 4  ;;  %v5009_v57 = vrot.slane %v5008_v34, 4  ;;  %v5021_v59 = vrot.slane %v5019_v25, 5  ;;  %v5035_v44 = vshll.u32 %v9422_v29, 16  ;;  %v9442_v50 = vld [vmem:[#allocation2 + $0xc8] sm:$0x1] }
 0x223   : > { %v5027_v13 = vrot.slane %v5025_v41, 5  ;;  %v1946_v9 = vpop.f32.mrf.mxu1  ;;  %v9433_v37 = vpop.f32.mrf.mxu0  ;;  %7470 = vmatmul.mubr.msk.bf16.gmra.mxu0 %vm1779_vm5, %v6830_v28  ;;  %v5004_v43 = vsel %vm7870_vm8, %v4999_v45, %v5003_v15  ;;  %v5031_v35 = vrot.slane %v5029_v27, 4  ;;  %v9439_v58 = vadd.f32 %v9333_v36, %v7233_v51 }
 0x224   : > { %7436 = vmatmul.mubr.msk.bf16.gmra.mxu1 %vm1779_vm5, %v7663_v47  ;;  %v5040_v34 = vshrl.u32 %v4697_v0, 16  ;;  %v5014_v25 = vsel %vm7870_vm8, %v5009_v57, %v5013_v7  ;;  %v5022_v41 = vor.u32 %v5021_v59, %v5018_v55  ;;  %v5037_v29 = vrot.slane %v5035_v44, 5 }
 0x225   : > { %10584 = vst [vmem:[#allocation30_spill] sm:$0xff] %v9439_v58  ;;  %v5043_v12 = vshll.u32 %v4697_v0, 16  ;;  %7439 = vmatprep.mubr.msk.bf16.mxu1 %vm1779_vm5, %v7664_v20  ;;  %v7234_v28 = vpop.f32.mrf.mxu1  ;;  %v9447_v17 = vpop.f32.mrf.mxu0  ;;  %v6831_v45 = vcombine.low %v5004_v43, %v5014_v25  ;;  %v5032_v15 = vor.u32 %v5031_v35, %v5027_v13  ;;  %v5049_v51 = vshll.u32 %v9431_v22, 16  ;;  %v5381_v35 = vld [vmem:[#allocation2 + $0x18] sm:$0xe] }
 0x226   : > { %10585 = vst [vmem:[#allocation31_spill] sm:$0xff] %v9447_v17  ;;  %v5042_v36 = vrot.slane %v5040_v34, 4  ;;  %v5023_v27 = vrot.slane %v5022_v41, 4  ;;  %v5053_v58 = vshrl.u32 %v9431_v22, 16  ;;  %v5059_v18 = vshll.u32 %v9442_v50, 16 }
 0x227   : > { %v5045_v47 = vrot.slane %v5043_v12, 5  ;;  %v9452_v7 = vpop.f32.mrf.mxu1  ;;  %v9454_v55 = vpop.f32.mrf.mxu0  ;;  %7473 = vmatprep.mubr.msk.bf16.mxu0 %vm1779_vm5, %v6831_v45  ;;  %v5033_v0 = vrot.slane %v5032_v15, 4  ;;  %v5051_v20 = vrot.slane %v5049_v51, 5  ;;  %v9458_v57 = vadd.f32 %v9344_v56, %v1946_v9  ;;  %v4700_v34 = vld [vmem:[#allocation2 + $0xcc] sm:$0xf]  ;;  %v7665_v45 = vld [vmem:[#allocation2 + $0xb4] sm:$0xff]  }
 0x228   : > { %v9461_v59 = vadd.f32 %v9352_v21, %v7234_v28  ;;  %v5055_v12 = vrot.slane %v5053_v58, 4  ;;  %v5028_v25 = vsel %vm7870_vm8, %v5023_v27, %v5027_v13  ;;  %v5447_v15 = vrot.slane %v9103_v26, 5  ;;  %v9470_v56 = vld [vmem:[#allocation2 + $0xd0] sm:$0xf]  ;;  %v7666_v51 = vld [vmem:[#allocation2 + $0xc0] sm:$0xff]  }
 0x229   : > { %v5046_v44 = vor.u32 %v5045_v47, %v5042_v36  ;;  %v9463_v43 = vpop.f32.mrf.mxu0  ;;  %v5038_v41 = vsel %vm7870_vm8, %v5033_v0, %v5037_v29  ;;  %v5061_v36 = vrot.slane %v5059_v18, 5  ;;  %v6851_v13 = vrot.slane %v5381_v35, 9 }
 0x22a   : > { %v6832_v9 = vcombine.low %v5028_v25, %v5038_v41  ;;  %v5056_v28 = vor.u32 %v5055_v12, %v5051_v20  ;;  %v5449_v29 = vrot.slane %v5447_v15, 4  ;;  %v5064_v27 = vshrl.u32 %v4700_v34, 16 }
 0x22b   : > { %v5047_v21 = vrot.slane %v5046_v44, 4  ;;  %v7237_v58 = vpop.f32.mrf.mxu1  ;;  %v9472_v47 = vpop.f32.mrf.mxu0  ;;  %v5450_v18 = vrot.slane %v9111_v63, 5  ;;  %v9481_v44 = vld [vmem:[#allocation2 + $0xd4] sm:$0x1]  ;;  %v5067_v12 = vshll.u32 %v4700_v34, 16  ;;  %v5073_v25 = vshll.u32 %v9470_v56, 16 }
 0x22c   : > { %v9475_v17 = vadd.f32 %v9372_v16, %v7237_v58  ;;  %7440 = vmatmul.mubr.msk.bf16.gmra.mxu1 %vm1779_vm5, %v7665_v45  ;;  %7474 = vmatmul.mubr.msk.bf16.gmra.mxu0 %vm1779_vm5, %v6832_v9  ;;  %v5057_v26 = vrot.slane %v5056_v28, 4  ;;  %v5066_v45 = vrot.slane %v5064_v27, 4  ;;  %v5077_v9 = vshrl.u32 %v9470_v56, 16 }
 0x22d   : > { %7443 = vmatprep.mubr.msk.bf16.mxu1 %vm1779_vm5, %v7666_v51  ;;  %v1962_v0 = vpop.f32.mrf.mxu1  ;;  %v9484_v16 = vpop.f32.mrf.mxu0  ;;  %v5052_v35 = vsel %vm7870_vm8, %v5047_v21, %v5051_v20  ;;  %v5451_v34 = vsel %vm8388_vm3, %v5449_v29, %v5450_v18  ;;  %v5069_v58 = vrot.slane %v5067_v12, 5  ;;  %v5075_v51 = vrot.slane %v5073_v25, 5  ;;  %v5383_v12 = vld [vmem:[#allocation2 + $0x30] sm:$0xe] }
 0x22e   : > { %10586 = vst [vmem:[#allocation32_spill] sm:$0xff] %v9475_v17  ;;  %10587 = vst [vmem:[#allocation33_spill] sm:$0xff] %v9484_v16  ;;  %v9489_v41 = vadd.f32 %v9382_v10, %v1962_v0  ;;  %v5062_v28 = vsel %vm7870_vm8, %v5057_v26, %v5061_v36  ;;  %v7667_v10 = vld [vmem:[#allocation2 + $0xcc] sm:$0xff]   ;;  %v5079_v21 = vrot.slane %v5077_v9, 4  ;;  %v5083_v27 = vshll.u32 %v9481_v44, 16 }
 0x22f   : > { %v7238_v63 = vpop.f32.mrf.mxu1  ;;  %v9496_v17 = vpop.f32.mrf.mxu0  ;;  %v6833_v16 = vcombine.low %v5052_v35, %v5062_v28  ;;  %v5448_v36 = vsel %vm8388_vm3, %v6851_v13, %v5447_v15  ;;  %v5070_v26 = vor.u32 %v5069_v58, %v5066_v45  ;;  %v5454_v29 = vrot.slane %v9132_v3, 5 }
 0x230   : > { %10588 = vst [vmem:[#allocation34_spill] sm:$0xff] %v9489_v41  ;;  %v9499_v20 = vadd.f32 %v9394_v8, %v7238_v63  ;;  %v5382_v41 = vld [vmem:[#allocation2 + $0x24] sm:$0xe]  ;;  %v9511_v8 = vadd.f32 %v9069_v6, %v9163_v2  ;;  %v6868_v25 = vcombine.low %v5448_v36, %v5451_v34  ;;  %v5080_v35 = vor.u32 %v5079_v21, %v5075_v51  ;;  %v5384_v34 = vld [vmem:[#allocation2 + $0x3c] sm:$0xe] }
 0x231   : > { %v9502_v0 = vpop.f32.mrf.mxu1  ;;  %v9507_v18 = vpop.f32.mrf.mxu0  ;;  %7477 = vmatprep.mubr.msk.bf16.mxu0 %vm1779_vm5, %v6833_v16  ;;  %v5085_v9 = vrot.slane %v5083_v27, 5  ;;  %v5071_v63 = vrot.slane %v5070_v26, 4  ;;  %v5457_v15 = vrot.slane %v9140_v32, 5  ;;  %v5461_v13 = vrot.slane %v9161_v23, 5 }
 0x232   : > { %10589 = vst [vmem:[#allocation35_spill] sm:$0xff] %v9499_v20  ;;  %v5456_v20 = vrot.slane %v5454_v29, 4  ;;  %v5081_v6 = vrot.slane %v5080_v35, 4  ;;  %v6852_v2 = vrot.slane %v5382_v41, 9  ;;  %v6853_v16 = vrot.slane %v5383_v12, 9 }
 0x233   : > { %v7241_v28 = vpop.f32.mrf.mxu1  ;;  %v9516_v3 = vpop.f32.mrf.mxu0  ;;  %v5076_v21 = vsel %vm7870_vm8, %v5071_v63, %v5075_v51  ;;  %v5463_v23 = vrot.slane %v5461_v13, 4  ;;  %v5464_v27 = vrot.slane %v9172_v38, 5  ;;  %v5468_v26 = vrot.slane %v9178_v48, 5  ;;  %v5385_v51 = vld [vmem:[#allocation2 + $0x48] sm:$0xe] }
 0x234   : > { %v9519_v45 = vadd.f32 %v9418_v1, %v7241_v28  ;;  %7444 = vmatmul.mubr.msk.bf16.gmra.mxu1 %vm1779_vm5, %v7667_v10  ;;  %v5458_v32 = vsel %vm8388_vm3, %v5456_v20, %v5457_v15  ;;  %v5086_v41 = vsel %vm7870_vm8, %v5081_v6, %v5085_v9  ;;  %v5455_v36 = vsel %vm8388_vm3, %v6852_v2, %v5454_v29  ;;  %v5386_v28 = vld [vmem:[#allocation2 + $0x54] sm:$0xe]  ;;  %v5387_v63 = vld [vmem:[#allocation2 + $0x60] sm:$0xe] }
 0x235   : > { %7483 = vmatprep.mubr.msk.bf16.mxu1 %vm1779_vm5, %v6868_v25  ;;  %v1978_v58 = vpop.f32.mrf.mxu1  ;;  %v9528_v1 = vpop.f32.mrf.mxu0  ;;  %v6834_v12 = vcombine.low %v5076_v21, %v5086_v41  ;;  %v5462_v20 = vsel %vm8388_vm3, %v6853_v16, %v5461_v13  ;;  %v5465_v38 = vsel %vm8388_vm3, %v5463_v23, %v5464_v27  ;;  %v6869_v9 = vcombine.low %v5455_v36, %v5458_v32 }
 0x236   : > { %v9531_v10 = vadd.f32 %v9427_v33, %v1978_v58  ;;  %v6854_v33 = vrot.slane %v5384_v34, 9  ;;  %v5470_v29 = vrot.slane %v5468_v26, 4  ;;  %v5471_v48 = vrot.slane %v9190_v49, 5 }
 0x237   : > { %v7242_v25 = vpop.f32.mrf.mxu1  ;;  %v9542_v35 = vpop.f32.mrf.mxu0  ;;  %7478 = vmatmul.mubr.msk.bf16.gmra.mxu0 %vm1779_vm5, %v6834_v12  ;;  %v6870_v13 = vcombine.low %v5462_v20, %v5465_v38  ;;  %v6855_v2 = vrot.slane %v5385_v51, 9  ;;  %v5475_v16 = vrot.slane %v9198_v31, 5  ;;  %v5482_v34 = vrot.slane %v9227_v24, 5  ;;  %v5388_v31 = vld [vmem:[#allocation2 + $0x6c] sm:$0xe] }
 0x238   : > { %v9545_v40 = vadd.f32 %v9433_v37, %v7242_v25  ;;  %v5469_v37 = vsel %vm8388_vm3, %v6854_v33, %v5468_v26  ;;  %v5472_v58 = vsel %vm8388_vm3, %v5470_v29, %v5471_v48  ;;  %v5478_v49 = vrot.slane %v9209_v5, 5  ;;  %v5389_v48 = vld [vmem:[#allocation2 + $0x78] sm:$0xe] }
 0x239   : > { %v9549_v15 = vpop.f32.mrf.mxu1  ;;  %v9551_v6 = vpop.f32.mrf.mxu0  ;;  %v6856_v21 = vrot.slane %v5386_v28, 9  ;;  %v6871_v23 = vcombine.low %v5469_v37, %v5472_v58  ;;  %v5477_v27 = vrot.slane %v5475_v16, 4  ;;  %v5485_v36 = vrot.slane %v9235_v4, 5 }
 0x23a   : > { %v6857_v51 = vrot.slane %v5387_v63, 9  ;;  %v5476_v26 = vsel %vm8388_vm3, %v6855_v2, %v5475_v16  ;;  %v5484_v12 = vrot.slane %v5482_v34, 4  ;;  %v5489_v5 = vrot.slane %v9250_v54, 5 }
 0x23b   : > { %v7281_v32 = vpop.f32.mrf.mxu1  ;;  %v9560_v41 = vpop.f32.mrf.mxu0  ;;  %v5479_v20 = vsel %vm8388_vm3, %v5477_v27, %v5478_v49  ;;  %v5492_v38 = vrot.slane %v9259_v11, 5  ;;  %v5496_v33 = vrot.slane %v9271_v53, 5  ;;  %v5499_v29 = vrot.slane %v9281_v42, 5 }
 0x23c   : > { %v9564_v24 = vadd.f32 %v7281_v32, %v9204_v19  ;;  %7484 = vmatmul.mubr.msk.bf16.vlgmr.msra.gmra.mxu1 %vm1779_vm5, %v6869_v9  ;;  %v9577_v19 = vsel %vm8388_vm3, %v6856_v21, %v5482_v34  ;;  %v9586_v54 = vsel %vm8388_vm3, %v5484_v12, %v5485_v36  ;;  %v6858_v9 = vrot.slane %v5388_v31, 9  ;;  %v5390_v34 = vld [vmem:[#allocation2 + $0x84] sm:$0xe]  ;;  %v5391_v12 = vld [vmem:[#allocation2 + $0x90] sm:$0xe] }
 0x23d   : > { %7487 = vmatprep.mubr.msk.bf16.mxu1 %vm1779_vm5, %v6870_v13  ;;  %v2583_v25 = vpop.f32.mrf.mxu1  ;;  %v9573_v4 = vpop.f32.mrf.mxu0  ;;  %v6872_v13 = vcombine.low %v5476_v26, %v5479_v20  ;;  %v5491_v16 = vrot.slane %v5489_v5, 4  ;;  %v5498_v53 = vrot.slane %v5496_v33, 4  ;;  %v9598_v37 = vsel %vm8388_vm3, %v6857_v51, %v5489_v5 }
 0x23e   : > { %10590 = vst [vmem:[#allocation36_spill] sm:$0xff] %v9573_v4  ;;  %v9582_v28 = vadd.f32 %v2583_v25, %v9225_v60  ;;  %v9602_v42 = vsel %vm8388_vm3, %v6858_v9, %v5496_v33  ;;  %v5503_v58 = vrot.slane %v9290_v62, 5  ;;  %v6859_v27 = vrot.slane %v5389_v48, 9  ;;  %v10591_v48 = vld [vmem:[#allocation13_spill] sm:$0xff]  ;;  %v10602_v4 = vld [vmem:[#allocation7_spill] sm:$0xff] }
 0x23f   : > { %v7282_v63 = vpop.f32.mrf.mxu1  ;;  %v9589_v2 = vpop.f32.mrf.mxu0  ;;  %v5493_v32 = vsel %vm8388_vm3, %v5491_v16, %v5492_v38  ;;  %v5510_v36 = vrot.slane %v9315_v39, 5  ;;  %v6860_v26 = vrot.slane %v5390_v34, 9  ;;  %v5506_v38 = vrot.slane %v9298_v61, 5  ;;  %v5392_v16 = vld [vmem:[#allocation2 + $0x9c] sm:$0xe]  ;;  %v10593_v34 = vld [vmem:[#allocation17_spill] sm:$0xff] }
 0x240   : > { %v9594_v60 = vadd.f32 %v7282_v63, %v9233_v52  ;;  %v9611_v52 = vsel %vm8388_vm3, %v5498_v53, %v5499_v29  ;;  %v6874_v31 = vcombine.low %v9598_v37, %v5493_v32  ;;  %v5505_v20 = vrot.slane %v5503_v58, 4 }
 0x241   : > { %v2586_v49 = vpop.f32.mrf.mxu1  ;;  %v9605_v21 = vpop.f32.mrf.mxu0  ;;  %v5512_v33 = vrot.slane %v5510_v36, 4  ;;  %v5513_v9 = vrot.slane %v9321_v14, 5  ;;  %v9632_v29 = vsel %vm8388_vm3, %v6860_v26, %v5510_v36  ;;  %v5517_v63 = vrot.slane %v10591_v48, 5  ;;  %v10597_v48 = vld [vmem:[#allocation4_spill] sm:$0xff] }
 0x242   : > { %v9615_v51 = vadd.f32 %v2586_v49, %v9511_v8  ;;  %v9628_v8 = vsel %vm8388_vm3, %v6859_v27, %v5503_v58  ;;  %v9640_v14 = vsel %vm8388_vm3, %v5505_v20, %v5506_v38  ;;  %v5524_v37 = vrot.slane %v10593_v34, 5  ;;  %v10594_v58 = vld [vmem:[#allocation5_spill] sm:$0xff]  ;;  %v10595_v27 = vld [vmem:[#allocation14_spill] sm:$0xff]  ;;  %v10598_v34 = vld [vmem:[#allocation3_spill] sm:$0xff] }
 0x243   : > { %v7285_v5 = vpop.f32.mrf.mxu1  ;;  %v9620_v25 = vpop.f32.mrf.mxu0  ;;  %v6876_v32 = vcombine.low %v9628_v8, %v9640_v14  ;;  %v5520_v36 = vrot.slane %v10595_v27, 5  ;;  %v5519_v20 = vrot.slane %v5517_v63, 4  ;;  %v6862_v38 = vrot.slane %v5392_v16, 9  ;;  %v5394_v14 = vld [vmem:[#allocation2 + $0xb4] sm:$0xe] }
 0x244   : > { %v2716_v39 = vadd.f32 %v7285_v5, %v9257_v30  ;;  %7488 = vmatmul.mubr.msk.bf16.gmra.mxu1 %vm1779_vm5, %v6871_v23  ;;  %v9644_v30 = vsel %vm8388_vm3, %v5512_v33, %v5513_v9  ;;  %v6861_v23 = vrot.slane %v5391_v12, 9  ;;  %v5526_v33 = vrot.slane %v5524_v37, 4  ;;  %v10596_v9 = vld [vmem:[#allocation20_spill] sm:$0xff] }
 0x245   : > { %7491 = vmatprep.mubr.msk.bf16.mxu1 %vm1779_vm5, %v6872_v13  ;;  %v2599_v61 = vpop.f32.mrf.mxu1  ;;  %v9636_v53 = vpop.f32.mrf.mxu0  ;;  %v5527_v12 = vrot.slane %v10596_v9, 5  ;;  %v2178_v62 = vadd.f32 %v10598_v34, %v10597_v48  ;;  %v9667_v11 = vsel %vm8388_vm3, %v5519_v20, %v5520_v36  ;;  %v9671_v16 = vsel %vm8388_vm3, %v6862_v38, %v5524_v37  ;;  %v10601_v38 = vld [vmem:[#allocation29_spill] sm:$0xff] }
 0x246   : > { %10592 = vst [vmem:[#allocation13_spill] sm:$0xff] %v9636_v53  ;;  %v2714_v49 = vadd.f32 %v2599_v61, %v10594_v58  ;;  %v10599_v61 = vld [vmem:[#allocation6_spill] sm:$0xff]  ;;  %v9661_v8 = vsel %vm8388_vm3, %v6861_v23, %v5517_v63  ;;  %v5541_v53 = vrot.slane %v10601_v38, 5  ;;  %v10604_v38 = vld [vmem:[#allocation8_spill] sm:$0xff]  ;;  %v9711_v34 = vadd.f32 %v9454_v55, %v9564_v24 }
 0x247   : > { %v7286_v26 = vpop.f32.mrf.mxu1  ;;  %v9653_v5 = vpop.f32.mrf.mxu0  ;;  %v9675_v9 = vsel %vm8388_vm3, %v5526_v33, %v5527_v12  ;;  %v6878_v23 = vcombine.low %v9661_v8, %v9667_v11  ;;  %v10603_v12 = vcombine.low %v9577_v19, %v9586_v54  ;;  %v9730_v55 = vadd.f32 %v9496_v17, %v2716_v39  ;;  %v10607_v39 = vld [vmem:[#allocation12_spill] sm:$0xff]  ;;  %v10621_v11 = vld [vmem:[#allocation27_spill] sm:$0xff] }
 0x248   : > { %v2717_v58 = vadd.f32 %v7286_v26, %v10599_v61  ;;  %v10600_v26 = vld [vmem:[#allocation26_spill] sm:$0xff]  ;;  %v6864_v61 = vrot.slane %v5394_v14, 9 }
 0x249   : > { %v2602_v13 = vpop.f32.mrf.mxu1  ;;  %v9663_v27 = vpop.f32.mrf.mxu0  ;;  %v5538_v48 = vrot.slane %v10600_v26, 5 }
 0x24a   : > { %v9678_v63 = vadd.f32 %v2602_v13, %v2178_v62 }
 0x24b   : > { %v7289_v36 = vpop.f32.mrf.mxu1  ;;  %v9684_v20 = vpop.f32.mrf.mxu0  ;;  %v5540_v37 = vrot.slane %v5538_v48, 4  ;;  %v9697_v26 = vsel %vm8388_vm3, %v6864_v61, %v5538_v48  ;;  %v9715_v48 = vadd.f32 %v9463_v43, %v9582_v28  ;;  %v5938_v61 = vld [vmem:[%s10529_s5] sm:$0x3]  ;;  %v10606_v43 = vld [vmem:[#allocation11_spill] sm:$0xff] }
 0x24c   : > { %v2720_v33 = vadd.f32 %v7289_v36, %v10602_v4  ;;  %7492 = vmatmul.mubr.msk.bf16.gmra.mxu1 %vm1779_vm5, %v10603_v12  ;;  %7593 = vmatprep.subr.msk.bf16.mxu0 %vm1828_vm4, %v5938_v61 }
 0x24d   : > { %7495 = vmatprep.mubr.msk.bf16.mxu1 %vm1779_vm5, %v6874_v31  ;;  %v2615_v62 = vpop.f32.mrf.mxu1  ;;  %v9693_v13 = vpop.f32.mrf.mxu0  ;;  %v9701_v14 = vsel %vm8388_vm3, %v5540_v37, %v5541_v53  ;;  %v10605_v31 = vld [vmem:[#allocation9_spill] sm:$0xff]  ;;  %v9719_v53 = vadd.f32 %v9472_v47, %v9594_v60  ;;  %v6158_v37 = vld [vmem:[%s10531_s7] sm:$0xf]  ;;  %v9737_v47 = vadd.f32 %v9507_v18, %v2714_v49  ;;  %v10608_v18 = vcombine.low %v9602_v42, %v9611_v52 }
 0x24e   : > { %v2718_v4 = vadd.f32 %v2615_v62, %v10604_v38  ;;  %7594 = vmatprep.subr.msk.bf16.mxu1 %vm503_vm0, %v6158_v37 }
 0x24f   : > { %v7290_v54 = vpop.f32.mrf.mxu1  ;;  %v9706_v36 = vpop.f32.mrf.mxu0 }
 0x250   : > { %v2721_v12 = vadd.f32 %v7290_v54, %v10605_v31  ;;  %v9743_v54 = vadd.f32 %v9516_v3, %v2717_v58  ;;  %v9746_v31 = vadd.f32 %v9542_v35, %v2720_v33  ;;  %v9749_v17 = vadd.f32 %v9551_v6, %v2718_v4  ;;  %v10609_v58 = vld [vmem:[#allocation16_spill] sm:$0xff] }
 0x251   : > { %v2618_v62 = vpop.f32.mrf.mxu1  ;;  %v9727_v38 = vpop.f32.mrf.mxu0  ;;  %v6167_v6 = vsel %vm503_vm0, %v6158_v37, 0  ;;  %v10612_v37 = vld [vmem:[#allocation19_spill] sm:$0xff]  ;;  %vm6394_vm0 = vcmask 130048  }
 0x252   : > { %v9734_v24 = vadd.f32 %v2618_v62, %v10606_v43  ;;  %v9757_v49 = vadd.f32 %v9560_v41, %v2721_v12  ;;  %v5995_v43 = vsel %vm1828_vm4, %v5938_v61, 0  ;;  %7550 = vmatpush3.bf16.msra.mxu1 %v6167_v6  ;;  %v10610_v41 = vld [vmem:[#allocation18_spill] sm:$0xff]  ;;  %v10611_v61 = vld [vmem:[#allocation21_spill] sm:$0xff] }
 0x253   : > { %v7293_v28 = vpop.f32.mrf.mxu1  ;;  %v9740_v60 = vpop.f32.mrf.mxu0  ;;  %7516 = vmatpush3.bf16.msra.mxu0 %v5995_v43  ;;  %v10615_v6 = vld [vmem:[#allocation22_spill] sm:$0xff] }
 0x254   : > { %v2724_v62 = vadd.f32 %v7293_v28, %v10607_v39  ;;  %7496 = vmatmul.mubr.msk.bf16.gmra.mxu1 %vm1779_vm5, %v10608_v18  ;;  %v5531_v28 = vrot.slane %v10611_v61, 5 }
 0x255   : > { %7499 = vmatprep.mubr.msk.bf16.mxu1 %vm1779_vm5, %v6876_v32  ;;  %v2631_v3 = vpop.f32.mrf.mxu1  ;;  %v9761_v35 = vpop.f32.mrf.mxu0 }
 0x256   : > { %v2722_v33 = vadd.f32 %v2631_v3, %v10609_v58  ;;  %v9766_v4 = vadd.f32 %v9589_v2, %v2724_v62 }
 0x257   : > { %v7294_v42 = vpop.f32.mrf.mxu1  ;;  %v9768_v52 = vpop.f32.mrf.mxu0 }
 0x258   : > { %v2725_v12 = vadd.f32 %v7294_v42, %v10610_v41  ;;  %v9773_v32 = vadd.f32 %v9605_v21, %v2722_v33  ;;  %v10616_v42 = vcombine.low %v9632_v29, %v9644_v30  ;;  %v5393_v21 = vld [vmem:[#allocation2 + $0xa8] sm:$0xe]  ;;  %v5533_v33 = vrot.slane %v5531_v28, 4  ;;  %v10619_v29 = vld [vmem:[#allocation28_spill] sm:$0xff]  ;;  %v10620_v30 = vld [vmem:[#allocation10_spill] sm:$0xff] }
 0x259   : > { %v2634_v39 = vpop.f32.mrf.mxu1  ;;  %v9775_v18 = vpop.f32.mrf.mxu0  ;;  %v6863_v19 = vrot.slane %v5393_v21, 9 }
 0x25a   : > { %v9778_v43 = vadd.f32 %v2634_v39, %v10612_v37  ;;  %v9781_v2 = vadd.f32 %v9620_v25, %v2725_v12  ;;  %v10617_v12 = vld [vmem:[#allocation25_spill] sm:$0xff]  ;;  %v10618_v39 = vld [vmem:[#allocation23_spill] sm:$0xff] }
 0x25b   : > { %v7297_v62 = vpop.f32.mrf.mxu1  ;;  %v9783_v3 = vpop.f32.mrf.mxu0  ;;  %v5534_v37 = vrot.slane %v10618_v39, 5  ;;  %v5532_v39 = vsel %vm8388_vm3, %v6863_v19, %v5531_v28 }
 0x25c   : > { %10613 = vst [vmem:[#allocation17_spill] sm:$0xff] %v9778_v43  ;;  %10614 = vst [vmem:[#allocation5_spill] sm:$0xff] %v9781_v2  ;;  %v2728_v58 = vadd.f32 %v7297_v62, %v10615_v6  ;;  %7500 = vmatmul.mubr.msk.bf16.gmra.mxu1 %vm1779_vm5, %v10616_v42  ;;  %v2226_v6 = vadd.f32 %v10620_v30, %v10619_v29  ;;  %v5545_v2 = vrot.slane %v9431_v22, 5 }
 0x25d   : > { %7503 = vmatprep.mubr.msk.bf16.mxu1 %vm1779_vm5, %v6878_v23  ;;  %v2647_v41 = vpop.f32.mrf.mxu1  ;;  %v9794_v25 = vpop.f32.mrf.mxu0  ;;  %v5535_v23 = vsel %vm8388_vm3, %v5533_v33, %v5534_v37  ;;  %v10622_v33 = vld [vmem:[#allocation30_spill] sm:$0xff]  ;;  %v10623_v22 = vcombine.low %v9671_v16, %v9675_v9  ;;  %v10624_v9 = vld [vmem:[#allocation15_spill] sm:$0xff] }
 0x25e   : > { %v2726_v61 = vadd.f32 %v2647_v41, %v10617_v12  ;;  %v9799_v62 = vadd.f32 %v9653_v5, %v2728_v58  ;;  %v6880_v30 = vcombine.low %v5532_v39, %v5535_v23  ;;  %v5396_v23 = vld [vmem:[#allocation2 + $0xcc] sm:$0xe] }
 0x25f   : > { %v7298_v42 = vpop.f32.mrf.mxu1  ;;  %v9803_v43 = vpop.f32.mrf.mxu0 }
 0x260   : > { %v2729_v8 = vadd.f32 %v7298_v42, %v10621_v11  ;;  %v9810_v41 = vadd.f32 %v9663_v27, %v2726_v61  ;;  %v5547_v27 = vrot.slane %v5545_v2, 4 }
 0x261   : > { %v2650_v12 = vpop.f32.mrf.mxu1  ;;  %v9812_v5 = vpop.f32.mrf.mxu0 }
 0x262   : > { %v2727_v58 = vadd.f32 %v2650_v12, %v2226_v6  ;;  %v9817_v21 = vadd.f32 %v9684_v20, %v2729_v8  ;;  %v5395_v20 = vld [vmem:[#allocation2 + $0xc0] sm:$0xe]  ;;  %v5552_v6 = vrot.slane %v9470_v56, 5  ;;  %v5548_v8 = vrot.slane %v9442_v50, 5 }
 0x263   : > { %v7301_v29 = vpop.f32.mrf.mxu1  ;;  %v9819_v42 = vpop.f32.mrf.mxu0 }
 0x264   : > { %v2732_v37 = vadd.f32 %v7301_v29, %v10622_v33  ;;  %7504 = vmatmul.mubr.msk.bf16.gmra.mxu1 %vm1779_vm5, %v10623_v22  ;;  %v9827_v61 = vadd.f32 %v9693_v13, %v2727_v58  ;;  %v2242_v13 = vadd.f32 %v10624_v9, %v9452_v7  ;;  %v6865_v29 = vrot.slane %v5395_v20, 9 }
 0x265   : > { %7507 = vmatprep.mubr.msk.bf16.mxu1 %vm1779_vm5, %v6880_v30  ;;  %v2663_v19 = vpop.f32.mrf.mxu1  ;;  %v9830_v28 = vpop.f32.mrf.mxu0  ;;  %v5549_v56 = vsel %vm8388_vm3, %v5547_v27, %v5548_v8  ;;  %v6866_v30 = vrot.slane %v5396_v23, 9  ;;  %v5554_v33 = vrot.slane %v5552_v6, 4  ;;  %v10626_v8 = vcombine.low %v9697_v26, %v9701_v14 }
 0x266   : > { %v2730_v11 = vadd.f32 %v2663_v19, %v9458_v57  ;;  %v9836_v16 = vadd.f32 %v9706_v36, %v2732_v37  ;;  %v5555_v36 = vrot.slane %v9481_v44, 5  ;;  %v5546_v22 = vsel %vm8388_vm3, %v6865_v29, %v5545_v2 }
 0x267   : > { %v7302_v12 = vpop.f32.mrf.mxu1  ;;  %v9840_v58 = vpop.f32.mrf.mxu0  ;;  %v6882_v20 = vcombine.low %v5546_v22, %v5549_v56  ;;  %v10629_v56 = vld [vmem:[#allocation35_spill] sm:$0xff] }
 0x268   : > { %v2733_v39 = vadd.f32 %v7302_v12, %v9461_v59  ;;  %v9846_v57 = vadd.f32 %v9727_v38, %v2730_v11  ;;  %v10625_v38 = vld [vmem:[#allocation32_spill] sm:$0xff]  ;;  %v5556_v23 = vsel %vm8388_vm3, %v5554_v33, %v5555_v36 }
 0x269   : > { %v2666_v50 = vpop.f32.mrf.mxu1  ;;  %v9849_v37 = vpop.f32.mrf.mxu0 }
 0x26a   : > { %v2731_v7 = vadd.f32 %v2666_v50, %v2242_v13  ;;  %v9854_v59 = vadd.f32 %v9740_v60, %v2733_v39  ;;  %v5553_v60 = vsel %vm8388_vm3, %v6866_v30, %v5552_v6  ;;  %v10627_v13 = vld [vmem:[#allocation34_spill] sm:$0xff] }
 0x26b   : > { %v9856_v27 = vpop.f32.mrf.mxu0 }
 0x26c   : > { %v7305_v19 = vpop.f32.mrf.mxu1  ;;  %7508 = vmatmul.mubr.msk.bf16.gmra.mxu1 %vm1779_vm5, %v10626_v8  ;;  %v9864_v44 = vadd.f32 %v9761_v35, %v2731_v7  ;;  %v10628_v35 = vld [vmem:[#allocation24_spill] sm:$0xff]  ;;  %v6883_v7 = vcombine.low %v5553_v60, %v5556_v23 }
 0x26d   : > { %v2736_v11 = vadd.f32 %v7305_v19, %v10625_v38  ;;  %7511 = vmatprep.mubr.msk.bf16.mxu1 %vm1779_vm5, %v6882_v20  ;;  %v9871_v9 = vpop.f32.mrf.mxu0  ;;  %v2258_v29 = vadd.f32 %v10628_v35, %v9502_v0 }
 0x26e   : > { %v2679_v2 = vpop.f32.mrf.mxu1 }
 0x26f   : > { %v2734_v12 = vadd.f32 %v2679_v2, %v10627_v13  ;;  %v9875_v26 = vadd.f32 %v9768_v52, %v2736_v11  ;;  %v7387_v39 = vpop.f32.mrf.mxu0 }
 0x270   : > { %v7306_v14 = vpop.f32.mrf.mxu1 }
 0x271   : > { %v2737_v50 = vadd.f32 %v7306_v14, %v10629_v56  ;;  %v9881_v6 = vadd.f32 %v9775_v18, %v2734_v12  ;;  %v4153_v30 = vpop.f32.mrf.mxu0  ;;  %v7676_v18 = vld [vmem:[%s7770_s16] sm:$0xff]  }
 0x272   : > { %v2682_v46 = vpop.f32.mrf.mxu1 }
 0x273   : > { %v2735_v33 = vadd.f32 %v2682_v46, %v2258_v29  ;;  %v9884_v36 = vadd.f32 %v9783_v3, %v2737_v50  ;;  %v9886_v22 = vpop.f32.mrf.mxu0  ;;  %v7678_v50 = vld [vmem:[%s7770_s16 + $0x10] sm:$0xff]  }
 0x274   : > { %v7309_v52 = vpop.f32.mrf.mxu1  ;;  %7512 = vmatmul.mubr.msk.bf16.gmra.mxu1 %vm1779_vm5, %v6883_v7 }
 0x275   : > { %v2740_v19 = vadd.f32 %v7309_v52, %v9519_v45  ;;  %v9891_v0 = vadd.f32 %v9794_v25, %v2735_v33  ;;  %v9893_v38 = vpop.f32.mrf.mxu0  ;;  %7551 = vmatprep.mubr.msk.bf16.mxu1 %vm454_vm1, %v7676_v18  ;;  %v10630_v45 = vld [vmem:[#allocation31_spill] sm:$0xff]  ;;  %v10631_v33 = vld [vmem:[#allocation33_spill] sm:$0xff] }
 0x276   : > { %v2695_v20 = vpop.f32.mrf.mxu1  ;;  %v2274_v60 = vadd.f32 %v10630_v45, %v9549_v15  ;;  %v7677_v15 = vld [vmem:[%s7770_s16 + $0x8] sm:$0xff]   ;;  %v3069_v52 = vadd.f32 %v10631_v33, %v9615_v51  ;;  %v7679_v45 = vld [vmem:[%s7770_s16 + $0x18] sm:$0xff]   ;;  %v7680_v51 = vld [vmem:[%s7770_s16 + $0x20] sm:$0xff]  }
 0x277   : > { %v2738_v3 = vadd.f32 %v2695_v20, %v9531_v10  ;;  %v9899_v11 = vadd.f32 %v9803_v43, %v2740_v19  ;;  %v7391_v2 = vpop.f32.mrf.mxu0 }
 0x278   : > { %v7310_v8 = vpop.f32.mrf.mxu1 }
 0x279   : > { %v2741_v25 = vadd.f32 %v7310_v8, %v9545_v40  ;;  %v9905_v23 = vadd.f32 %v9812_v5, %v2738_v3  ;;  %v4169_v12 = vpop.f32.mrf.mxu0 }
 0x27a   : > { %v2698_v13 = vpop.f32.mrf.mxu1 }
 0x27b   : > { %v2739_v14 = vadd.f32 %v2698_v13, %v2274_v60  ;;  %v9908_v35 = vadd.f32 %v9819_v42, %v2741_v25  ;;  %v9910_v43 = vpop.f32.mrf.mxu0 }
 0x27c   : > { %v7349_v10 = vpop.f32.mrf.mxu1  ;;  %7552 = vmatmul.mubr.msk.bf16.vlgmr.msra.gmra.mxu1 %vm454_vm1, %v7677_v15 }
 0x27d   : > { %v3796_v29 = vadd.f32 %v7349_v10, %v9711_v34  ;;  %v9914_v56 = vadd.f32 %v9830_v28, %v2739_v14  ;;  %v9918_v5 = vpop.f32.mrf.mxu0  ;;  %7555 = vmatprep.mubr.msk.bf16.mxu1 %vm454_vm1, %v7678_v50 }
 0x27e   : > { %v3667_v40 = vpop.f32.mrf.mxu1 }
 0x27f   : > { %v3794_v42 = vadd.f32 %v3667_v40, %v9715_v48  ;;  %v9924_v7 = vadd.f32 %v9840_v58, %v3796_v29  ;;  %v7395_v46 = vpop.f32.mrf.mxu0 }
 0x280   : > { %v7350_v34 = vpop.f32.mrf.mxu1 }
 0x281   : > { %v9927_v28 = vadd.f32 %v7350_v34, %v9719_v53  ;;  %v9932_v19 = vadd.f32 %v9849_v37, %v3794_v42  ;;  %v4185_v18 = vpop.f32.mrf.mxu0 }
 0x282   : > { %v3670_v20 = vpop.f32.mrf.mxu1 }
 0x283   : > { %v9934_v3 = vadd.f32 %v3670_v20, %v3069_v52  ;;  %v9936_v8 = vpop.f32.mrf.mxu0  ;;  %v7682_v52 = vld [vmem:[%s7770_s16 + $0x30] sm:$0xff]  }
 0x284   : > { %v7353_v48 = vpop.f32.mrf.mxu1  ;;  %7556 = vmatmul.mubr.msk.bf16.gmra.mxu1 %vm454_vm1, %v7679_v45 }
 0x285   : > { %v3800_v58 = vadd.f32 %v7353_v48, %v9730_v55  ;;  %v9941_v60 = vpop.f32.mrf.mxu0  ;;  %7559 = vmatprep.mubr.msk.bf16.mxu1 %vm454_vm1, %v7680_v51  ;;  %v3073_v55 = vadd.f32 %v9528_v1, %v9678_v63 }
 0x286   : > { %v3683_v53 = vpop.f32.mrf.mxu1 }
 0x287   : > { %v3798_v37 = vadd.f32 %v3683_v53, %v9737_v47  ;;  %v9946_v25 = vadd.f32 %v7387_v39, %v3800_v58  ;;  %v7399_v14 = vpop.f32.mrf.mxu0  ;;  %v7681_v39 = vld [vmem:[%s7770_s16 + $0x28] sm:$0xff]  }
 0x288   : > { %v7354_v13 = vpop.f32.mrf.mxu1 }
 0x289   : > { %v9949_v10 = vadd.f32 %v7354_v13, %v9743_v54  ;;  %v9953_v29 = vadd.f32 %v4153_v30, %v3798_v37  ;;  %v4201_v40 = vpop.f32.mrf.mxu0 }
 0x28a   : > { %v3686_v15 = vpop.f32.mrf.mxu1 }
 0x28b   : > { %v9955_v50 = vadd.f32 %v3686_v15, %v3073_v55  ;;  %v9957_v34 = vpop.f32.mrf.mxu0  ;;  %v7684_v15 = vld [vmem:[%s7770_s16 + $0x40] sm:$0xff]  }
 0x28c   : > { %v7357_v42 = vpop.f32.mrf.mxu1  ;;  %7560 = vmatmul.mubr.msk.bf16.gmra.mxu1 %vm454_vm1, %v7681_v39 }
 0x28d   : > { %v3804_v47 = vadd.f32 %v7357_v42, %v9746_v31  ;;  %v9962_v54 = vpop.f32.mrf.mxu0  ;;  %7563 = vmatprep.mubr.msk.bf16.mxu1 %vm454_vm1, %v7682_v52  ;;  %v10633_v31 = vld [vmem:[#allocation36_spill] sm:$0xff] }
 0x28e   : > { %v3699_v33 = vpop.f32.mrf.mxu1  ;;  %10632 = vst [vmem:[#allocation14_spill] sm:$0xff] %v9962_v54  ;;  %v3077_v58 = vadd.f32 %v10633_v31, %v9734_v24 }
 0x28f   : > { %v3802_v1 = vadd.f32 %v3699_v33, %v9749_v17  ;;  %v9967_v63 = vadd.f32 %v7391_v2, %v3804_v47  ;;  %v7403_v20 = vpop.f32.mrf.mxu0  ;;  %v7683_v2 = vld [vmem:[%s7770_s16 + $0x38] sm:$0xff]   ;;  %v10635_v47 = vld [vmem:[#allocation5_spill] sm:$0xff] }
 0x290   : > { %v7358_v30 = vpop.f32.mrf.mxu1  ;;  %v10637_v33 = vld [vmem:[#allocation13_spill] sm:$0xff] }
 0x291   : > { %v9970_v48 = vadd.f32 %v7358_v30, %v9757_v49  ;;  %v9974_v45 = vadd.f32 %v4169_v12, %v3802_v1  ;;  %v4217_v51 = vpop.f32.mrf.mxu0 }
 0x292   : > { %v3702_v53 = vpop.f32.mrf.mxu1 }
 0x293   : > { %v9976_v37 = vadd.f32 %v3702_v53, %v3077_v58  ;;  %v9979_v55 = vpop.f32.mrf.mxu0 }
 0x294   : > { %v7361_v13 = vpop.f32.mrf.mxu1  ;;  %10634 = vst [vmem:[#allocation20_spill] sm:$0xff] %v9979_v55  ;;  %7564 = vmatmul.mubr.msk.bf16.gmra.mxu1 %vm454_vm1, %v7683_v2  ;;  %v7686_v2 = vld [vmem:[%s7770_s16 + $0x50] sm:$0xff]  }
 0x295   : > { %v3808_v17 = vadd.f32 %v7361_v13, %v9766_v4  ;;  %7567 = vmatprep.mubr.msk.bf16.mxu1 %vm454_vm1, %v7684_v15  ;;  %v10636_v4 = vld [vmem:[#allocation17_spill] sm:$0xff]  ;;  %v9993_v1 = vpop.f32.mrf.mxu0 }
 0x296   : > { %v3715_v49 = vpop.f32.mrf.mxu1  ;;  %v3081_v52 = vadd.f32 %v10637_v33, %v10636_v4  ;;  %10638 = vst [vmem:[#allocation4_spill] sm:$0xff] %v9993_v1 }
 0x297   : > { %v3806_v24 = vadd.f32 %v3715_v49, %v9773_v32  ;;  %v9986_v12 = vadd.f32 %v7395_v46, %v3808_v17  ;;  %v7407_v32 = vpop.f32.mrf.mxu0  ;;  %v7685_v46 = vld [vmem:[%s7770_s16 + $0x48] sm:$0xff]  }
 0x298   : > { %v7362_v42 = vpop.f32.mrf.mxu1 }
 0x299   : > { %v9989_v39 = vadd.f32 %v7362_v42, %v10635_v47  ;;  %v9995_v30 = vadd.f32 %v4185_v18, %v3806_v24  ;;  %v4233_v42 = vpop.f32.mrf.mxu0 }
 0x29a   : > { %v3718_v31 = vpop.f32.mrf.mxu1 }
 0x29b   : > { %v9997_v58 = vadd.f32 %v3718_v31, %v3081_v52  ;;  %v10016_v31 = vpop.f32.mrf.mxu0 }
 0x29c   : > { %v7365_v53 = vpop.f32.mrf.mxu1  ;;  %7568 = vmatmul.mubr.msk.bf16.gmra.mxu1 %vm454_vm1, %v7685_v46  ;;  %10639 = vst [vmem:[#allocation3_spill] sm:$0xff] %v10016_v31 }
 0x29d   : > { %v3812_v13 = vadd.f32 %v7365_v53, %v9799_v62  ;;  %7571 = vmatprep.mubr.msk.bf16.mxu1 %vm454_vm1, %v7686_v2  ;;  %v7687_v53 = vld [vmem:[%s7770_s16 + $0x58] sm:$0xff]  }
 0x29e   : > { %v3731_v17 = vpop.f32.mrf.mxu1 }
 0x29f   : > { %v3810_v49 = vadd.f32 %v3731_v17, %v9810_v41  ;;  %v10005_v18 = vadd.f32 %v7399_v14, %v3812_v13  ;;  %v7688_v14 = vld [vmem:[%s7770_s16 + $0x60] sm:$0xff]  }
 0x2a0   : > { %v7366_v15 = vpop.f32.mrf.mxu1 }
 0x2a1   : > { %v10008_v24 = vadd.f32 %v7366_v15, %v9817_v21  ;;  %v10010_v62 = vadd.f32 %v4201_v40, %v3810_v49 }
 0x2a2   : > { %v3734_v47 = vpop.f32.mrf.mxu1 }
 0x2a3   : > { %v10013_v4 = vadd.f32 %v3734_v47, %v9827_v61 }
 0x2a4   : > { %v7369_v33 = vpop.f32.mrf.mxu1  ;;  %7572 = vmatmul.mubr.msk.bf16.gmra.mxu1 %vm454_vm1, %v7687_v53 }
 0x2a5   : > { %v3816_v52 = vadd.f32 %v7369_v33, %v9836_v16  ;;  %7575 = vmatprep.mubr.msk.bf16.mxu1 %vm454_vm1, %v7688_v14  ;;  %v10028_v16 = vpop.f32.mrf.mxu0  ;;  %v7690_v33 = vld [vmem:[%s7770_s16 + $0x70] sm:$0xff]  }
 0x2a6   : > { %v3747_v41 = vpop.f32.mrf.mxu1  ;;  %10641 = vst [vmem:[#allocation26_spill] sm:$0xff] %v10028_v16 }
 0x2a7   : > { %v3814_v21 = vadd.f32 %v3747_v41, %v9846_v57  ;;  %v10023_v40 = vadd.f32 %v7403_v20, %v3816_v52  ;;  %v7411_v15 = vpop.f32.mrf.mxu0  ;;  %v7689_v57 = vld [vmem:[%s7770_s16 + $0x68] sm:$0xff]  }
 0x2a8   : > { %v7370_v61 = vpop.f32.mrf.mxu1 }
 0x2a9   : > { %v10026_v13 = vadd.f32 %v7370_v61, %v9854_v59  ;;  %v10030_v46 = vadd.f32 %v4217_v51, %v3814_v21  ;;  %v4249_v53 = vpop.f32.mrf.mxu0 }
 0x2aa   : > { %v3750_v17 = vpop.f32.mrf.mxu1 }
 0x2ab   : > { %10640 = vst [vmem:[#allocation6_spill] sm:$0xff] %v10026_v13  ;;  %v10033_v2 = vadd.f32 %v3750_v17, %v9864_v44  ;;  %v10051_v21 = vpop.f32.mrf.mxu0  ;;  %v7691_v17 = vld [vmem:[%s7770_s16 + $0x78] sm:$0xff]  }
 0x2ac   : > { %v7373_v49 = vpop.f32.mrf.mxu1  ;;  %7576 = vmatmul.mubr.msk.bf16.gmra.mxu1 %vm454_vm1, %v7689_v57  ;;  %10645 = vst [vmem:[#allocation9_spill] sm:$0xff] %v10051_v21 }
 0x2ad   : > { %10642 = vst [vmem:[#allocation29_spill] sm:$0xff] %v10033_v2  ;;  %v3820_v47 = vadd.f32 %v7373_v49, %v9875_v26  ;;  %7579 = vmatprep.mubr.msk.bf16.mxu1 %vm454_vm1, %v7690_v33 }
 0x2ae   : > { %v3763_v20 = vpop.f32.mrf.mxu1 }
 0x2af   : > { %v3818_v59 = vadd.f32 %v3763_v20, %v9881_v6  ;;  %v10041_v51 = vadd.f32 %v7407_v32, %v3820_v47 }
 0x2b0   : > { %v7374_v52 = vpop.f32.mrf.mxu1 }
 0x2b1   : > { %v10044_v44 = vadd.f32 %v7374_v52, %v9884_v36  ;;  %v10046_v41 = vadd.f32 %v4233_v42, %v3818_v59  ;;  %v10059_v36 = vpop.f32.mrf.mxu0 }
 0x2b2   : > { %v3766_v26 = vpop.f32.mrf.mxu1  ;;  %10646 = vst [vmem:[#allocation11_spill] sm:$0xff] %v10059_v36 }
 0x2b3   : > { %10643 = vst [vmem:[#allocation7_spill] sm:$0xff] %v10044_v44  ;;  %v10049_v14 = vadd.f32 %v3766_v26, %v9891_v0  ;;  %v10069_v59 = vpop.f32.mrf.mxu0 }
 0x2b4   : > { %v7377_v61 = vpop.f32.mrf.mxu1  ;;  %7580 = vmatmul.mubr.msk.bf16.gmra.mxu1 %vm454_vm1, %v7691_v17 }
 0x2b5   : > { %10644 = vst [vmem:[#allocation8_spill] sm:$0xff] %v10049_v14  ;;  %v3824_v6 = vadd.f32 %v7377_v61, %v9899_v11  ;;  %v10077_v26 = vpop.f32.mrf.mxu0 }
 0x2b6   : > { %v3779_v32 = vpop.f32.mrf.mxu1 }
 0x2b7   : > { %v3822_v49 = vadd.f32 %v3779_v32, %v9905_v23  ;;  %v10057_v47 = vadd.f32 %v7411_v15, %v3824_v6 }
 0x2b8   : > { %v7378_v42 = vpop.f32.mrf.mxu1 }
 0x2b9   : > { %v10062_v57 = vadd.f32 %v7378_v42, %v9908_v35  ;;  %v10064_v0 = vadd.f32 %v4249_v53, %v3822_v49  ;;  %v10081_v53 = vpop.f32.mrf.mxu0 }
 0x2ba   : > { %v3782_v20 = vpop.f32.mrf.mxu1 }
 0x2bb   : > { %10647 = vst [vmem:[#allocation12_spill] sm:$0xff] %v10062_v57  ;;  %v10067_v33 = vadd.f32 %v3782_v20, %v9914_v56 }
 0x2bc   : > { %v7417_v11 = vpop.f32.mrf.mxu1 }
 0x2bd   : > { %10648 = vst [vmem:[#allocation16_spill] sm:$0xff] %v10067_v33  ;;  %v10072_v52 = vadd.f32 %v7417_v11, %v9924_v7  ;;  %v10089_v7 = vpop.f32.mrf.mxu0 }
 0x2be   : > { %v4496_v23 = vpop.f32.mrf.mxu1 }
 0x2bf   : > { %v10075_v15 = vadd.f32 %v4496_v23, %v9932_v19  ;;  %v10095_v42 = vpop.f32.mrf.mxu0 }
 0x2c0   : > { %v7418_v35 = vpop.f32.mrf.mxu1 }
 0x2c2   : > { %v10079_v61 = vpop.f32.mrf.mxu1 }
 0x2c4   : > { %v7421_v17 = vpop.f32.mrf.mxu1 }
 0x2c5   : > { %v10084_v56 = vadd.f32 %v7421_v17, %v9946_v25  ;;  %v10103_v17 = vpop.f32.mrf.mxu0 }
 0x2c6   : > { %v4512_v6 = vpop.f32.mrf.mxu1 }
 0x2c7   : > { %v10087_v32 = vadd.f32 %v4512_v6, %v9953_v29  ;;  %v10109_v36 = vpop.f32.mrf.mxu0 }
 0x2c8   : > { %v10091_v49 = vpop.f32.mrf.mxu1 }
 0x2ca   : > { %v10093_v19 = vpop.f32.mrf.mxu1 }
 0x2cc   : > { %v7425_v20 = vpop.f32.mrf.mxu1 }
 0x2cd   : > { %v10098_v11 = vadd.f32 %v7425_v20, %v9967_v63  ;;  %v10117_v20 = vpop.f32.mrf.mxu0 }
 0x2ce   : > { %v4528_v23 = vpop.f32.mrf.mxu1 }
 0x2cf   : > { %v10101_v25 = vadd.f32 %v4528_v23, %v9974_v45  ;;  %v10123_v16 = vpop.f32.mrf.mxu0 }
 0x2d0   : > { %v10105_v29 = vpop.f32.mrf.mxu1 }
 0x2d2   : > { %v10107_v6 = vpop.f32.mrf.mxu1 }
 0x2d4   : > { %v7429_v33 = vpop.f32.mrf.mxu1 }
 0x2d5   : > { %v10112_v21 = vadd.f32 %v7429_v33, %v9986_v12  ;;  %v10131_v33 = vpop.f32.mrf.mxu0 }
 0x2d6   : > { %v4544_v57 = vpop.f32.mrf.mxu1 }
 0x2d7   : > { %v10115_v63 = vadd.f32 %v4544_v57, %v9995_v30  ;;  %v10137_v1 = vpop.f32.mrf.mxu0 }
 0x2d8   : > { %v10119_v45 = vpop.f32.mrf.mxu1 }
 0x2da   : > { %v10121_v23 = vpop.f32.mrf.mxu1 }
 0x2dc   : > { %v7433_v14 = vpop.f32.mrf.mxu1 }
 0x2dd   : > { %v10126_v31 = vadd.f32 %v7433_v14, %v10005_v18  ;;  %v10145_v14 = vpop.f32.mrf.mxu0 }
 0x2de   : > { %v4560_v44 = vpop.f32.mrf.mxu1 }
 0x2df   : > { %10649 = vst [vmem:[#allocation18_spill] sm:$0xff] %v10126_v31  ;;  %v10129_v12 = vadd.f32 %v4560_v44, %v10010_v62 }
 0x2e0   : > { %v10133_v30 = vpop.f32.mrf.mxu1 }
 0x2e1   : > { %10650 = vst [vmem:[#allocation21_spill] sm:$0xff] %v10129_v12  ;;  %v10151_v12 = vpop.f32.mrf.mxu0 }
 0x2e2   : > { %v10135_v57 = vpop.f32.mrf.mxu1 }
 0x2e3   : > { %10651 = vst [vmem:[#allocation19_spill] sm:$0xff] %v10135_v57 }
 0x2e4   : > { %v7437_v2 = vpop.f32.mrf.mxu1 }
 0x2e5   : > { %v10140_v55 = vadd.f32 %v7437_v2, %v10023_v40  ;;  %v10159_v2 = vpop.f32.mrf.mxu0 }
 0x2e6   : > { %v4576_v13 = vpop.f32.mrf.mxu1 }
 0x2e7   : > { %10652 = vst [vmem:[#allocation22_spill] sm:$0xff] %v10140_v55  ;;  %v10143_v18 = vadd.f32 %v4576_v13, %v10030_v46 }
 0x2e8   : > { %v10147_v62 = vpop.f32.mrf.mxu1 }
 0x2e9   : > { %10653 = vst [vmem:[#allocation25_spill] sm:$0xff] %v10143_v18  ;;  %10654 = vst [vmem:[#allocation23_spill] sm:$0xff] %v10147_v62  ;;  %v10165_v18 = vpop.f32.mrf.mxu0 }
 0x2ea   : > { %v10149_v44 = vpop.f32.mrf.mxu1 }
 0x2eb   : > { %10655 = vst [vmem:[#allocation28_spill] sm:$0xff] %v10149_v44 }
 0x2ec   : > { %v7441_v31 = vpop.f32.mrf.mxu1 }
 0x2ed   : > { %v10154_v57 = vadd.f32 %v7441_v31, %v10041_v51  ;;  %v10173_v51 = vpop.f32.mrf.mxu0 }
 0x2ee   : > { %v4592_v54 = vpop.f32.mrf.mxu1 }
 0x2ef   : > { %10656 = vst [vmem:[#allocation10_spill] sm:$0xff] %v10154_v57  ;;  %v10157_v40 = vadd.f32 %v4592_v54, %v10046_v41  ;;  %v4267_v41 = vadd.f32 %v9856_v27, %v9927_v28  ;;  %v4265_v57 = vadd.f32 %v9871_v9, %v9934_v3  ;;  %v10193_v27 = vld [vmem:[%s10528_s4] ss:$0 sm:$0xff]  ;;  %v4271_v3 = vadd.f32 %v9886_v22, %v9949_v10 }
 0x2f0   : > { %v10161_v13 = vpop.f32.mrf.mxu1  ;;  %v5355_v22 = vadd.f32 %v10095_v42, %v10084_v56 }
 0x2f1   : > { %10657 = vst [vmem:[#allocation27_spill] sm:$0xff] %v10157_v40 }
 0x2f2   : > { %v10163_v46 = vpop.f32.mrf.mxu1 }
 0x2f3   : > { %10658 = vst [vmem:[#allocation30_spill] sm:$0xff] %v10163_v46  ;;  %v4626_v46 = vadd.f32 %v7418_v35, %v4267_v41  ;;  %v4269_v41 = vadd.f32 %v9893_v38, %v9955_v50 }
 0x2f4   : > { %v7445_v55 = vpop.f32.mrf.mxu1 }
 0x2f5   : > { %v10168_v44 = vadd.f32 %v7445_v55, %v10057_v47  ;;  %v5351_v55 = vadd.f32 %v10069_v59, %v10072_v52  ;;  %v10185_v47 = vpop.f32.mrf.mxu0  ;;  %v5352_v9 = vadd.f32 %v10081_v53, %v4626_v46  ;;  %v4628_v10 = vadd.f32 %v10093_v19, %v4269_v41 }
 0x2f6   : > { %v4608_v62 = vpop.f32.mrf.mxu1  ;;  %v4275_v19 = vadd.f32 %v9910_v43, %v9970_v48  ;;  %v5359_v48 = vadd.f32 %v10123_v16, %v10098_v11 }
 0x2f7   : > { %10659 = vst [vmem:[#allocation15_spill] sm:$0xff] %v10168_v44  ;;  %v10171_v31 = vadd.f32 %v4608_v62, %v10064_v0  ;;  %v4624_v62 = vadd.f32 %v10079_v61, %v4265_v57  ;;  %v5349_v44 = vadd.f32 %v10077_v26, %v10075_v15  ;;  %v10198_v59 = vpop.f32.mrf.mxu0  ;;  %v4630_v26 = vadd.f32 %v10091_v49, %v4271_v3 }
 0x2f8   : > { %v10175_v54 = vpop.f32.mrf.mxu1  ;;  %v4634_v41 = vadd.f32 %v10105_v29, %v4275_v19 }
 0x2f9   : > { %10660 = vst [vmem:[#allocation32_spill] sm:$0xff] %v10171_v31  ;;  %v5350_v15 = vadd.f32 %v10089_v7, %v4624_v62  ;;  %v5353_v7 = vadd.f32 %v10103_v17, %v10087_v32 }
 0x2fa   : > { %v10179_v40 = vpop.f32.mrf.mxu1 }
 0x2fc   : > { %v7485_v0 = vpop.f32.mrf.mxu1 }
 0x2fd   : > { %v5821_v31 = vadd.f32 %v7485_v0, %v5351_v55 }
 0x2fe   : > { %v5692_v28 = vpop.f32.mrf.mxu1 }
 0x2ff   : > { %v5819_v35 = vadd.f32 %v5692_v28, %v5349_v44  ;;  %v5860_v61 = vadd.f32 %v10193_v27, %v5821_v31  ;;  %v10210_v31 = vpop.f32.mrf.mxu0 }
 0x300   : > { %v7486_v52 = vpop.f32.mrf.mxu1 }
 0x301   : > { %v5822_v57 = vadd.f32 %v7486_v52, %v5352_v9  ;;  %v5858_v44 = vadd.f32 %v10193_v27, %v5819_v35  ;;  %v5892_v49 = vmax.f32 %v5860_v61, 0.0  ;;  %v5356_v35 = vadd.f32 %v10109_v36, %v4630_v26  ;;  %v10218_v42 = vpop.f32.mrf.mxu0 }
 0x302   : > { %v5695_v55 = vpop.f32.mrf.mxu1  ;;  %v5354_v61 = vadd.f32 %v10117_v20, %v4628_v10  ;;  %v4273_v36 = vadd.f32 %v9918_v5, %v9976_v37  ;;  %v5357_v5 = vadd.f32 %v10131_v33, %v10101_v25 }
 0x303   : > { %v5861_v53 = vadd.f32 %v10193_v27, %v5822_v57  ;;  %v5820_v46 = vadd.f32 %v5695_v55, %v5350_v15  ;;  %v5890_v9 = vmax.f32 %v5858_v44, 0.0 }
 0x304   : > { %v7489_v0 = vpop.f32.mrf.mxu1 }
 0x305   : > { %v5893_v62 = vmax.f32 %v5861_v53, 0.0  ;;  %v5859_v38 = vadd.f32 %v10193_v27, %v5820_v46  ;;  %v5825_v50 = vadd.f32 %v7489_v0, %v5355_v22  ;;  %v4632_v53 = vadd.f32 %v10107_v6, %v4273_v36  ;;  %v10231_v46 = vpop.f32.mrf.mxu0 }
 0x306   : > { %v5708_v28 = vpop.f32.mrf.mxu1  ;;  %v4283_v36 = vadd.f32 %v9957_v34, %v10008_v24  ;;  %v10662_v24 = vld [vmem:[#allocation18_spill] sm:$0xff] }
 0x307   : > { %v5923_v3 = vpack.c.bf16 %v5893_v62, %v5892_v49  ;;  %v5891_v52 = vmax.f32 %v5859_v38, 0.0  ;;  %v5823_v56 = vadd.f32 %v5708_v28, %v5353_v7  ;;  %v5864_v32 = vadd.f32 %v10193_v27, %v5825_v50  ;;  %v10240_v38 = vpop.f32.mrf.mxu0 }
 0x308   : > { %v7490_v57 = vpop.f32.mrf.mxu1  ;;  %v5360_v7 = vadd.f32 %v10137_v1, %v4634_v41  ;;  %v4279_v62 = vadd.f32 %v9936_v8, %v9989_v39  ;;  %v4277_v1 = vadd.f32 %v9941_v60, %v9997_v58  ;;  %v5363_v39 = vadd.f32 %v10151_v12, %v10112_v21 }
 0x309   : > { %v5922_v15 = vpack.c.bf16 %v5891_v52, %v5890_v9  ;;  %v5826_v17 = vadd.f32 %v7490_v57, %v5356_v35  ;;  %v5862_v55 = vadd.f32 %v10193_v27, %v5823_v56  ;;  %v5896_v37 = vmax.f32 %v5864_v32, 0.0  ;;  %v10253_v57 = vpop.f32.mrf.mxu0 }
 0x30a   : > { %v5711_v26 = vpop.f32.mrf.mxu1  ;;  %v5358_v35 = vadd.f32 %v10145_v14, %v4632_v53  ;;  %v4638_v9 = vadd.f32 %v10119_v45, %v4279_v62  ;;  %v4636_v19 = vadd.f32 %v10121_v23, %v4277_v1  ;;  %v5361_v60 = vadd.f32 %v10159_v2, %v10115_v63 }
 0x30b   : > { %v5865_v44 = vadd.f32 %v10193_v27, %v5826_v17  ;;  %v5824_v43 = vadd.f32 %v5711_v26, %v5354_v61  ;;  %7517 = vmatprep.mubr.msk.bf16.mxu0 %vm1779_vm5, %v5922_v15  ;;  %v5894_v49 = vmax.f32 %v5862_v55, 0.0  ;;  %v10262_v26 = vpop.f32.mrf.mxu0 }
 0x30c   : > { %v7493_v20 = vpop.f32.mrf.mxu1  ;;  %7518 = vmatmul.mubr.msk.bf16.vlgmr.msra.gmra.mxu0 %vm1779_vm5, %v5923_v3  ;;  %v5364_v61 = vadd.f32 %v10165_v18, %v4638_v9  ;;  %v10661_v18 = vld [vmem:[#allocation14_spill] sm:$0xff]  ;;  %v10666_v9 = vld [vmem:[#allocation20_spill] sm:$0xff] }
 0x30d   : > { %v5897_v29 = vmax.f32 %v5865_v44, 0.0  ;;  %v5863_v22 = vadd.f32 %v10193_v27, %v5824_v43  ;;  %v5829_v10 = vadd.f32 %v7493_v20, %v5359_v48  ;;  %v5362_v43 = vadd.f32 %v10173_v51, %v4636_v19 }
 0x30e   : > { %v5724_v0 = vpop.f32.mrf.mxu1  ;;  %v4642_v48 = vadd.f32 %v10133_v30, %v4283_v36  ;;  %v4281_v53 = vadd.f32 %v10661_v18, %v10013_v4  ;;  %v10664_v30 = vld [vmem:[#allocation21_spill] sm:$0xff] }
 0x30f   : > { %v5925_v16 = vpack.c.bf16 %v5897_v29, %v5896_v37  ;;  %v5895_v11 = vmax.f32 %v5863_v22, 0.0  ;;  %v5827_v6 = vadd.f32 %v5724_v0, %v5357_v5  ;;  %v5868_v25 = vadd.f32 %v10193_v27, %v5829_v10  ;;  %v10663_v22 = vld [vmem:[#allocation19_spill] sm:$0xff]  ;;  %v7475_v0 = vpop.f32.mrf.mxu0 }
 0x310   : > { %v7494_v50 = vpop.f32.mrf.mxu1  ;;  %v5367_v29 = vadd.f32 %v10185_v47, %v10662_v24  ;;  %v4640_v10 = vadd.f32 %v10663_v22, %v4281_v53  ;;  %v5365_v4 = vadd.f32 %v10198_v59, %v10664_v30  ;;  %v5368_v62 = vadd.f32 %v10210_v31, %v4642_v48 }
 0x311   : > { %v5924_v28 = vpack.c.bf16 %v5895_v11, %v5894_v49  ;;  %v5830_v33 = vadd.f32 %v7494_v50, %v5360_v7  ;;  %v5866_v52 = vadd.f32 %v10193_v27, %v5827_v6  ;;  %v5900_v58 = vmax.f32 %v5868_v25, 0.0 }
 0x312   : > { %v5727_v3 = vpop.f32.mrf.mxu1 }
 0x313   : > { %v5869_v56 = vadd.f32 %v10193_v27, %v5830_v33  ;;  %v5828_v8 = vadd.f32 %v5727_v3, %v5358_v35  ;;  %7521 = vmatprep.mubr.msk.bf16.mxu0 %vm1779_vm5, %v5924_v28  ;;  %v5898_v41 = vmax.f32 %v5866_v52, 0.0  ;;  %v5318_v33 = vpop.f32.mrf.mxu0  ;;  %v10665_v35 = vld [vmem:[#allocation6_spill] sm:$0xff] }
 0x314   : > { %v7497_v14 = vpop.f32.mrf.mxu1  ;;  %7522 = vmatmul.mubr.msk.bf16.gmra.mxu0 %vm1779_vm5, %v5925_v16  ;;  %v4287_v1 = vadd.f32 %v10666_v9, %v10665_v35 }
 0x315   : > { %v5901_v45 = vmax.f32 %v5869_v56, 0.0  ;;  %v5867_v15 = vadd.f32 %v10193_v27, %v5828_v8  ;;  %v5833_v32 = vadd.f32 %v7497_v14, %v5363_v39  ;;  %v5366_v8 = vadd.f32 %v10218_v42, %v4640_v10  ;;  %v10667_v39 = vld [vmem:[#allocation23_spill] sm:$0xff]  ;;  %v10668_v14 = vld [vmem:[#allocation29_spill] sm:$0xff] }
 0x316   : > { %v5740_v17 = vpop.f32.mrf.mxu1  ;;  %v4646_v19 = vadd.f32 %v10667_v39, %v4287_v1 }
 0x317   : > { %v5927_v21 = vpack.c.bf16 %v5901_v45, %v5900_v58  ;;  %v5899_v12 = vmax.f32 %v5867_v15, 0.0  ;;  %v5831_v23 = vadd.f32 %v5740_v17, %v5361_v60  ;;  %v5872_v63 = vadd.f32 %v10193_v27, %v5833_v32  ;;  %v10669_v60 = vld [vmem:[#allocation4_spill] sm:$0xff]  ;;  %v10670_v17 = vld [vmem:[#allocation22_spill] sm:$0xff] }
 0x318   : > { %v7498_v55 = vpop.f32.mrf.mxu1  ;;  %v4285_v31 = vadd.f32 %v10669_v60, %v10668_v14  ;;  %v5372_v48 = vadd.f32 %v10253_v57, %v4646_v19 }
 0x319   : > { %v5926_v44 = vpack.c.bf16 %v5899_v12, %v5898_v41  ;;  %v5834_v2 = vadd.f32 %v7498_v55, %v5364_v61  ;;  %v5870_v5 = vadd.f32 %v10193_v27, %v5831_v23  ;;  %v5904_v7 = vmax.f32 %v5872_v63, 0.0  ;;  %v7476_v41 = vpop.f32.mrf.mxu0  ;;  %v10672_v23 = vld [vmem:[#allocation25_spill] sm:$0xff] }
 0x31a   : > { %v5743_v20 = vpop.f32.mrf.mxu1  ;;  %v5371_v61 = vadd.f32 %v10231_v46, %v10670_v17  ;;  %v5369_v36 = vadd.f32 %v10240_v38, %v10672_v23 }
 0x31b   : > { %v5873_v37 = vadd.f32 %v10193_v27, %v5834_v2  ;;  %v5832_v34 = vadd.f32 %v5743_v20, %v5362_v43  ;;  %7525 = vmatprep.mubr.msk.bf16.mxu0 %vm1779_vm5, %v5926_v44  ;;  %v5902_v50 = vmax.f32 %v5870_v5, 0.0  ;;  %v5321_v5 = vpop.f32.mrf.mxu0 }
 0x31c   : > { %v7501_v51 = vpop.f32.mrf.mxu1  ;;  %7526 = vmatmul.mubr.msk.bf16.gmra.mxu0 %vm1779_vm5, %v5927_v21  ;;  %v10671_v21 = vld [vmem:[#allocation28_spill] sm:$0xff] }
 0x31d   : > { %v5905_v49 = vmax.f32 %v5873_v37, 0.0  ;;  %v5871_v16 = vadd.f32 %v10193_v27, %v5832_v34  ;;  %v5837_v11 = vadd.f32 %v7501_v51, %v5367_v29  ;;  %v4644_v12 = vadd.f32 %v10671_v21, %v4285_v31  ;;  %v10673_v37 = vld [vmem:[#allocation7_spill] sm:$0xff]  ;;  %v10681_v31 = vld [vmem:[#allocation9_spill] sm:$0xff]  ;;  %v10682_v21 = vld [vmem:[#allocation16_spill] sm:$0xff] }
 0x31e   : > { %v5756_v6 = vpop.f32.mrf.mxu1  ;;  %v10674_v34 = vld [vmem:[#allocation3_spill] sm:$0xff] }
 0x31f   : > { %v5929_v28 = vpack.c.bf16 %v5905_v49, %v5904_v7  ;;  %v5903_v47 = vmax.f32 %v5871_v16, 0.0  ;;  %v5835_v25 = vadd.f32 %v5756_v6, %v5365_v4  ;;  %v5876_v59 = vadd.f32 %v10193_v27, %v5837_v11  ;;  %v10675_v4 = vld [vmem:[#allocation8_spill] sm:$0xff]  ;;  %v10676_v7 = vld [vmem:[#allocation26_spill] sm:$0xff]  ;;  %v7479_v49 = vpop.f32.mrf.mxu0 }
 0x320   : > { %v7502_v3 = vpop.f32.mrf.mxu1  ;;  %v4291_v24 = vadd.f32 %v10674_v34, %v10673_v37  ;;  %v5370_v51 = vadd.f32 %v10262_v26, %v4644_v12  ;;  %v4289_v57 = vadd.f32 %v10676_v7, %v10675_v4  ;;  %v10683_v12 = vld [vmem:[#allocation11_spill] sm:$0xff] }
 0x321   : > { %v5928_v52 = vpack.c.bf16 %v5903_v47, %v5902_v50  ;;  %v5838_v56 = vadd.f32 %v7502_v3, %v5368_v62  ;;  %v5874_v45 = vadd.f32 %v10193_v27, %v5835_v25  ;;  %v5908_v55 = vmax.f32 %v5876_v59, 0.0  ;;  %v10677_v50 = vld [vmem:[#allocation10_spill] sm:$0xff]  ;;  %v5334_v59 = vpop.f32.mrf.mxu0 }
 0x322   : > { %v5759_v58 = vpop.f32.mrf.mxu1  ;;  %v4650_v30 = vadd.f32 %v10161_v13, %v4291_v24  ;;  %v10678_v47 = vld [vmem:[#allocation30_spill] sm:$0xff]  ;;  %v10679_v13 = vld [vmem:[#allocation27_spill] sm:$0xff] }
 0x323   : > { %v5877_v15 = vadd.f32 %v10193_v27, %v5838_v56  ;;  %v5836_v32 = vadd.f32 %v5759_v58, %v5366_v8  ;;  %7529 = vmatprep.mubr.msk.bf16.mxu0 %vm1779_vm5, %v5928_v52  ;;  %v5906_v18 = vmax.f32 %v5874_v45, 0.0  ;;  %v4648_v25 = vadd.f32 %v10678_v47, %v4289_v57  ;;  %v7480_v23 = vpop.f32.mrf.mxu0 }
 0x324   : > { %v7505_v42 = vpop.f32.mrf.mxu1  ;;  %7530 = vmatmul.mubr.msk.bf16.gmra.mxu0 %vm1779_vm5, %v5929_v28  ;;  %v5375_v28 = vadd.f32 %v7475_v0, %v10677_v50  ;;  %v5373_v26 = vadd.f32 %v5318_v33, %v10679_v13  ;;  %v5376_v8 = vadd.f32 %v7476_v41, %v4650_v30  ;;  %v10680_v0 = vld [vmem:[#allocation12_spill] sm:$0xff] }
 0x325   : > { %v5909_v44 = vmax.f32 %v5877_v15, 0.0  ;;  %v5875_v63 = vadd.f32 %v10193_v27, %v5836_v32  ;;  %v5841_v2 = vadd.f32 %v7505_v42, %v5371_v61  ;;  %v4295_v58 = vadd.f32 %v10681_v31, %v10680_v0  ;;  %v5337_v34 = vpop.f32.mrf.mxu0  ;;  %v10350_v31 = vld [vmem:[%s10532_s8] ss:$0 sm:$0xff] }
 0x326   : > { %v5772_v43 = vpop.f32.mrf.mxu1  ;;  %v5374_v17 = vadd.f32 %v5321_v5, %v4648_v25  ;;  %v4293_v42 = vadd.f32 %v10683_v12, %v10682_v21 }
 0x327   : > { %v5931_v53 = vpack.c.bf16 %v5909_v44, %v5908_v55  ;;  %v5907_v46 = vmax.f32 %v5875_v63, 0.0  ;;  %v5839_v20 = vadd.f32 %v5772_v43, %v5369_v36  ;;  %v5880_v38 = vadd.f32 %v10193_v27, %v5841_v2  ;;  %v10684_v36 = vld [vmem:[#allocation15_spill] sm:$0xff]  ;;  %v10685_v43 = vld [vmem:[#allocation32_spill] sm:$0xff] }
 0x328   : > { %v7506_v29 = vpop.f32.mrf.mxu1  ;;  %v4654_v61 = vadd.f32 %v10175_v54, %v4295_v58  ;;  %v5379_v55 = vadd.f32 %v7479_v49, %v10684_v36 }
 0x329   : > { %v5930_v22 = vpack.c.bf16 %v5907_v46, %v5906_v18  ;;  %v5842_v10 = vadd.f32 %v7506_v29, %v5372_v48  ;;  %v5878_v11 = vadd.f32 %v10193_v27, %v5839_v20  ;;  %v5912_v9 = vmax.f32 %v5880_v38, 0.0 }
 0x32a   : > { %v5775_v16 = vpop.f32.mrf.mxu1  ;;  %v5377_v48 = vadd.f32 %v5334_v59, %v10685_v43  ;;  %v4652_v18 = vadd.f32 %v10179_v40, %v4293_v42  ;;  %v5380_v37 = vadd.f32 %v7480_v23, %v4654_v61 }
 0x32b   : > { %v5881_v6 = vadd.f32 %v10193_v27, %v5842_v10  ;;  %v5840_v62 = vadd.f32 %v5775_v16, %v5370_v51  ;;  %7533 = vmatprep.mubr.msk.bf16.mxu0 %vm1779_vm5, %v5930_v22  ;;  %v5910_v39 = vmax.f32 %v5878_v11, 0.0 }
 0x32c   : > { %v7509_v35 = vpop.f32.mrf.mxu1  ;;  %7534 = vmatmul.mubr.msk.bf16.gmra.mxu0 %vm1779_vm5, %v5931_v53  ;;  %v5378_v30 = vadd.f32 %v5337_v34, %v4652_v18 }
 0x32d   : > { %v5913_v1 = vmax.f32 %v5881_v6, 0.0  ;;  %v5879_v3 = vadd.f32 %v10193_v27, %v5840_v62  ;;  %v5845_v52 = vadd.f32 %v7509_v35, %v5375_v28 }
 0x32e   : > { %v5788_v56 = vpop.f32.mrf.mxu1 }
 0x32f   : > { %v5933_v19 = vpack.c.bf16 %v5913_v1, %v5912_v9  ;;  %v5911_v14 = vmax.f32 %v5879_v3, 0.0  ;;  %v5843_v60 = vadd.f32 %v5788_v56, %v5373_v26  ;;  %v5884_v32 = vadd.f32 %v10193_v27, %v5845_v52 }
 0x330   : > { %v7510_v45 = vpop.f32.mrf.mxu1 }
 0x331   : > { %v5932_v15 = vpack.c.bf16 %v5911_v14, %v5910_v39  ;;  %v5846_v33 = vadd.f32 %v7510_v45, %v5376_v8  ;;  %v5882_v44 = vadd.f32 %v10193_v27, %v5843_v60  ;;  %v5916_v54 = vmax.f32 %v5884_v32, 0.0  ;;  %v10357_v45 = vld [vmem:[%s10530_s6] ss:$0 sm:$0xff] }
 0x332   : > { %v5791_v41 = vpop.f32.mrf.mxu1 }
 0x333   : > { %v5885_v63 = vadd.f32 %v10193_v27, %v5846_v33  ;;  %v5844_v2 = vadd.f32 %v5791_v41, %v5374_v17  ;;  %7537 = vmatprep.mubr.msk.bf16.mxu0 %vm1779_vm5, %v5932_v15  ;;  %v5914_v29 = vmax.f32 %v5882_v44, 0.0 }
 0x334   : > { %v7513_v53 = vpop.f32.mrf.mxu1  ;;  %7538 = vmatmul.mubr.msk.bf16.gmra.mxu0 %vm1779_vm5, %v5933_v19 }
 0x335   : > { %v5917_v46 = vmax.f32 %v5885_v63, 0.0  ;;  %v5883_v20 = vadd.f32 %v10193_v27, %v5844_v2  ;;  %v5849_v5 = vadd.f32 %v7513_v53, %v5379_v55 }
 0x336   : > { %v5804_v24 = vpop.f32.mrf.mxu1 }
 0x337   : > { %v5935_v22 = vpack.c.bf16 %v5917_v46, %v5916_v54  ;;  %v5915_v38 = vmax.f32 %v5883_v20, 0.0  ;;  %v5847_v10 = vadd.f32 %v5804_v24, %v5377_v48  ;;  %v5888_v40 = vadd.f32 %v10193_v27, %v5849_v5 }
 0x338   : > { %v7514_v51 = vpop.f32.mrf.mxu1 }
 0x339   : > { %v5934_v4 = vpack.c.bf16 %v5915_v38, %v5914_v29  ;;  %v5850_v7 = vadd.f32 %v7514_v51, %v5380_v37  ;;  %v5886_v49 = vadd.f32 %v10193_v27, %v5847_v10  ;;  %v5920_v6 = vmax.f32 %v5888_v40, 0.0 }
 0x33a   : > { %v5807_v57 = vpop.f32.mrf.mxu1 }
 0x33b   : > { %v5889_v16 = vadd.f32 %v10193_v27, %v5850_v7  ;;  %v5848_v11 = vadd.f32 %v5807_v57, %v5378_v30  ;;  %7541 = vmatprep.mubr.msk.bf16.mxu0 %vm1779_vm5, %v5934_v4  ;;  %v5918_v28 = vmax.f32 %v5886_v49, 0.0 }
 0x33c   : > { %7542 = vmatmul.mubr.msk.bf16.gmra.mxu0 %vm1779_vm5, %v5935_v22  ;;  %v7553_v13 = vpop.f32.mrf.mxu1 }
 0x33d   : > { %v5921_v62 = vmax.f32 %v5889_v16, 0.0  ;;  %v5887_v50 = vadd.f32 %v10193_v27, %v5848_v11  ;;  %v6212_v15 = vadd.f32 %v7553_v13, %v10350_v31 }
 0x33e   : > { %v6203_v26 = vpop.f32.mrf.mxu1 }
 0x33f   : > { %v5937_v47 = vpack.c.bf16 %v5921_v62, %v5920_v6  ;;  %v5919_v25 = vmax.f32 %v5887_v50, 0.0  ;;  %v6204_v21 = vadd.f32 %v10350_v31, %v6203_v26 }
 0x340   : > { %v7554_v9 = vpop.f32.mrf.mxu1 }
 0x341   : > { %v5936_v35 = vpack.c.bf16 %v5919_v25, %v5918_v28  ;;  %v6215_v36 = vadd.f32 %v7554_v9, %v10350_v31 }
 0x342   : > { %v6206_v1 = vpop.f32.mrf.mxu1 }
 0x343   : > { %7545 = vmatprep.mubr.msk.bf16.mxu0 %vm1779_vm5, %v5936_v35  ;;  %v6207_v2 = vadd.f32 %v10350_v31, %v6206_v1 }
 0x344   : > { %7546 = vmatmul.mubr.msk.bf16.gmra.mxu0 %vm1779_vm5, %v5937_v47  ;;  %v7557_v3 = vpop.f32.mrf.mxu1 }
 0x345   : > { %v6228_v18 = vadd.f32 %v7557_v3, %v10350_v31 }
 0x346   : > { %v6219_v52 = vpop.f32.mrf.mxu1 }
 0x347   : > { %v6220_v29 = vadd.f32 %v10350_v31, %v6219_v52 }
 0x348   : > { %v7558_v59 = vpop.f32.mrf.mxu1 }
 0x349   : > { %v6231_v4 = vadd.f32 %v7558_v59, %v10350_v31 }
 0x34a   : > { %v6222_v56 = vpop.f32.mrf.mxu1 }
 0x34b   : > { %v6223_v49 = vadd.f32 %v10350_v31, %v6222_v56 }
 0x34c   : > { %v7561_v8 = vpop.f32.mrf.mxu1 }
 0x34d   : > { %v6244_v6 = vadd.f32 %v7561_v8, %v10350_v31 }
 0x34e   : > { %v10335_v39 = vpop.f32.mrf.mxu1 }
 0x34f   : > { %v6236_v9 = vadd.f32 %v10350_v31, %v10335_v39 }
 0x350   : > { %v10337_v27 = vpop.f32.mrf.mxu1 }
 0x351   : > { %v6247_v8 = vadd.f32 %v10337_v27, %v10350_v31 }
 0x352   : > { %v10339_v19 = vpop.f32.mrf.mxu1 }
 0x353   : > { %v6239_v39 = vadd.f32 %v10350_v31, %v10339_v19 }
 0x354   : > { %v10341_v14 = vpop.f32.mrf.mxu1 }
 0x356   : > { %v10343_v60 = vpop.f32.mrf.mxu1 }
 0x358   : > { %v10345_v0 = vpop.f32.mrf.mxu1 }
 0x35a   : > { %v10352_v58 = vpop.f32.mrf.mxu1 }
 0x35c   : > { %v10360_v33 = vpop.f32.mrf.mxu1 }
 0x35e   : > { %v10371_v41 = vpop.f32.mrf.mxu1 }
 0x360   : > { %v10380_v20 = vpop.f32.mrf.mxu1 }
 0x362   : > { %v10389_v30 = vpop.f32.mrf.mxu1 }
 0x364   : > { %v10400_v47 = vpop.f32.mrf.mxu1 }
 0x366   : > { %v10410_v56 = vpop.f32.mrf.mxu1 }
 0x3cc   : > { %v7519_v32 = vpop.f32.mrf.mxu0 }
 0x3cd   : > { %v6040_v17 = vadd.f32 %v7519_v32, %v10357_v45 }
 0x3ce   : > { %v6031_v61 = vpop.f32.mrf.mxu0 }
 0x3cf   : > { %v6332_v12 = vadd.f32 %v6212_v15, %v6040_v17  ;;  %v6032_v42 = vadd.f32 %v10357_v45, %v6031_v61 }
 0x3d0   : > { %v7520_v23 = vpop.f32.mrf.mxu0 }
 0x3d1   : > { %v6364_v55 = vmax.f32 %v6332_v12, 0.0  ;;  %v6330_v44 = vadd.f32 %v6204_v21, %v6032_v42  ;;  %v6043_v63 = vadd.f32 %v7520_v23, %v10357_v45  ;;  %v6260_v12 = vadd.f32 %v10341_v14, %v10350_v31 }
 0x3d2   : > { %v6034_v43 = vpop.f32.mrf.mxu0  ;;  %v6252_v14 = vadd.f32 %v10350_v31, %v10343_v60  ;;  %v6255_v60 = vadd.f32 %v10350_v31, %v10352_v58 }
 0x3d3   : > { %6397 = vst.msk [vmem:[%s10369_s17 + $0x10] sm:$0xff] %vm6394_vm0, %v6364_v55  ;;  %v6362_v48 = vmax.f32 %v6330_v44, 0.0  ;;  %v6333_v53 = vadd.f32 %v6215_v36, %v6043_v63  ;;  %v6035_v54 = vadd.f32 %v10357_v45, %v6034_v43  ;;  %v10424_v36 = vpop.f32.mrf.mxu1 }
 0x3d4   : > { %v7523_v46 = vpop.f32.mrf.mxu0 }
 0x3d5   : > { %6395 = vst.msk [vmem:[%s10369_s17] sm:$0xff] %vm6394_vm0, %v6362_v48  ;;  %v6365_v5 = vmax.f32 %v6333_v53, 0.0  ;;  %v6331_v37 = vadd.f32 %v6207_v2, %v6035_v54  ;;  %v6056_v34 = vadd.f32 %v7523_v46, %v10357_v45  ;;  %v6286_v53 = vpop.f32.mrf.mxu1  ;;  %v6263_v54 = vadd.f32 %v10345_v0, %v10350_v31 }
 0x3d6   : > { %v6047_v24 = vpop.f32.mrf.mxu0 }
 0x3d7   : > { %6398 = vst.msk [vmem:[%s10369_s17 + $0x18] sm:$0xff] %vm6394_vm0, %v6365_v5  ;;  %v6363_v22 = vmax.f32 %v6331_v37, 0.0  ;;  %v6336_v38 = vadd.f32 %v6228_v18, %v6056_v34  ;;  %v6048_v10 = vadd.f32 %v10357_v45, %v6047_v24 }
 0x3d8   : > { %v7524_v51 = vpop.f32.mrf.mxu0 }
 0x3d9   : > { %6396 = vst.msk [vmem:[%s10369_s17 + $0x8] sm:$0xff] %vm6394_vm0, %v6363_v22  ;;  %v6368_v40 = vmax.f32 %v6336_v38, 0.0  ;;  %v6334_v7 = vadd.f32 %v6220_v29, %v6048_v10  ;;  %v6059_v57 = vadd.f32 %v7524_v51, %v10357_v45  ;;  %v6276_v29 = vadd.f32 %v10360_v33, %v10350_v31  ;;  %v7577_v10 = vpop.f32.mrf.mxu1 }
 0x3da   : > { %v6050_v16 = vpop.f32.mrf.mxu0 }
 0x3db   : > { %6401 = vst.msk [vmem:[%s10369_s17 + $0x30] sm:$0xff] %vm6394_vm0, %v6368_v40  ;;  %v6366_v11 = vmax.f32 %v6334_v7, 0.0  ;;  %v6337_v62 = vadd.f32 %v6231_v4, %v6059_v57  ;;  %v6051_v50 = vadd.f32 %v10357_v45, %v6050_v16  ;;  %v6268_v7 = vadd.f32 %v10350_v31, %v10371_v41 }
 0x3dc   : > { %v7527_v28 = vpop.f32.mrf.mxu0  ;;  %v6271_v41 = vadd.f32 %v10350_v31, %v10389_v30 }
 0x3dd   : > { %6399 = vst.msk [vmem:[%s10369_s17 + $0x20] sm:$0xff] %vm6394_vm0, %v6366_v11  ;;  %v6369_v25 = vmax.f32 %v6337_v62, 0.0  ;;  %v6335_v35 = vadd.f32 %v6223_v49, %v6051_v50  ;;  %v6072_v13 = vadd.f32 %v7527_v28, %v10357_v45  ;;  %v6299_v11 = vpop.f32.mrf.mxu1 }
 0x3de   : > { %v6063_v26 = vpop.f32.mrf.mxu0 }
 0x3df   : > { %6402 = vst.msk [vmem:[%s10369_s17 + $0x38] sm:$0xff] %vm6394_vm0, %v6369_v25  ;;  %v6367_v1 = vmax.f32 %v6335_v35, 0.0  ;;  %v6340_v3 = vadd.f32 %v6244_v6, %v6072_v13  ;;  %v6064_v52 = vadd.f32 %v10357_v45, %v6063_v26  ;;  %v6279_v6 = vadd.f32 %v10380_v20, %v10350_v31 }
 0x3e0   : > { %v7528_v59 = vpop.f32.mrf.mxu0  ;;  %v6292_v13 = vadd.f32 %v10400_v47, %v10350_v31 }
 0x3e1   : > { %6400 = vst.msk [vmem:[%s10369_s17 + $0x28] sm:$0xff] %vm6394_vm0, %v6367_v1  ;;  %v6372_v15 = vmax.f32 %v6340_v3, 0.0  ;;  %v6338_v32 = vadd.f32 %v6236_v9, %v6064_v52  ;;  %v6075_v17 = vadd.f32 %v7528_v59, %v10357_v45  ;;  %v7578_v1 = vpop.f32.mrf.mxu1 }
 0x3e2   : > { %v6066_v61 = vpop.f32.mrf.mxu0 }
 0x3e3   : > { %6405 = vst.msk [vmem:[%s10369_s17 + $0x50] sm:$0xff] %vm6394_vm0, %v6372_v15  ;;  %v6370_v21 = vmax.f32 %v6338_v32, 0.0  ;;  %v6341_v42 = vadd.f32 %v6247_v8, %v6075_v17  ;;  %v6067_v23 = vadd.f32 %v10357_v45, %v6066_v61  ;;  %v6284_v8 = vadd.f32 %v10350_v31, %v10410_v56 }
 0x3e4   : > { %v7531_v27 = vpop.f32.mrf.mxu0  ;;  %v6295_v61 = vadd.f32 %v10424_v36, %v10350_v31 }
 0x3e5   : > { %6403 = vst.msk [vmem:[%s10369_s17 + $0x40] sm:$0xff] %vm6394_vm0, %v6370_v21  ;;  %v6373_v55 = vmax.f32 %v6341_v42, 0.0  ;;  %v6339_v44 = vadd.f32 %v6239_v39, %v6067_v23  ;;  %v6088_v19 = vadd.f32 %v7531_v27, %v10357_v45  ;;  %v6302_v39 = vpop.f32.mrf.mxu1  ;;  %v6287_v23 = vadd.f32 %v10350_v31, %v6286_v53 }
 0x3e6   : > { %v6079_v63 = vpop.f32.mrf.mxu0 }
 0x3e7   : > { %6406 = vst.msk [vmem:[%s10369_s17 + $0x58] sm:$0xff] %vm6394_vm0, %v6373_v55  ;;  %v6371_v2 = vmax.f32 %v6339_v44, 0.0  ;;  %v6344_v43 = vadd.f32 %v6260_v12, %v6088_v19  ;;  %v6080_v48 = vadd.f32 %v10357_v45, %v6079_v63  ;;  %v6308_v55 = vadd.f32 %v7577_v10, %v10350_v31 }
 0x3e8   : > { %v7532_v18 = vpop.f32.mrf.mxu0 }
 0x3e9   : > { %6404 = vst.msk [vmem:[%s10369_s17 + $0x48] sm:$0xff] %vm6394_vm0, %v6371_v2  ;;  %v6376_v46 = vmax.f32 %v6344_v43, 0.0  ;;  %v6342_v5 = vadd.f32 %v6252_v14, %v6080_v48  ;;  %v6091_v37 = vadd.f32 %v7532_v18, %v10357_v45  ;;  %v7581_v14 = vpop.f32.mrf.mxu1  ;;  %v6300_v18 = vadd.f32 %v10350_v31, %v6299_v11 }
 0x3ea   : > { %v6082_v34 = vpop.f32.mrf.mxu0  ;;  %v6324_v10 = vadd.f32 %v7581_v14, %v10350_v31 }
 0x3eb   : > { %6409 = vst.msk [vmem:[%s10369_s17 + $0x70] sm:$0xff] %vm6394_vm0, %v6376_v46  ;;  %v6374_v24 = vmax.f32 %v6342_v5, 0.0  ;;  %v6345_v22 = vadd.f32 %v6263_v54, %v6091_v37  ;;  %v6083_v38 = vadd.f32 %v10357_v45, %v6082_v34  ;;  %v6315_v37 = vpop.f32.mrf.mxu1 }
 0x3ec   : > { %v7535_v0 = vpop.f32.mrf.mxu0 }
 0x3ed   : > { %6407 = vst.msk [vmem:[%s10369_s17 + $0x60] sm:$0xff] %vm6394_vm0, %v6374_v24  ;;  %v6377_v51 = vmax.f32 %v6345_v22, 0.0  ;;  %v6343_v4 = vadd.f32 %v6255_v60, %v6083_v38  ;;  %v6104_v40 = vadd.f32 %v7535_v0, %v10357_v45  ;;  %v6311_v60 = vadd.f32 %v7578_v1, %v10350_v31 }
 0x3ee   : > { %v6095_v58 = vpop.f32.mrf.mxu0  ;;  %v6303_v22 = vadd.f32 %v10350_v31, %v6302_v39 }
 0x3ef   : > { %6410 = vst.msk [vmem:[%s10369_s17 + $0x78] sm:$0xff] %vm6394_vm0, %v6377_v51  ;;  %v6375_v33 = vmax.f32 %v6343_v4, 0.0  ;;  %v6348_v57 = vadd.f32 %v6276_v29, %v6104_v40  ;;  %v6096_v49 = vadd.f32 %v10357_v45, %v6095_v58  ;;  %v7582_v40 = vpop.f32.mrf.mxu1 }
 0x3f0   : > { %v7536_v16 = vpop.f32.mrf.mxu0 }
 0x3f1   : > { %6408 = vst.msk [vmem:[%s10369_s17 + $0x68] sm:$0xff] %vm6394_vm0, %v6375_v33  ;;  %v6380_v62 = vmax.f32 %v6348_v57, 0.0  ;;  %v6346_v50 = vadd.f32 %v6268_v7, %v6096_v49  ;;  %v6107_v28 = vadd.f32 %v7536_v16, %v10357_v45  ;;  %v6316_v16 = vadd.f32 %v10350_v31, %v6315_v37 }
 0x3f2   : > { %v6098_v25 = vpop.f32.mrf.mxu0 }
 0x3f3   : > { %6413 = vst.msk [vmem:[%s10369_s17 + $0x90] sm:$0xff] %vm6394_vm0, %v6380_v62  ;;  %v6378_v35 = vmax.f32 %v6346_v50, 0.0  ;;  %v6349_v26 = vadd.f32 %v6279_v6, %v6107_v28  ;;  %v6099_v9 = vadd.f32 %v10357_v45, %v6098_v25  ;;  %v6318_v50 = vpop.f32.mrf.mxu1 }
 0x3f4   : > { %v7539_v20 = vpop.f32.mrf.mxu0 }
 0x3f5   : > { %6411 = vst.msk [vmem:[%s10369_s17 + $0x80] sm:$0xff] %vm6394_vm0, %v6378_v35  ;;  %v6381_v3 = vmax.f32 %v6349_v26, 0.0  ;;  %v6347_v52 = vadd.f32 %v6271_v41, %v6099_v9  ;;  %v6120_v59 = vadd.f32 %v7539_v20, %v10357_v45  ;;  %v6327_v41 = vadd.f32 %v7582_v40, %v10350_v31 }
 0x3f6   : > { %v6111_v30 = vpop.f32.mrf.mxu0  ;;  %v6319_v9 = vadd.f32 %v10350_v31, %v6318_v50 }
 0x3f7   : > { %6414 = vst.msk [vmem:[%s10369_s17 + $0x98] sm:$0xff] %vm6394_vm0, %v6381_v3  ;;  %v6379_v47 = vmax.f32 %v6347_v52, 0.0  ;;  %v6352_v15 = vadd.f32 %v6292_v13, %v6120_v59  ;;  %v6112_v32 = vadd.f32 %v10357_v45, %v6111_v30 }
 0x3f8   : > { %v7540_v17 = vpop.f32.mrf.mxu0 }
 0x3f9   : > { %6412 = vst.msk [vmem:[%s10369_s17 + $0x88] sm:$0xff] %vm6394_vm0, %v6379_v47  ;;  %v6384_v21 = vmax.f32 %v6352_v15, 0.0  ;;  %v6350_v12 = vadd.f32 %v6284_v8, %v6112_v32  ;;  %v6123_v42 = vadd.f32 %v7540_v17, %v10357_v45 }
 0x3fa   : > { %v6114_v56 = vpop.f32.mrf.mxu0 }
 0x3fb   : > { %6417 = vst.msk [vmem:[%s10369_s17 + $0xb0] sm:$0xff] %vm6394_vm0, %v6384_v21  ;;  %v6382_v27 = vmax.f32 %v6350_v12, 0.0  ;;  %v6353_v44 = vadd.f32 %v6295_v61, %v6123_v42  ;;  %v6115_v19 = vadd.f32 %v10357_v45, %v6114_v56 }
 0x3fc   : > { %v7543_v63 = vpop.f32.mrf.mxu0 }
 0x3fd   : > { %6415 = vst.msk [vmem:[%s10369_s17 + $0xa0] sm:$0xff] %vm6394_vm0, %v6382_v27  ;;  %v6385_v36 = vmax.f32 %v6353_v44, 0.0  ;;  %v6351_v2 = vadd.f32 %v6287_v23, %v6115_v19  ;;  %v6136_v43 = vadd.f32 %v7543_v63, %v10357_v45 }
 0x3fe   : > { %v6127_v48 = vpop.f32.mrf.mxu0 }
 0x3ff   : > { %6418 = vst.msk [vmem:[%s10369_s17 + $0xb8] sm:$0xff] %vm6394_vm0, %v6385_v36  ;;  %v6383_v53 = vmax.f32 %v6351_v2, 0.0  ;;  %v6356_v54 = vadd.f32 %v6308_v55, %v6136_v43  ;;  %v6128_v46 = vadd.f32 %v10357_v45, %v6127_v48 }
 0x400   : > { %v7544_v5 = vpop.f32.mrf.mxu0 }
 0x401   : > { %6416 = vst.msk [vmem:[%s10369_s17 + $0xa8] sm:$0xff] %vm6394_vm0, %v6383_v53  ;;  %v6388_v34 = vmax.f32 %v6356_v54, 0.0  ;;  %v6354_v24 = vadd.f32 %v6300_v18, %v6128_v46  ;;  %v6139_v29 = vadd.f32 %v7544_v5, %v10357_v45 }
 0x402   : > { %v6130_v38 = vpop.f32.mrf.mxu0 }
 0x403   : > { %6421 = vst.msk [vmem:[%s10369_s17 + $0xd0] sm:$0xff] %vm6394_vm0, %v6388_v34  ;;  %v6386_v0 = vmax.f32 %v6354_v24, 0.0  ;;  %v6357_v51 = vadd.f32 %v6311_v60, %v6139_v29  ;;  %v6131_v4 = vadd.f32 %v10357_v45, %v6130_v38 }
 0x404   : > { %v7547_v58 = vpop.f32.mrf.mxu0 }
 0x405   : > { %6419 = vst.msk [vmem:[%s10369_s17 + $0xc0] sm:$0xff] %vm6394_vm0, %v6386_v0  ;;  %v6389_v7 = vmax.f32 %v6357_v51, 0.0  ;;  %v6355_v33 = vadd.f32 %v6303_v22, %v6131_v4  ;;  %v6152_v57 = vadd.f32 %v7547_v58, %v10357_v45 }
 0x406   : > { %v6143_v49 = vpop.f32.mrf.mxu0 }
 0x407   : > { %6422 = vst.msk [vmem:[%s10369_s17 + $0xd8] sm:$0xff] %vm6394_vm0, %v6389_v7  ;;  %v6387_v11 = vmax.f32 %v6355_v33, 0.0  ;;  %v6360_v6 = vadd.f32 %v6324_v10, %v6152_v57  ;;  %v6144_v62 = vadd.f32 %v10357_v45, %v6143_v49 }
 0x408   : > { %v7548_v28 = vpop.f32.mrf.mxu0 }
 0x409   : > { %6420 = vst.msk [vmem:[%s10369_s17 + $0xc8] sm:$0xff] %vm6394_vm0, %v6387_v11  ;;  %v6392_v25 = vmax.f32 %v6360_v6, 0.0  ;;  %v6358_v35 = vadd.f32 %v6316_v16, %v6144_v62  ;;  %v6155_v13 = vadd.f32 %v7548_v28, %v10357_v45 }
 0x40a   : > { %v6146_v26 = vpop.f32.mrf.mxu0 }
 0x40b   : > { %6425 = vst.msk [vmem:[%s10369_s17 + $0xf0] sm:$0xff] %vm6394_vm0, %v6392_v25  ;;  %v6390_v20 = vmax.f32 %v6358_v35, 0.0  ;;  %v6361_v1 = vadd.f32 %v6327_v41, %v6155_v13  ;;  %v6147_v3 = vadd.f32 %v10357_v45, %v6146_v26 }
 0x40d   : > { %6423 = vst.msk [vmem:[%s10369_s17 + $0xe0] sm:$0xff] %vm6394_vm0, %v6390_v20  ;;  %v6393_v52 = vmax.f32 %v6361_v1, 0.0  ;;  %v6359_v59 = vadd.f32 %v6319_v9, %v6147_v3 }
 0x40f   : > { %6426 = vst.msk [vmem:[%s10369_s17 + $0xf8] sm:$0xff] %vm6394_vm0, %v6393_v52  ;;  %v6391_v30 = vmax.f32 %v6359_v59, 0.0 }
 0x411   : > { %6424 = vst.msk [vmem:[%s10369_s17 + $0xe8] sm:$0xff] %vm6394_vm0, %v6391_v30 }
 0x412 PF: > { %s19_s30 = sadd.s32 1, %s7698_s30  }
 0x413   : > { %p16_p4 = scmp.ge.s32.totalorder %s19_s30, 4  }
 0x415   :  { %18 = sbr.rel (!%p16_p4) target bundleno = 1 (0x1), region = 96 }

</bundles_post_ra>
